<compile_context>
chip_gen: v5e
topology: v5e:2x2
jax: 0.10.0
libtpu: 0.0.40
codegen_flags: <defaults>
</compile_context>

<pallas_src>
import functools

import jax
import jax.numpy as jnp
from jax import lax
from jax.experimental import pallas as pl
from jax.experimental.pallas import tpu as pltpu

LANE = 128                      # lane padding for Cout (lane-dense output tiles)
TARGET_ROWS = 1024              # ~rows of the per-step matmul LHS (TH * Wo)
VMEM_LIMIT = 32 * 1024 * 1024   # conservative; fits v7x's 64 MiB/TC (raise on v5e/v6e if tiles grow)


def conv_block_forward(x, weight, bias, gamma, beta, *, stride=1, padding=1, eps=1e-5):
    """Conv2d(+bias) -> BatchNorm2d(training batch stats) -> ReLU.

    `bias` is accepted for API parity with nn.Conv2d but is mathematically cancelled by
    the training-mode BatchNorm right after the conv (mean shifts by the same constant,
    variance unchanged).  NOTE: dropping the bias is also what makes zero-input output
    rows contribute exactly 0 to the batch statistics — do NOT re-introduce a per-channel
    add inside the conv kernel without also masking the stats.
    """
    del bias
    f32, bf16 = jnp.float32, jnp.bfloat16

    N, Cin, H, W = x.shape
    Cout, _, kh, kw = weight.shape
    Ho = (H + 2 * padding - kh) // stride + 1
    Wo = (W + 2 * padding - kw) // stride + 1
    M = N * Ho * Wo

    # ---- tiling over output rows ----
    TH = max(1, min(Ho, TARGET_ROWS // max(1, Wo)))
    # v7x: make sure there are at least 2 parallel grid blocks to feed both TensorCores.
    if N * pl.cdiv(Ho, TH) < 2 and Ho > 1:
        TH = pl.cdiv(Ho, 2)
    n_hb = pl.cdiv(Ho, TH)
    Ho_pad = n_hb * TH
    C_pad = pl.cdiv(Cout, LANE) * LANE

    # ---- glue: NCHW -> padded NHWC bf16 (single ~1x-input XLA pass, no patch matrix) ----
    Wp = W + 2 * padding
    Hp = max(H + 2 * padding, (Ho_pad - 1) * stride + kh)   # extra zero rows for ragged Ho
    xp = jnp.pad(
        x.transpose(0, 2, 3, 1).astype(bf16),
        ((0, 0), (padding, Hp - H - padding), (padding, padding), (0, 0)))
    # weight [Cout, Cin, kh, kw] -> [kh*kw, Cin, C_pad] bf16 (tap-major), zero-padded channels
    wk = weight.astype(bf16).transpose(2, 3, 1, 0).reshape(kh * kw, Cin, Cout)
    wk = jnp.pad(wk, ((0, 0), (0, 0), (0, C_pad - Cout)))

    # ---- fused im2col conv + per-tile BN statistics kernel ----
    def conv_bn_stats_kernel(x_ref, w_ref, y_ref, st_ref):
        # x_ref:  [1, Hp, Wp, Cin] bf16   (whole padded image for batch n; resident across row-blocks)
        # w_ref:  [kh*kw, Cin, C_pad] bf16 (fully resident weight slab)
        # y_ref:  [1, TH, Wo, C_pad] bf16  (conv intermediate, NHWC)
        # st_ref: [1, 2, C_pad] f32        (row 0 = channel sum, row 1 = channel sumsq)
        j = pl.program_id(1)
        row0 = j * (TH * stride)

        acc = jnp.zeros((TH * Wo, C_pad), jnp.float32)
        for t in range(kh * kw):                      # static unrolled tap loop
            dh, dw = t // kw, t % kw
            if stride == 1:
                xs = x_ref[0, pl.ds(row0 + dh, TH), pl.ds(dw, Wo), :]
            else:
                # TODO(synk): verify strided pl.ds lowering for stride>1 on all TPU gens.
                xs = x_ref[0, pl.ds(row0 + dh, TH, stride), pl.ds(dw, Wo, stride), :]
            acc += jnp.dot(xs.reshape(TH * Wo, Cin), w_ref[t],
                           preferred_element_type=jnp.float32)

        yb = acc.astype(y_ref.dtype)                  # bf16 conv intermediate (halved HBM)
        y_ref[0] = yb.reshape(TH, Wo, C_pad)

        # Stats from the bf16-rounded values so the BN epilogue normalizes exactly what
        # the stats describe.  Zero-weight padded channels and (masked) padded rows
        # contribute exactly 0.
        y32 = yb.astype(jnp.float32)
        if Ho % TH != 0:
            ho = j * TH + lax.broadcasted_iota(jnp.int32, (TH * Wo, 1), 0) // Wo
            y32 = jnp.where(ho < Ho, y32, 0.0)
        s = jnp.sum(y32, axis=0, keepdims=True)           # [1, C_pad]
        sq = jnp.sum(y32 * y32, axis=0, keepdims=True)    # [1, C_pad]
        st_ref[0] = jnp.concatenate([s, sq], axis=0)      # [2, C_pad]

    y, st = pl.pallas_call(
        conv_bn_stats_kernel,
        out_shape=(jax.ShapeDtypeStruct((N, Ho_pad, Wo, C_pad), bf16),
                   jax.ShapeDtypeStruct((N * n_hb, 2, C_pad), f32)),
        grid=(N, n_hb),
        in_specs=[
            # whole padded image per batch element; constant across the row-block axis,
            # so Pallas fetches it from HBM only when n changes.
            pl.BlockSpec((1, Hp, Wp, Cin), lambda n, j: (n, 0, 0, 0)),
            # fully resident weight slab (fetched once).
            pl.BlockSpec((kh * kw, Cin, C_pad), lambda n, j: (0, 0, 0)),
        ],
        out_specs=(
            pl.BlockSpec((1, TH, Wo, C_pad), lambda n, j: (n, j, 0, 0)),
            pl.BlockSpec((1, 2, C_pad), lambda n, j: (n * n_hb + j, 0, 0)),
        ),
        compiler_params=pltpu.CompilerParams(
            dimension_semantics=("parallel", "parallel"),
            vmem_limit_bytes=VMEM_LIMIT),
    )(xp, wk)

    # ---- tiny glue reduce: batch mean / biased variance -> BN scale/shift ----
    csum = jnp.sum(st[:, 0, :Cout], axis=0)
    csq = jnp.sum(st[:, 1, :Cout], axis=0)
    mean = csum / float(M)
    # E[y^2] - E[y]^2 in f32 can cancel for large-mean channels; clamp before rsqrt.
    var = jnp.maximum(csq / float(M) - mean * mean, 0.0)
    scale = gamma.astype(f32) * lax.rsqrt(var + eps)
    shift = beta.astype(f32) - mean * scale

    # ---- epilogue: BN affine + ReLU + NCHW transpose, fused by XLA into one HBM pass ----
    yv = y[:, :Ho, :, :Cout].astype(f32)
    out = jnp.maximum(yv * scale[None, None, None, :] + shift[None, None, None, :], 0.0)
    return out.transpose(0, 3, 1, 2)                 # NCHW f32, matches the PyTorch module


def _reference(x, weight, bias, gamma, beta, *, stride=1, padding=1, eps=1e-5):
    conv = lax.conv_general_dilated(
        x, weight, (stride, stride), [(padding, padding), (padding, padding)],
        dimension_numbers=("NCHW", "OIHW", "NCHW")) + bias[None, :, None, None]
    mean = conv.mean(axis=(0, 2, 3), keepdims=True)
    var = conv.var(axis=(0, 2, 3), keepdims=True)    # biased, like PyTorch training BN
    y = (conv - mean) * lax.rsqrt(var + eps) * gamma[None, :, None, None] + beta[None, :, None, None]
    return jnp.maximum(y, 0.0)


if __name__ == "__main__":
    key = jax.random.PRNGKey(0)
    kx, kw_, kb, kg, kbeta = jax.random.split(key, 5)

    N, Cin, H, W = 2, 4, 16, 16
    Cout, kh, kwid = 8, 3, 3
    stride, padding = 1, 1

    x = jax.random.normal(kx, (N, Cin, H, W), dtype=jnp.float32)
    weight = jax.random.normal(kw_, (Cout, Cin, kh, kwid), dtype=jnp.float32) * 0.1
    bias = jax.random.normal(kb, (Cout,), dtype=jnp.float32) * 0.1
    gamma = 1.0 + 0.1 * jax.random.normal(kg, (Cout,), dtype=jnp.float32)
    beta = 0.1 * jax.random.normal(kbeta, (Cout,), dtype=jnp.float32)

    fwd = jax.jit(functools.partial(conv_block_forward, stride=stride, padding=padding))
    out = jax.block_until_ready(fwd(x, weight, bias, gamma, beta))

    ref = _reference(x, weight, bias, gamma, beta, stride=stride, padding=padding)
    assert out.shape == ref.shape == (N, Cout, H, W)
    # bf16 matmul inputs + bf16 conv intermediate -> bf16-class tolerance vs f32 reference
    err = float(jnp.max(jnp.abs(out - ref)))
    assert jnp.allclose(out, ref, atol=5e-2, rtol=5e-2), err

    print("KERNEL_OK")
</pallas_src>

<mosaic_0001>
module attributes {stable_mosaic.version = 11 : i64} {
  func.func @conv_bn_stats_kernel(%arg0: i32, %arg1: i32, %arg2: memref<1x18x18x4xbf16, #tpu.memory_space<vmem>>, %arg3: memref<9x4x128xbf16, #tpu.memory_space<vmem>>, %arg4: memref<1x16x16x128xbf16, #tpu.memory_space<vmem>>, %arg5: memref<1x2x128xf32, #tpu.memory_space<vmem>>) attributes {dimension_semantics = [#tpu.dimension_semantics<parallel>, #tpu.dimension_semantics<parallel>], iteration_bounds = array<i64: 2, 1>, scalar_prefetch = 0 : i64, scratch_operands = 0 : i64, tpu.core_type = #tpu.core_type<tc>, window_params = [{transform_indices = @transform_0, window_bounds = array<i64: 1, 18, 18, 4>}, {pipeline_mode = #tpu.pipeline_mode<synchronous>, transform_indices = @transform_1, window_bounds = array<i64: 9, 4, 128>}, {transform_indices = @transform_2, window_bounds = array<i64: 1, 16, 16, 128>}, {transform_indices = @transform_3, window_bounds = array<i64: 1, 2, 128>}]} {
    %c16_i32 = arith.constant 16 : i32
    %0 = arith.muli %arg1, %c16_i32 : i32
    %cst = arith.constant 0.000000e+00 : f32
    %1 = vector.broadcast %cst : f32 to vector<256x128xf32>
    %c0_i32 = arith.constant 0 : i32
    %2 = arith.addi %0, %c0_i32 : i32
    %c0 = arith.constant 0 : index
    %3 = arith.index_cast %2 : i32 to index
    %c0_0 = arith.constant 0 : index
    %c0_1 = arith.constant 0 : index
    %4 = vector.load %arg2[%c0, %3, %c0_0, %c0_1] : memref<1x18x18x4xbf16, #tpu.memory_space<vmem>>, vector<1x16x16x4xbf16>
    %5 = vector.shape_cast %4 : vector<1x16x16x4xbf16> to vector<16x16x4xbf16>
    %6 = vector.shape_cast %5 : vector<16x16x4xbf16> to vector<256x4xbf16>
    %c0_2 = arith.constant 0 : index
    %c0_3 = arith.constant 0 : index
    %c0_4 = arith.constant 0 : index
    %7 = vector.load %arg3[%c0_2, %c0_3, %c0_4] : memref<9x4x128xbf16, #tpu.memory_space<vmem>>, vector<1x4x128xbf16>
    %8 = vector.shape_cast %7 : vector<1x4x128xbf16> to vector<4x128xbf16>
    %cst_5 = arith.constant dense<0.000000e+00> : vector<256x128xf32>
    %9 = tpu.matmul %6, %8, %cst_5 {dimension_numbers = #tpu.dot_dimension_numbers<[1], [0], [0], [1], [0, 0, 1, 1], [], []>} : vector<256x4xbf16>, vector<4x128xbf16>, vector<256x128xf32> -> vector<256x128xf32>
    %10 = arith.addf %1, %9 : vector<256x128xf32>
    %c0_i32_6 = arith.constant 0 : i32
    %11 = arith.addi %0, %c0_i32_6 : i32
    %c0_7 = arith.constant 0 : index
    %12 = arith.index_cast %11 : i32 to index
    %c1 = arith.constant 1 : index
    %c0_8 = arith.constant 0 : index
    %13 = vector.load %arg2[%c0_7, %12, %c1, %c0_8] : memref<1x18x18x4xbf16, #tpu.memory_space<vmem>>, vector<1x16x16x4xbf16>
    %14 = vector.shape_cast %13 : vector<1x16x16x4xbf16> to vector<16x16x4xbf16>
    %15 = vector.shape_cast %14 : vector<16x16x4xbf16> to vector<256x4xbf16>
    %c1_9 = arith.constant 1 : index
    %c0_10 = arith.constant 0 : index
    %c0_11 = arith.constant 0 : index
    %16 = vector.load %arg3[%c1_9, %c0_10, %c0_11] : memref<9x4x128xbf16, #tpu.memory_space<vmem>>, vector<1x4x128xbf16>
    %17 = vector.shape_cast %16 : vector<1x4x128xbf16> to vector<4x128xbf16>
    %cst_12 = arith.constant dense<0.000000e+00> : vector<256x128xf32>
    %18 = tpu.matmul %15, %17, %cst_12 {dimension_numbers = #tpu.dot_dimension_numbers<[1], [0], [0], [1], [0, 0, 1, 1], [], []>} : vector<256x4xbf16>, vector<4x128xbf16>, vector<256x128xf32> -> vector<256x128xf32>
    %19 = arith.addf %10, %18 : vector<256x128xf32>
    %c0_i32_13 = arith.constant 0 : i32
    %20 = arith.addi %0, %c0_i32_13 : i32
    %c0_14 = arith.constant 0 : index
    %21 = arith.index_cast %20 : i32 to index
    %c2 = arith.constant 2 : index
    %c0_15 = arith.constant 0 : index
    %22 = vector.load %arg2[%c0_14, %21, %c2, %c0_15] : memref<1x18x18x4xbf16, #tpu.memory_space<vmem>>, vector<1x16x16x4xbf16>
    %23 = vector.shape_cast %22 : vector<1x16x16x4xbf16> to vector<16x16x4xbf16>
    %24 = vector.shape_cast %23 : vector<16x16x4xbf16> to vector<256x4xbf16>
    %c2_16 = arith.constant 2 : index
    %c0_17 = arith.constant 0 : index
    %c0_18 = arith.constant 0 : index
    %25 = vector.load %arg3[%c2_16, %c0_17, %c0_18] : memref<9x4x128xbf16, #tpu.memory_space<vmem>>, vector<1x4x128xbf16>
    %26 = vector.shape_cast %25 : vector<1x4x128xbf16> to vector<4x128xbf16>
    %cst_19 = arith.constant dense<0.000000e+00> : vector<256x128xf32>
    %27 = tpu.matmul %24, %26, %cst_19 {dimension_numbers = #tpu.dot_dimension_numbers<[1], [0], [0], [1], [0, 0, 1, 1], [], []>} : vector<256x4xbf16>, vector<4x128xbf16>, vector<256x128xf32> -> vector<256x128xf32>
    %28 = arith.addf %19, %27 : vector<256x128xf32>
    %c1_i32 = arith.constant 1 : i32
    %29 = arith.addi %0, %c1_i32 : i32
    %c0_20 = arith.constant 0 : index
    %30 = arith.index_cast %29 : i32 to index
    %c0_21 = arith.constant 0 : index
    %c0_22 = arith.constant 0 : index
    %31 = vector.load %arg2[%c0_20, %30, %c0_21, %c0_22] : memref<1x18x18x4xbf16, #tpu.memory_space<vmem>>, vector<1x16x16x4xbf16>
    %32 = vector.shape_cast %31 : vector<1x16x16x4xbf16> to vector<16x16x4xbf16>
    %33 = vector.shape_cast %32 : vector<16x16x4xbf16> to vector<256x4xbf16>
    %c3 = arith.constant 3 : index
    %c0_23 = arith.constant 0 : index
    %c0_24 = arith.constant 0 : index
    %34 = vector.load %arg3[%c3, %c0_23, %c0_24] : memref<9x4x128xbf16, #tpu.memory_space<vmem>>, vector<1x4x128xbf16>
    %35 = vector.shape_cast %34 : vector<1x4x128xbf16> to vector<4x128xbf16>
    %cst_25 = arith.constant dense<0.000000e+00> : vector<256x128xf32>
    %36 = tpu.matmul %33, %35, %cst_25 {dimension_numbers = #tpu.dot_dimension_numbers<[1], [0], [0], [1], [0, 0, 1, 1], [], []>} : vector<256x4xbf16>, vector<4x128xbf16>, vector<256x128xf32> -> vector<256x128xf32>
    %37 = arith.addf %28, %36 : vector<256x128xf32>
    %c1_i32_26 = arith.constant 1 : i32
    %38 = arith.addi %0, %c1_i32_26 : i32
    %c0_27 = arith.constant 0 : index
    %39 = arith.index_cast %38 : i32 to index
    %c1_28 = arith.constant 1 : index
    %c0_29 = arith.constant 0 : index
    %40 = vector.load %arg2[%c0_27, %39, %c1_28, %c0_29] : memref<1x18x18x4xbf16, #tpu.memory_space<vmem>>, vector<1x16x16x4xbf16>
    %41 = vector.shape_cast %40 : vector<1x16x16x4xbf16> to vector<16x16x4xbf16>
    %42 = vector.shape_cast %41 : vector<16x16x4xbf16> to vector<256x4xbf16>
    %c4 = arith.constant 4 : index
    %c0_30 = arith.constant 0 : index
    %c0_31 = arith.constant 0 : index
    %43 = vector.load %arg3[%c4, %c0_30, %c0_31] : memref<9x4x128xbf16, #tpu.memory_space<vmem>>, vector<1x4x128xbf16>
    %44 = vector.shape_cast %43 : vector<1x4x128xbf16> to vector<4x128xbf16>
    %cst_32 = arith.constant dense<0.000000e+00> : vector<256x128xf32>
    %45 = tpu.matmul %42, %44, %cst_32 {dimension_numbers = #tpu.dot_dimension_numbers<[1], [0], [0], [1], [0, 0, 1, 1], [], []>} : vector<256x4xbf16>, vector<4x128xbf16>, vector<256x128xf32> -> vector<256x128xf32>
    %46 = arith.addf %37, %45 : vector<256x128xf32>
    %c1_i32_33 = arith.constant 1 : i32
    %47 = arith.addi %0, %c1_i32_33 : i32
    %c0_34 = arith.constant 0 : index
    %48 = arith.index_cast %47 : i32 to index
    %c2_35 = arith.constant 2 : index
    %c0_36 = arith.constant 0 : index
    %49 = vector.load %arg2[%c0_34, %48, %c2_35, %c0_36] : memref<1x18x18x4xbf16, #tpu.memory_space<vmem>>, vector<1x16x16x4xbf16>
    %50 = vector.shape_cast %49 : vector<1x16x16x4xbf16> to vector<16x16x4xbf16>
    %51 = vector.shape_cast %50 : vector<16x16x4xbf16> to vector<256x4xbf16>
    %c5 = arith.constant 5 : index
    %c0_37 = arith.constant 0 : index
    %c0_38 = arith.constant 0 : index
    %52 = vector.load %arg3[%c5, %c0_37, %c0_38] : memref<9x4x128xbf16, #tpu.memory_space<vmem>>, vector<1x4x128xbf16>
    %53 = vector.shape_cast %52 : vector<1x4x128xbf16> to vector<4x128xbf16>
    %cst_39 = arith.constant dense<0.000000e+00> : vector<256x128xf32>
    %54 = tpu.matmul %51, %53, %cst_39 {dimension_numbers = #tpu.dot_dimension_numbers<[1], [0], [0], [1], [0, 0, 1, 1], [], []>} : vector<256x4xbf16>, vector<4x128xbf16>, vector<256x128xf32> -> vector<256x128xf32>
    %55 = arith.addf %46, %54 : vector<256x128xf32>
    %c2_i32 = arith.constant 2 : i32
    %56 = arith.addi %0, %c2_i32 : i32
    %c0_40 = arith.constant 0 : index
    %57 = arith.index_cast %56 : i32 to index
    %c0_41 = arith.constant 0 : index
    %c0_42 = arith.constant 0 : index
    %58 = vector.load %arg2[%c0_40, %57, %c0_41, %c0_42] : memref<1x18x18x4xbf16, #tpu.memory_space<vmem>>, vector<1x16x16x4xbf16>
    %59 = vector.shape_cast %58 : vector<1x16x16x4xbf16> to vector<16x16x4xbf16>
    %60 = vector.shape_cast %59 : vector<16x16x4xbf16> to vector<256x4xbf16>
    %c6 = arith.constant 6 : index
    %c0_43 = arith.constant 0 : index
    %c0_44 = arith.constant 0 : index
    %61 = vector.load %arg3[%c6, %c0_43, %c0_44] : memref<9x4x128xbf16, #tpu.memory_space<vmem>>, vector<1x4x128xbf16>
    %62 = vector.shape_cast %61 : vector<1x4x128xbf16> to vector<4x128xbf16>
    %cst_45 = arith.constant dense<0.000000e+00> : vector<256x128xf32>
    %63 = tpu.matmul %60, %62, %cst_45 {dimension_numbers = #tpu.dot_dimension_numbers<[1], [0], [0], [1], [0, 0, 1, 1], [], []>} : vector<256x4xbf16>, vector<4x128xbf16>, vector<256x128xf32> -> vector<256x128xf32>
    %64 = arith.addf %55, %63 : vector<256x128xf32>
    %c2_i32_46 = arith.constant 2 : i32
    %65 = arith.addi %0, %c2_i32_46 : i32
    %c0_47 = arith.constant 0 : index
    %66 = arith.index_cast %65 : i32 to index
    %c1_48 = arith.constant 1 : index
    %c0_49 = arith.constant 0 : index
    %67 = vector.load %arg2[%c0_47, %66, %c1_48, %c0_49] : memref<1x18x18x4xbf16, #tpu.memory_space<vmem>>, vector<1x16x16x4xbf16>
    %68 = vector.shape_cast %67 : vector<1x16x16x4xbf16> to vector<16x16x4xbf16>
    %69 = vector.shape_cast %68 : vector<16x16x4xbf16> to vector<256x4xbf16>
    %c7 = arith.constant 7 : index
    %c0_50 = arith.constant 0 : index
    %c0_51 = arith.constant 0 : index
    %70 = vector.load %arg3[%c7, %c0_50, %c0_51] : memref<9x4x128xbf16, #tpu.memory_space<vmem>>, vector<1x4x128xbf16>
    %71 = vector.shape_cast %70 : vector<1x4x128xbf16> to vector<4x128xbf16>
    %cst_52 = arith.constant dense<0.000000e+00> : vector<256x128xf32>
    %72 = tpu.matmul %69, %71, %cst_52 {dimension_numbers = #tpu.dot_dimension_numbers<[1], [0], [0], [1], [0, 0, 1, 1], [], []>} : vector<256x4xbf16>, vector<4x128xbf16>, vector<256x128xf32> -> vector<256x128xf32>
    %73 = arith.addf %64, %72 : vector<256x128xf32>
    %c2_i32_53 = arith.constant 2 : i32
    %74 = arith.addi %0, %c2_i32_53 : i32
    %c0_54 = arith.constant 0 : index
    %75 = arith.index_cast %74 : i32 to index
    %c2_55 = arith.constant 2 : index
    %c0_56 = arith.constant 0 : index
    %76 = vector.load %arg2[%c0_54, %75, %c2_55, %c0_56] : memref<1x18x18x4xbf16, #tpu.memory_space<vmem>>, vector<1x16x16x4xbf16>
    %77 = vector.shape_cast %76 : vector<1x16x16x4xbf16> to vector<16x16x4xbf16>
    %78 = vector.shape_cast %77 : vector<16x16x4xbf16> to vector<256x4xbf16>
    %c8 = arith.constant 8 : index
    %c0_57 = arith.constant 0 : index
    %c0_58 = arith.constant 0 : index
    %79 = vector.load %arg3[%c8, %c0_57, %c0_58] : memref<9x4x128xbf16, #tpu.memory_space<vmem>>, vector<1x4x128xbf16>
    %80 = vector.shape_cast %79 : vector<1x4x128xbf16> to vector<4x128xbf16>
    %cst_59 = arith.constant dense<0.000000e+00> : vector<256x128xf32>
    %81 = tpu.matmul %78, %80, %cst_59 {dimension_numbers = #tpu.dot_dimension_numbers<[1], [0], [0], [1], [0, 0, 1, 1], [], []>} : vector<256x4xbf16>, vector<4x128xbf16>, vector<256x128xf32> -> vector<256x128xf32>
    %82 = arith.addf %73, %81 : vector<256x128xf32>
    %83 = arith.truncf %82 : vector<256x128xf32> to vector<256x128xbf16>
    %84 = vector.shape_cast %83 : vector<256x128xbf16> to vector<16x16x128xbf16>
    %c0_60 = arith.constant 0 : index
    %c0_61 = arith.constant 0 : index
    %c0_62 = arith.constant 0 : index
    %c0_63 = arith.constant 0 : index
    %85 = vector.load %arg4[%c0_60, %c0_61, %c0_62, %c0_63] : memref<1x16x16x128xbf16, #tpu.memory_space<vmem>>, vector<1x16x16x128xbf16>
    %86 = vector.shape_cast %85 : vector<1x16x16x128xbf16> to vector<16x16x128xbf16>
    %87 = vector.shape_cast %84 : vector<16x16x128xbf16> to vector<1x16x16x128xbf16>
    tpu.vector_store %arg4[%c0_60, %c0_61, %c0_62, %c0_63], %87 {strides = array<i32>} : memref<1x16x16x128xbf16, #tpu.memory_space<vmem>>, vector<1x16x16x128xbf16>,
    %88 = arith.extf %83 : vector<256x128xbf16> to vector<256x128xf32>
    %cst_64 = arith.constant dense<0.000000e+00> : vector<128xf32>
    %89 = vector.multi_reduction <add>, %88, %cst_64 [0] : vector<256x128xf32> to vector<128xf32>
    %90 = vector.shape_cast %89 : vector<128xf32> to vector<1x128xf32>
    %91 = arith.mulf %88, %88 : vector<256x128xf32>
    %cst_65 = arith.constant dense<0.000000e+00> : vector<128xf32>
    %92 = vector.multi_reduction <add>, %91, %cst_65 [0] : vector<256x128xf32> to vector<128xf32>
    %93 = vector.shape_cast %92 : vector<128xf32> to vector<1x128xf32>
    %94 = tpu.concatenate %90, %93 in 0 : vector<1x128xf32>, vector<1x128xf32> -> vector<2x128xf32>
    %c0_66 = arith.constant 0 : index
    %c0_67 = arith.constant 0 : index
    %c0_68 = arith.constant 0 : index
    %95 = vector.load %arg5[%c0_66, %c0_67, %c0_68] : memref<1x2x128xf32, #tpu.memory_space<vmem>>, vector<1x2x128xf32>
    %96 = vector.shape_cast %95 : vector<1x2x128xf32> to vector<2x128xf32>
    %97 = vector.shape_cast %94 : vector<2x128xf32> to vector<1x2x128xf32>
    tpu.vector_store %arg5[%c0_66, %c0_67, %c0_68], %97 {strides = array<i32>} : memref<1x2x128xf32, #tpu.memory_space<vmem>>, vector<1x2x128xf32>,
    return
  }
  func.func @transform_0(%arg0: i32, %arg1: i32) -> (i32, i32, i32, i32) {
    %c0_i32 = arith.constant 0 : i32
    %c0_i32_0 = arith.constant 0 : i32
    %c0_i32_1 = arith.constant 0 : i32
    %c0_i32_2 = arith.constant 0 : i32
    return %arg0, %c0_i32, %c0_i32_0, %c0_i32_1 : i32, i32, i32, i32
  }
  func.func @transform_1(%arg0: i32, %arg1: i32) -> (i32, i32, i32) {
    %c0_i32 = arith.constant 0 : i32
    %c0_i32_0 = arith.constant 0 : i32
    %c0_i32_1 = arith.constant 0 : i32
    %c0_i32_2 = arith.constant 0 : i32
    return %c0_i32, %c0_i32_0, %c0_i32_1 : i32, i32, i32
  }
  func.func @transform_2(%arg0: i32, %arg1: i32) -> (i32, i32, i32, i32) {
    %c0_i32 = arith.constant 0 : i32
    %c0_i32_0 = arith.constant 0 : i32
    %c0_i32_1 = arith.constant 0 : i32
    return %arg0, %arg1, %c0_i32, %c0_i32_0 : i32, i32, i32, i32
  }
  func.func @transform_3(%arg0: i32, %arg1: i32) -> (i32, i32, i32) {
    %c1_i32 = arith.constant 1 : i32
    %0 = arith.muli %arg0, %c1_i32 : i32
    %1 = arith.addi %0, %arg1 : i32
    %c0_i32 = arith.constant 0 : i32
    %c0_i32_0 = arith.constant 0 : i32
    %c0_i32_1 = arith.constant 0 : i32
    return %1, %c0_i32, %c0_i32_0 : i32, i32, i32
  }
}

</mosaic_0001>

<bundles_post_ra>
// kernel: conv_block_forward.1
= control target key start
LH: loop header
LB: loop body
LE: loop exit
PB: predicated region body
PF: predicated region fallthrough
CT: control target
= control target key end

     0   :  { %s5331_s12 = smov 0   ;;  %s5333_s13 = smov 0   ;;  %s6670_s0 = inlined_call_operand.vmem [shape: bf16[2,18,18,4], index: 0, kind: input, shape index: {}]   ;;  %s6671_s1 = inlined_call_operand.vmem [shape: bf16[9,4,128], index: 1, kind: input, shape index: {}]   ;;  %s6672_s2 = inlined_call_operand.vmem [shape: bf16[2,16,16,128], index: 2, kind: output, shape index: {0}]   ;;  %s6673_s3 = inlined_call_operand.vmem [shape: f32[2,2,128], index: 3, kind: output, shape index: {1}]  }
   0x1   :  { %s5335_s14 = smov 0  }
   0x2 LB: > { %s26_s15 = sadd.s32 1, %s5305_s13  ;;  %p4474_p0 = scmp.ge.s32.totalorder %s5309_s14, 1  ;;  %s5309_s14 = sphi %s5335_s14, %s14_s14   ;;  %s5305_s13 = sphi %s5333_s13, %s6687_s13   ;;  %s5301_s12 = sphi %s5331_s12, %s6686_s12  }
   0x3   : > { %p28_p1 = scmp.ge.s32.totalorder %s26_s15, 2  ;;  %p156_p2 = scmp.lt.s32.totalorder %s5309_s14, 3 }
   0x5   : > { %s6689_s15 = smov (%p28_p1, %s26_s15), 0  ;;  %p157_p3 = pnand %p4474_p0, %p156_p2 }
   0x7   : > { %160 = sbr.rel (%p157_p3) target bundleno = 776 (0x308), region = 28 }
   0xc   : > { %v4479_v0 = vld [vmem:[%s6671_s1 + $0x2] sm:$0x3]  ;;  %vm752_vm0 = vcmask 1041408   ;;  %p190_p4 = scmp.lt.s32.totalorder %s5301_s12, 1  ;;  %v4592_v2 = vld [vmem:[%s6671_s1 + $0x4] sm:$0x3] }
   0xd   : > { %v754_v1 = vsel %vm752_vm0, %v4479_v0, 0  ;;  %v1327_v3 = vsel %vm752_vm0, %v4592_v2, 0  ;;  %v4641_v4 = vld [vmem:[%s6671_s1 + $0x6] sm:$0x3]  ;;  %v249_v5 = vld [vmem:[%s6671_s1] sm:$0x3] }
   0xe   : > { %5209 = vmatpush.bf16.msra.mxu1 %v754_v1  ;;  %5210 = vmatpush.bf16.msra.mxu2 %v754_v1  ;;  %s6691_s12 = smov (!%p190_p4, %s5301_s12), 1  ;;  %v4770_v6 = vld [vmem:[%s6671_s1 + $0x8] sm:$0x3]  ;;  %v1617_v7 = vsel %vm752_vm0, %v4641_v4, 0  ;;  %v974_v8 = vsel %vm752_vm0, %v249_v5, 0  ;;  %vm703_vm4 = vcmask 31744  }
   0xf   : > { %5211 = vmatpush.bf16.msra.mxu3 %v754_v1  ;;  %763 = vmatpush.bf16.msra.mxu0 %v754_v1  ;;  %s5212_s26 = smul.u32 216, %s6691_s12  ;;  %v2271_v9 = vsel %vm752_vm0, %v4770_v6, 0  ;;  %vm266_vm1 = vsmask.f32 3328  ;;  %vm267_vm2 = vsmask.f32 7440 }
  0x10   : > { %vm5387_vm3 = vmor %vm266_vm1, %vm267_vm2  ;;  %vm1113_vm5 = vcmask 1042432   ;;  %vm1114_vm6 = vcmask 1046532   ;;  %s5065_s11 = sshll.u32 %s6691_s12, 7  ;;  %s4478_s19 = sshll.u32 %s6691_s12, 1  ;;  %vm4336_vm8 = vcmask 1040384  }
  0x11   : > { %s5375_s29 = scalar_lea.vmem %s6670_s0, %s5212_s26  ;;  %vm5561_vm7 = vmor %vm1113_vm5, %vm1114_vm6  ;;  %s6416_s18 = scalar_lea.vmem %s6672_s2, %s5065_s11 }
  0x12   : > { %1336 = vmatpush.bf16.msrb.mxu2 %v1327_v3  ;;  %983 = vmatpush.bf16.msrb.mxu1 %v974_v8  ;;  %v225_v10 = vld [vmem:[%s5375_s29 + $0x30] sm:$0xf]  ;;  %v226_v11 = vld [vmem:[%s5375_s29 + $0x34] sm:$0xf]  ;;  %v254_v12 = vld [vmem:[%s5375_s29 + $0x38] sm:$0x1]  ;;  %s210_s22 = scalar_lea.vmem %s6673_s3, %s4478_s19 }
  0x13   : > { %1626 = vmatpush.bf16.msrb.mxu3 %v1617_v7  ;;  %2280 = vmatpush.bf16.msrb.mxu0 %v2271_v9  ;;  %v366_v13 = vshrl.u32 %v225_v10, 16  ;;  %v369_v14 = vshll.u32 %v225_v10, 16  ;;  %v375_v15 = vshll.u32 %v226_v11, 16  ;;  %v379_v16 = vshrl.u32 %v226_v11, 16  ;;  %v233_v17 = vld [vmem:[%s5375_s29 + $0x60] sm:$0xf] }
  0x14   : > { %v385_v18 = vshll.u32 %v254_v12, 16  ;;  %v234_v19 = vld [vmem:[%s5375_s29 + $0x64] sm:$0xf]  ;;  %v258_v20 = vld [vmem:[%s5375_s29 + $0x68] sm:$0x1]  ;;  %v462_v21 = vshrl.u32 %v233_v17, 16 }
  0x15   : > { %v368_v22 = vrot.slane %v366_v13, 4  ;;  %v371_v23 = vrot.slane %v369_v14, 5  ;;  %v377_v24 = vrot.slane %v375_v15, 5  ;;  %v381_v25 = vrot.slane %v379_v16, 4  ;;  %v241_v26 = vld [vmem:[%s5375_s29 + $0x90] sm:$0xf] }
  0x16   : > { %v387_v27 = vrot.slane %v385_v18, 5  ;;  %v464_v28 = vrot.slane %v462_v21, 4  ;;  %v465_v29 = vshll.u32 %v233_v17, 16  ;;  %v471_v30 = vshll.u32 %v234_v19, 16  ;;  %v242_v35 = vld [vmem:[%s5375_s29 + $0x94] sm:$0xf] }
  0x17   : > { %v372_v31 = vor.u32 %v371_v23, %v368_v22  ;;  %v382_v32 = vor.u32 %v381_v25, %v377_v24  ;;  %v475_v33 = vshrl.u32 %v234_v19, 16  ;;  %v481_v34 = vshll.u32 %v258_v20, 16  ;;  %v262_v45 = vld [vmem:[%s5375_s29 + $0x98] sm:$0x1]  ;;  %v217_v61 = vld [vmem:[%s5375_s29] sm:$0xf] }
  0x18   : > { %v467_v37 = vrot.slane %v465_v29, 5  ;;  %v473_v38 = vrot.slane %v471_v30, 5  ;;  %v558_v39 = vshrl.u32 %v241_v26, 16  ;;  %v561_v47 = vshll.u32 %v241_v26, 16  ;;  %v5400_v1 = vld [vmem:[%s5375_s29 + $0x4] sm:$0xf] }
  0x19   : > { %v373_v40 = vrot.slane %v372_v31, 4  ;;  %v383_v41 = vrot.slane %v382_v32, 4  ;;  %v477_v42 = vrot.slane %v475_v33, 4  ;;  %v483_v43 = vrot.slane %v481_v34, 5  ;;  %v5403_v2 = vld [vmem:[%s5375_s29 + $0x8] sm:$0x1] }
  0x1a   : > { %v468_v44 = vor.u32 %v467_v37, %v464_v28  ;;  %v560_v46 = vrot.slane %v558_v39, 4  ;;  %v567_v48 = vshll.u32 %v242_v35, 16  ;;  %v571_v52 = vshrl.u32 %v242_v35, 16  ;;  %v227_v19 = vld [vmem:[%s5375_s29 + $0x3c] sm:$0xf] }
  0x1b   : > { %v378_v49 = vsel %vm5387_vm3, %v373_v40, %v377_v24  ;;  %v388_v50 = vsel %vm5387_vm3, %v383_v41, %v387_v27  ;;  %v478_v51 = vor.u32 %v477_v42, %v473_v38  ;;  %v563_v56 = vrot.slane %v561_v47, 5  ;;  %v5415_v20 = vld [vmem:[%s5375_s29 + $0x40] sm:$0xf]  ;;  %v5420_v25 = vld [vmem:[%s5375_s29 + $0x44] sm:$0x1] }
  0x1c   : > { %v663_v53 = vunpack.c.l.b16 %v378_v49  ;;  %v664_v54 = vunpack.c.l.b16 %v388_v50  ;;  %v469_v55 = vrot.slane %v468_v44, 4  ;;  %v569_v58 = vrot.slane %v567_v48, 5  ;;  %v235_v33 = vld [vmem:[%s5375_s29 + $0x6c] sm:$0xf]  ;;  %v259_v47 = vld [vmem:[%s5375_s29 + $0x74] sm:$0x1] }
  0x1d   : > { %v479_v57 = vrot.slane %v478_v51, 4  ;;  %v573_v59 = vrot.slane %v571_v52, 4  ;;  %v577_v60 = vshll.u32 %v262_v45, 16  ;;  %v564_v0 = vor.u32 %v563_v56, %v560_v46 }
  0x1e   : > { %v691_v62 = vpack.c.b16 %v664_v54, %v663_v53  ;;  %v474_v63 = vsel %vm5387_vm3, %v469_v55, %v473_v38  ;;  %v270_v9 = vshrl.u32 %v217_v61, 16  ;;  %v273_v10 = vshll.u32 %v217_v61, 16  ;;  %v243_v61 = vld [vmem:[%s5375_s29 + $0x9c] sm:$0xf] }
  0x1f   : > { %v484_v3 = vsel %vm5387_vm3, %v479_v57, %v483_v43  ;;  %v671_v4 = vunpack.c.l.b16 %v474_v63  ;;  %v574_v5 = vor.u32 %v573_v59, %v569_v58  ;;  %v579_v6 = vrot.slane %v577_v60, 5  ;;  %v236_v43 = vld [vmem:[%s5375_s29 + $0x70] sm:$0xf] }
  0x20   : > { %4484 = vmatmul.msk.bf16.vlgmr.msra.gmra.mxu1 %vm703_vm4, %v691_v62  ;;  %v672_v7 = vunpack.c.l.b16 %v484_v3  ;;  %v565_v8 = vrot.slane %v564_v0, 4  ;;  %v279_v12 = vshll.u32 %v5400_v1, 16  ;;  %v283_v13 = vshrl.u32 %v5400_v1, 16  ;;  %v244_v3 = vld [vmem:[%s5375_s29 + $0xa0] sm:$0xf] }
  0x21   : > { %v575_v11 = vrot.slane %v574_v5, 4  ;;  %v289_v14 = vshll.u32 %v5403_v2, 16  ;;  %v272_v17 = vrot.slane %v270_v9, 4  ;;  %v275_v18 = vrot.slane %v273_v10, 5 }
  0x22   : > { %v695_v15 = vpack.c.b16 %v672_v7, %v671_v4  ;;  %v570_v16 = vsel %vm5387_vm3, %v565_v8, %v569_v58  ;;  %v281_v23 = vrot.slane %v279_v12, 5  ;;  %v285_v24 = vrot.slane %v283_v13, 4  ;;  %v263_v8 = vld [vmem:[%s5375_s29 + $0xa4] sm:$0x1] }
  0x23   : > { %v580_v21 = vsel %vm5387_vm3, %v575_v11, %v579_v6  ;;  %v679_v22 = vunpack.c.l.b16 %v570_v16  ;;  %v276_v27 = vor.u32 %v275_v18, %v272_v17  ;;  %v291_v28 = vrot.slane %v289_v14, 5 }
  0x24   : > { %4488 = vmatmul.msk.bf16.vlgmr.msra.gmra.mxu2 %vm703_vm4, %v695_v15  ;;  %v680_v26 = vunpack.c.l.b16 %v580_v21  ;;  %v286_v29 = vor.u32 %v285_v24, %v281_v23  ;;  %v390_v30 = vshrl.u32 %v227_v19, 16  ;;  %v393_v31 = vshll.u32 %v227_v19, 16 }
  0x25   : > { %v399_v32 = vshll.u32 %v5415_v20, 16  ;;  %v277_v35 = vrot.slane %v276_v27, 4  ;;  %v403_v37 = vshrl.u32 %v5415_v20, 16  ;;  %v409_v38 = vshll.u32 %v5420_v25, 16 }
  0x26   : > { %v699_v34 = vpack.c.b16 %v680_v26, %v679_v22  ;;  %v287_v39 = vrot.slane %v286_v29, 4  ;;  %v392_v40 = vrot.slane %v390_v30, 4  ;;  %v395_v41 = vrot.slane %v393_v31, 5  ;;  %v219_v22 = vld [vmem:[%s5375_s29 + $0xc] sm:$0xf] }
  0x27   : > { %v401_v42 = vrot.slane %v399_v32, 5  ;;  %v282_v44 = vsel %vm5387_vm3, %v277_v35, %v281_v23  ;;  %v405_v45 = vrot.slane %v403_v37, 4  ;;  %v411_v46 = vrot.slane %v409_v38, 5  ;;  %v5449_v32 = vld [vmem:[%s5375_s29 + $0x14] sm:$0x1] }
  0x28   : > { %4492 = vmatmul.msk.bf16.vlgmr.msra.gmra.mxu3 %vm703_vm4, %v699_v34  ;;  %v486_v48 = vshrl.u32 %v235_v33, 16  ;;  %v292_v49 = vsel %vm5387_vm3, %v287_v39, %v291_v28  ;;  %v655_v50 = vunpack.c.l.b16 %v282_v44  ;;  %v396_v51 = vor.u32 %v395_v41, %v392_v40  ;;  %v5446_v28 = vld [vmem:[%s5375_s29 + $0x10] sm:$0xf] }
  0x29   : > { %v489_v52 = vshll.u32 %v235_v33, 16  ;;  %v656_v53 = vunpack.c.l.b16 %v292_v49  ;;  %v406_v54 = vor.u32 %v405_v45, %v401_v42  ;;  %v495_v56 = vshll.u32 %v236_v43, 16 }
  0x2a   : > { %v488_v55 = vrot.slane %v486_v48, 4  ;;  %v397_v57 = vrot.slane %v396_v51, 4  ;;  %v499_v59 = vshrl.u32 %v236_v43, 16  ;;  %v505_v60 = vshll.u32 %v259_v47, 16  ;;  %v5459_v47 = vld [vmem:[%s5375_s29 + $0x4c] sm:$0xf] }
  0x2b   : > { %v491_v58 = vrot.slane %v489_v52, 5  ;;  %v687_v62 = vpack.c.b16 %v656_v53, %v655_v50  ;;  %v407_v63 = vrot.slane %v406_v54, 4  ;;  %v497_v0 = vrot.slane %v495_v56, 5  ;;  %v5464_v56 = vld [vmem:[%s5375_s29 + $0x50] sm:$0x1] }
  0x2c   : > { %v402_v4 = vsel %vm5387_vm3, %v397_v57, %v401_v42  ;;  %v501_v6 = vrot.slane %v499_v59, 4  ;;  %v507_v7 = vrot.slane %v505_v60, 5  ;;  %v582_v11 = vshrl.u32 %v243_v61, 16  ;;  %v229_v42 = vld [vmem:[%s5375_s29 + $0x48] sm:$0xf] }
  0x2d   : > { %v492_v5 = vor.u32 %v491_v58, %v488_v55  ;;  %4480 = vmatmul.msk.bf16.vlgmr.msra.gmra.mxu0 %vm703_vm4, %v687_v62  ;;  %v412_v9 = vsel %vm5387_vm3, %v407_v63, %v411_v46  ;;  %v665_v10 = vunpack.c.l.b16 %v402_v4  ;;  %v585_v12 = vshll.u32 %v243_v61, 16 }
  0x2e   : > { %v666_v13 = vunpack.c.l.b16 %v412_v9  ;;  %v502_v15 = vor.u32 %v501_v6, %v497_v0  ;;  %v591_v16 = vshll.u32 %v244_v3, 16  ;;  %v584_v17 = vrot.slane %v582_v11, 4 }
  0x2f   : > { %v493_v14 = vrot.slane %v492_v5, 4  ;;  %v587_v18 = vrot.slane %v585_v12, 5  ;;  %v595_v19 = vshrl.u32 %v244_v3, 16  ;;  %v601_v21 = vshll.u32 %v263_v8, 16  ;;  %v237_v3 = vld [vmem:[%s5375_s29 + $0x78] sm:$0xf] }
  0x30   : > { %v692_v23 = vpack.c.b16 %v666_v13, %v665_v10  ;;  %v503_v26 = vrot.slane %v502_v15, 4  ;;  %v593_v27 = vrot.slane %v591_v16, 5  ;;  %v294_v35 = vshrl.u32 %v219_v22, 16  ;;  %v238_v8 = vld [vmem:[%s5375_s29 + $0x7c] sm:$0xf] }
  0x31   : > { %v498_v24 = vsel %vm5387_vm3, %v493_v14, %v497_v0  ;;  %v588_v30 = vor.u32 %v587_v18, %v584_v17  ;;  %v597_v31 = vrot.slane %v595_v19, 4  ;;  %v603_v34 = vrot.slane %v601_v21, 5  ;;  %v260_v16 = vld [vmem:[%s5375_s29 + $0x80] sm:$0x1] }
  0x32   : > { %v673_v29 = vunpack.c.l.b16 %v498_v24  ;;  %4485 = vmatmul.msk.bf16.gmra.mxu1 %vm703_vm4, %v692_v23  ;;  %v508_v33 = vsel %vm5387_vm3, %v503_v26, %v507_v7  ;;  %v297_v37 = vshll.u32 %v219_v22, 16  ;;  %v303_v41 = vshll.u32 %v5446_v28, 16 }
  0x33   : > { %v674_v38 = vunpack.c.l.b16 %v508_v33  ;;  %v589_v39 = vrot.slane %v588_v30, 4  ;;  %v598_v40 = vor.u32 %v597_v31, %v593_v27  ;;  %v296_v43 = vrot.slane %v294_v35, 4 }
  0x34   : > { %v299_v44 = vrot.slane %v297_v37, 5  ;;  %v307_v45 = vshrl.u32 %v5446_v28, 16  ;;  %v313_v46 = vshll.u32 %v5449_v32, 16  ;;  %v305_v51 = vrot.slane %v303_v41, 5 }
  0x35   : > { %v696_v48 = vpack.c.b16 %v674_v38, %v673_v29  ;;  %v594_v49 = vsel %vm5387_vm3, %v589_v39, %v593_v27  ;;  %v599_v50 = vrot.slane %v598_v40, 4  ;;  %v414_v58 = vshrl.u32 %v229_v42, 16  ;;  %v246_v39 = vld [vmem:[%s5375_s29 + $0xac] sm:$0xf]  ;;  %v264_v40 = vld [vmem:[%s5375_s29 + $0xb0] sm:$0x1] }
  0x36   : > { %v681_v52 = vunpack.c.l.b16 %v594_v49  ;;  %v300_v53 = vor.u32 %v299_v44, %v296_v43  ;;  %v309_v54 = vrot.slane %v307_v45, 4  ;;  %v315_v55 = vrot.slane %v313_v46, 5 }
  0x37   : > { %4489 = vmatmul.msk.bf16.gmra.mxu2 %vm703_vm4, %v696_v48  ;;  %v604_v57 = vsel %vm5387_vm3, %v599_v50, %v603_v34  ;;  %v417_v59 = vshll.u32 %v229_v42, 16  ;;  %v423_v60 = vshll.u32 %v5459_v47, 16  ;;  %v427_v0 = vshrl.u32 %v5459_v47, 16  ;;  %v245_v34 = vld [vmem:[%s5375_s29 + $0xa8] sm:$0xf] }
  0x38   : > { %v682_v61 = vunpack.c.l.b16 %v604_v57  ;;  %v301_v62 = vrot.slane %v300_v53, 4  ;;  %v310_v63 = vor.u32 %v309_v54, %v305_v51  ;;  %v416_v4 = vrot.slane %v414_v58, 4 }
  0x39   : > { %v419_v5 = vrot.slane %v417_v59, 5  ;;  %v425_v6 = vrot.slane %v423_v60, 5  ;;  %v433_v7 = vshll.u32 %v5464_v56, 16  ;;  %v429_v12 = vrot.slane %v427_v0, 4  ;;  %v221_v59 = vld [vmem:[%s5375_s29 + $0x18] sm:$0xf] }
  0x3a   : > { %v700_v9 = vpack.c.b16 %v682_v61, %v681_v52  ;;  %v306_v10 = vsel %vm5387_vm3, %v301_v62, %v305_v51  ;;  %v311_v11 = vrot.slane %v310_v63, 4  ;;  %v510_v17 = vshrl.u32 %v237_v3, 16  ;;  %v5492_v63 = vld [vmem:[%s5375_s29 + $0x1c] sm:$0xf]  ;;  %v5495_v0 = vld [vmem:[%s5375_s29 + $0x20] sm:$0x1] }
  0x3b   : > { %v657_v13 = vunpack.c.l.b16 %v306_v10  ;;  %v420_v14 = vor.u32 %v419_v5, %v416_v4  ;;  %v435_v15 = vrot.slane %v433_v7, 5  ;;  %v430_v19 = vor.u32 %v429_v12, %v425_v6 }
  0x3c   : > { %4493 = vmatmul.msk.bf16.gmra.mxu3 %vm703_vm4, %v700_v9  ;;  %v316_v18 = vsel %vm5387_vm3, %v311_v11, %v315_v55  ;;  %v513_v21 = vshll.u32 %v237_v3, 16  ;;  %v519_v22 = vshll.u32 %v238_v8, 16  ;;  %v512_v26 = vrot.slane %v510_v17, 4 }
  0x3d   : > { %v658_v23 = vunpack.c.l.b16 %v316_v18  ;;  %v421_v24 = vrot.slane %v420_v14, 4  ;;  %v523_v27 = vshrl.u32 %v238_v8, 16  ;;  %v431_v29 = vrot.slane %v430_v19, 4 }
  0x3e   : > { %v515_v30 = vrot.slane %v513_v21, 5  ;;  %v521_v31 = vrot.slane %v519_v22, 5  ;;  %v529_v33 = vshll.u32 %v260_v16, 16  ;;  %v606_v48 = vshrl.u32 %v245_v34, 16  ;;  %v5505_v21 = vld [vmem:[%s5375_s29 + $0x58] sm:$0xf] }
  0x3f   : > { %v688_v35 = vpack.c.b16 %v658_v23, %v657_v13  ;;  %v426_v37 = vsel %vm5387_vm3, %v421_v24, %v425_v6  ;;  %v525_v38 = vrot.slane %v523_v27, 4  ;;  %v436_v41 = vsel %vm5387_vm3, %v431_v29, %v435_v15  ;;  %v231_v15 = vld [vmem:[%s5375_s29 + $0x54] sm:$0xf]  ;;  %v5510_v27 = vld [vmem:[%s5375_s29 + $0x5c] sm:$0x1] }
  0x40   : > { %v667_v42 = vunpack.c.l.b16 %v426_v37  ;;  %v516_v43 = vor.u32 %v515_v30, %v512_v26  ;;  %v531_v44 = vrot.slane %v529_v33, 5  ;;  %v668_v45 = vunpack.c.l.b16 %v436_v41 }
  0x41   : > { %4481 = vmatmul.msk.bf16.gmra.mxu0 %vm703_vm4, %v688_v35  ;;  %v526_v46 = vor.u32 %v525_v38, %v521_v31  ;;  %v609_v49 = vshll.u32 %v245_v34, 16  ;;  %v615_v51 = vshll.u32 %v246_v39, 16  ;;  %v619_v52 = vshrl.u32 %v246_v39, 16  ;;  %v239_v39 = vld [vmem:[%s5375_s29 + $0x84] sm:$0xf] }
  0x42   : > { %v517_v50 = vrot.slane %v516_v43, 4  ;;  %v625_v53 = vshll.u32 %v264_v40, 16  ;;  %v693_v54 = vpack.c.b16 %v668_v45, %v667_v42  ;;  %v608_v57 = vrot.slane %v606_v48, 4 }
  0x43   : > { %v527_v55 = vrot.slane %v526_v46, 4  ;;  %v611_v58 = vrot.slane %v609_v49, 5  ;;  %v617_v61 = vrot.slane %v615_v51, 5  ;;  %v621_v62 = vrot.slane %v619_v52, 4  ;;  %v240_v49 = vld [vmem:[%s5375_s29 + $0x88] sm:$0xf] }
  0x44   : > { %v522_v60 = vsel %vm5387_vm3, %v517_v50, %v521_v31  ;;  %4486 = vmatmul.msk.bf16.gmra.mxu1 %vm703_vm4, %v693_v54  ;;  %v627_v6 = vrot.slane %v625_v53, 5  ;;  %v318_v9 = vshrl.u32 %v221_v59, 16  ;;  %v321_v10 = vshll.u32 %v221_v59, 16  ;;  %v261_v53 = vld [vmem:[%s5375_s29 + $0x8c] sm:$0x1] }
  0x45   : > { %v532_v3 = vsel %vm5387_vm3, %v527_v55, %v531_v44  ;;  %v675_v4 = vunpack.c.l.b16 %v522_v60  ;;  %v612_v5 = vor.u32 %v611_v58, %v608_v57  ;;  %v622_v8 = vor.u32 %v621_v62, %v617_v61 }
  0x46   : > { %v676_v7 = vunpack.c.l.b16 %v532_v3  ;;  %v327_v12 = vshll.u32 %v5492_v63, 16  ;;  %v331_v13 = vshrl.u32 %v5492_v63, 16  ;;  %v337_v14 = vshll.u32 %v5495_v0, 16 }
  0x47   : > { %v613_v11 = vrot.slane %v612_v5, 4  ;;  %v623_v17 = vrot.slane %v622_v8, 4  ;;  %v320_v18 = vrot.slane %v318_v9, 4  ;;  %v323_v19 = vrot.slane %v321_v10, 5  ;;  %v247_v8 = vld [vmem:[%s5375_s29 + $0xb4] sm:$0xf] }
  0x48   : > { %v697_v16 = vpack.c.b16 %v676_v7, %v675_v4  ;;  %v329_v23 = vrot.slane %v327_v12, 5  ;;  %v333_v24 = vrot.slane %v331_v13, 4  ;;  %v339_v26 = vrot.slane %v337_v14, 5  ;;  %v248_v12 = vld [vmem:[%s5375_s29 + $0xb8] sm:$0xf] }
  0x49   : > { %v618_v22 = vsel %vm5387_vm3, %v613_v11, %v617_v61  ;;  %v628_v29 = vsel %vm5387_vm3, %v623_v17, %v627_v6  ;;  %v324_v31 = vor.u32 %v323_v19, %v320_v18  ;;  %v438_v33 = vshrl.u32 %v231_v15, 16  ;;  %v265_v17 = vld [vmem:[%s5375_s29 + $0xbc] sm:$0x1] }
  0x4a   : > { %4490 = vmatmul.msk.bf16.gmra.mxu2 %vm703_vm4, %v697_v16  ;;  %v683_v30 = vunpack.c.l.b16 %v618_v22  ;;  %v684_v34 = vunpack.c.l.b16 %v628_v29  ;;  %v334_v35 = vor.u32 %v333_v24, %v329_v23  ;;  %v441_v37 = vshll.u32 %v231_v15, 16 }
  0x4b   : > { %v447_v38 = vshll.u32 %v5505_v21, 16  ;;  %v325_v40 = vrot.slane %v324_v31, 4  ;;  %v440_v41 = vrot.slane %v438_v33, 4  ;;  %v451_v42 = vshrl.u32 %v5505_v21, 16 }
  0x4c   : > { %v457_v43 = vshll.u32 %v5510_v27, 16  ;;  %v701_v44 = vpack.c.b16 %v684_v34, %v683_v30  ;;  %v335_v45 = vrot.slane %v334_v35, 4  ;;  %v443_v46 = vrot.slane %v441_v37, 5  ;;  %v223_v37 = vld [vmem:[%s5375_s29 + $0x24] sm:$0xf] }
  0x4d   : > { %v449_v48 = vrot.slane %v447_v38, 5  ;;  %v330_v50 = vsel %vm5387_vm3, %v325_v40, %v329_v23  ;;  %v453_v51 = vrot.slane %v451_v42, 4  ;;  %v534_v54 = vshrl.u32 %v239_v39, 16  ;;  %v5538_v42 = vld [vmem:[%s5375_s29 + $0x28] sm:$0xf] }
  0x4e   : > { %v459_v52 = vrot.slane %v457_v43, 5  ;;  %4494 = vmatmul.msk.bf16.gmra.mxu3 %vm703_vm4, %v701_v44  ;;  %v340_v55 = vsel %vm5387_vm3, %v335_v45, %v339_v26  ;;  %v659_v57 = vunpack.c.l.b16 %v330_v50  ;;  %v444_v58 = vor.u32 %v443_v46, %v440_v41 }
  0x4f   : > { %v537_v59 = vshll.u32 %v239_v39, 16  ;;  %v660_v60 = vunpack.c.l.b16 %v340_v55  ;;  %v454_v61 = vor.u32 %v453_v51, %v449_v48  ;;  %v536_v62 = vrot.slane %v534_v54, 4 }
  0x50   : > { %v543_v3 = vshll.u32 %v240_v49, 16  ;;  %v445_v4 = vrot.slane %v444_v58, 4  ;;  %v547_v6 = vshrl.u32 %v240_v49, 16  ;;  %v553_v7 = vshll.u32 %v261_v53, 16 }
  0x51   : > { %v539_v5 = vrot.slane %v537_v59, 5  ;;  %v689_v9 = vpack.c.b16 %v660_v60, %v659_v57  ;;  %v455_v10 = vrot.slane %v454_v61, 4  ;;  %v630_v22 = vshrl.u32 %v247_v8, 16  ;;  %v1065_v61 = vld [vmem:[%s5375_s29] sm:$0xe] }
  0x52   : > { %v545_v11 = vrot.slane %v543_v3, 5  ;;  %v450_v13 = vsel %vm5387_vm3, %v445_v4, %v449_v48  ;;  %v549_v15 = vrot.slane %v547_v6, 4  ;;  %v555_v16 = vrot.slane %v553_v7, 5  ;;  %v5542_v48 = vld [vmem:[%s5375_s29 + $0x2c] sm:$0x1] }
  0x53   : > { %v540_v14 = vor.u32 %v539_v5, %v536_v62  ;;  %4482 = vmatmul.msk.bf16.gmra.mxu0 %vm703_vm4, %v689_v9  ;;  %v460_v18 = vsel %vm5387_vm3, %v455_v10, %v459_v52  ;;  %v669_v19 = vunpack.c.l.b16 %v450_v13  ;;  %v633_v23 = vshll.u32 %v247_v8, 16  ;;  %v4722_v6 = vld [vmem:[%s5375_s29 + $0xc] sm:$0xf] }
  0x54   : > { %v670_v24 = vunpack.c.l.b16 %v460_v18  ;;  %v550_v29 = vor.u32 %v549_v15, %v545_v11  ;;  %v639_v30 = vshll.u32 %v248_v12, 16  ;;  %v632_v31 = vrot.slane %v630_v22, 4 }
  0x55   : > { %v541_v26 = vrot.slane %v540_v14, 4  ;;  %v635_v33 = vrot.slane %v633_v23, 5  ;;  %v643_v34 = vshrl.u32 %v248_v12, 16  ;;  %v649_v35 = vshll.u32 %v265_v17, 16  ;;  %v4723_v12 = vld [vmem:[%s5375_s29 + $0x10] sm:$0xf] }
  0x56   : > { %v694_v38 = vpack.c.b16 %v670_v24, %v669_v19  ;;  %v551_v40 = vrot.slane %v550_v29, 4  ;;  %v641_v41 = vrot.slane %v639_v30, 5  ;;  %v1121_v43 = vrot.slane %v5403_v2, 5 }
  0x57   : > { %v546_v39 = vsel %vm5387_vm3, %v541_v26, %v545_v11  ;;  %v636_v45 = vor.u32 %v635_v33, %v632_v31  ;;  %v645_v46 = vrot.slane %v643_v34, 4  ;;  %v651_v50 = vrot.slane %v649_v35, 5  ;;  %v4868_v11 = vld [vmem:[%s6671_s1 + $0xc] sm:$0x3] }
  0x58   : > { %v677_v44 = vunpack.c.l.b16 %v546_v39  ;;  %4487 = vmatmul.msk.bf16.gmra.mxu1 %vm703_vm4, %v694_v38  ;;  %v556_v49 = vsel %vm5387_vm3, %v551_v40, %v555_v16  ;;  %v342_v51 = vshrl.u32 %v223_v37, 16  ;;  %v345_v52 = vshll.u32 %v223_v37, 16  ;;  %v4724_v38 = vld [vmem:[%s5375_s29 + $0x14] sm:$0x1] }
  0x59   : > { %v678_v53 = vunpack.c.l.b16 %v556_v49  ;;  %v637_v54 = vrot.slane %v636_v45, 4  ;;  %v646_v55 = vor.u32 %v645_v46, %v641_v41  ;;  %v351_v2 = vshll.u32 %v5538_v42, 16  ;;  %v4997_v45 = vld [vmem:[%s6671_s1 + $0xe] sm:$0x3] }
  0x5a   : > { %v344_v57 = vrot.slane %v342_v51, 4  ;;  %v347_v58 = vrot.slane %v345_v52, 5  ;;  %v355_v59 = vshrl.u32 %v5538_v42, 16  ;;  %v361_v60 = vshll.u32 %v5542_v48, 16  ;;  %v5066_v51 = vld [vmem:[%s5375_s29] sm:$0xff] }
  0x5b   : > { %v698_v62 = vpack.c.b16 %v678_v53, %v677_v44  ;;  %v642_v3 = vsel %vm5387_vm3, %v637_v54, %v641_v41  ;;  %v647_v4 = vrot.slane %v646_v55, 4  ;;  %v353_v5 = vrot.slane %v351_v2, 5  ;;  %v5046_v2 = vld [vmem:[%s6671_s1 + $0x10] sm:$0x3] }
  0x5c   : > { %v685_v7 = vunpack.c.l.b16 %v642_v3  ;;  %v348_v8 = vor.u32 %v347_v58, %v344_v57  ;;  %v357_v9 = vrot.slane %v355_v59, 4  ;;  %v363_v10 = vrot.slane %v361_v60, 5 }
  0x5d   : > { %4491 = vmatmul.msk.bf16.gmra.mxu2 %vm703_vm4, %v698_v62  ;;  %v652_v13 = vsel %vm5387_vm3, %v647_v4, %v651_v50  ;;  %v4576_v14 = vrot.slane %v1065_v61, 9  ;;  %v1118_v19 = vrot.slane %v5400_v1, 5  ;;  %v2959_v22 = vsel %vm752_vm0, %v4868_v11, 0  ;;  %v4819_v50 = vld [vmem:[%s6671_s1 + $0xa] sm:$0x3] }
  0x5e   : > { %v686_v15 = vunpack.c.l.b16 %v652_v13  ;;  %v349_v16 = vrot.slane %v348_v8, 4  ;;  %v358_v17 = vor.u32 %v357_v9, %v353_v5  ;;  %v1789_v23 = vshrl.u32 %v4722_v6, 16  ;;  %2968 = vmatpush.bf16.msra.mxu2 %v2959_v22  ;;  %v1066_v8 = vld [vmem:[%s5375_s29 + $0xc] sm:$0xe] }
  0x5f   : > { %v1792_v24 = vshll.u32 %v4722_v6, 16  ;;  %v1798_v26 = vshll.u32 %v4723_v12, 16  ;;  %v1119_v33 = vsel %vm5561_vm7, %v4576_v14, %v1118_v19  ;;  %v1120_v35 = vrot.slane %v1118_v19, 4  ;;  %v4726_v6 = vld [vmem:[%s5375_s29 + $0x1c] sm:$0xf] }
  0x60   : > { %v702_v29 = vpack.c.b16 %v686_v15, %v685_v7  ;;  %v354_v30 = vsel %vm5387_vm3, %v349_v16, %v353_v5  ;;  %v359_v31 = vrot.slane %v358_v17, 4  ;;  %v1230_v37 = vunpack.c.l.b16 %v1119_v33  ;;  %v4725_v5 = vld [vmem:[%s5375_s29 + $0x18] sm:$0xf]  ;;  %v5082_v15 = vld [vmem:[%s5375_s29 + $0xc] sm:$0xff] }
  0x61   : > { %v661_v34 = vunpack.c.l.b16 %v354_v30  ;;  %v1791_v1 = vrot.slane %v1789_v23, 4  ;;  %v1794_v40 = vrot.slane %v1792_v24, 5  ;;  %v1800_v41 = vrot.slane %v1798_v26, 5  ;;  %v4727_v30 = vld [vmem:[%s5375_s29 + $0x20] sm:$0x1] }
  0x62   : > { %4495 = vmatmul.msk.bf16.gmra.mxu3 %vm703_vm4, %v702_v29  ;;  %v364_v39 = vsel %vm5387_vm3, %v359_v31, %v363_v10  ;;  %v1802_v44 = vshrl.u32 %v4723_v12, 16  ;;  %v1122_v49 = vsel %vm5561_vm7, %v1120_v35, %v1121_v43  ;;  %v1808_v55 = vshll.u32 %v4724_v38, 16 }
  0x63   : > { %v662_v46 = vunpack.c.l.b16 %v364_v39  ;;  %v1231_v52 = vunpack.c.l.b16 %v1122_v49  ;;  %v1795_v53 = vor.u32 %v1794_v40, %v1791_v1  ;;  %v3613_v58 = vsel %vm752_vm0, %v4997_v45, 0  ;;  %v4728_v45 = vld [vmem:[%s5375_s29 + $0x24] sm:$0xf]  ;;  %v4729_v49 = vld [vmem:[%s5375_s29 + $0x28] sm:$0xf] }
  0x64   : > { %v1804_v54 = vrot.slane %v1802_v44, 4  ;;  %3622 = vmatpush.bf16.msra.mxu3 %v3613_v58  ;;  %v2669_v60 = vsel %vm752_vm0, %v4819_v50, 0  ;;  %v4011_v61 = vsel %vm752_vm0, %v5046_v2, 0  ;;  %v1810_v4 = vrot.slane %v1808_v55, 5  ;;  %v5083_v58 = vld [vmem:[%s5375_s29 + $0x18] sm:$0xff] }
  0x65   : > { %v690_v57 = vpack.c.b16 %v662_v46, %v661_v34  ;;  %v1262_v43 = vpack.c.b16 %v1231_v52, %v1230_v37  ;;  %2678 = vmatpush.bf16.msra.mxu1 %v2669_v60  ;;  %v1796_v62 = vrot.slane %v1795_v53, 4  ;;  %4020 = vmatpush.bf16.msra.mxu0 %v4011_v61  ;;  %v1125_v7 = vrot.slane %v5446_v28, 5  ;;  %v1067_v52 = vld [vmem:[%s5375_s29 + $0x18] sm:$0xe] }
  0x66   : > { %v1805_v59 = vor.u32 %v1804_v54, %v1800_v41  ;;  %v1813_v9 = vshrl.u32 %v4725_v5, 16  ;;  %v1816_v10 = vshll.u32 %v4725_v5, 16  ;;  %v1822_v13 = vshll.u32 %v4726_v6, 16 }
  0x67   : > { %4483 = vmatmul.msk.bf16.gmra.mxu0 %vm703_vm4, %v690_v57  ;;  %v1801_v11 = vsel %vm5387_vm3, %v1796_v62, %v1800_v41  ;;  %v1826_v14 = vshrl.u32 %v4726_v6, 16  ;;  %v4577_v16 = vrot.slane %v1066_v8, 9  ;;  %v1127_v17 = vrot.slane %v1125_v7, 4  ;;  %v4730_v6 = vld [vmem:[%s5375_s29 + $0x2c] sm:$0x1] }
  0x68   : > { %4560 = vmatmul.msk.bf16.vlgmr.msrb.gmra.mxu1 %vm703_vm4, %v5066_v51  ;;  %v1806_v3 = vrot.slane %v1805_v59, 4  ;;  %v1128_v28 = vrot.slane %v5449_v32, 5  ;;  %v2174_v19 = vunpack.c.l.b16 %v1801_v11  ;;  %v1815_v23 = vrot.slane %v1813_v9, 4  ;;  %v5067_v32 = vld [vmem:[%s5375_s29 + $0xc] sm:$0xff] }
  0x69   : > { %v1818_v24 = vrot.slane %v1816_v10, 5  ;;  %v1824_v26 = vrot.slane %v1822_v13, 5  ;;  %v1828_v29 = vrot.slane %v1826_v14, 4  ;;  %v1126_v31 = vsel %vm5561_vm7, %v4577_v16, %v1125_v7  ;;  %v4732_v16 = vld [vmem:[%s5375_s29 + $0x34] sm:$0xf] }
  0x6a   : > { %v1811_v12 = vsel %vm5387_vm3, %v1806_v3, %v1810_v4  ;;  %v1129_v33 = vsel %vm5561_vm7, %v1127_v17, %v1128_v28  ;;  %v1832_v38 = vshll.u32 %v4727_v30, 16  ;;  %v1232_v1 = vunpack.c.l.b16 %v1126_v31 }
  0x6b   : > { %v2175_v22 = vunpack.c.l.b16 %v1811_v12  ;;  %v1819_v35 = vor.u32 %v1818_v24, %v1815_v23  ;;  %v1829_v37 = vor.u32 %v1828_v29, %v1824_v26  ;;  %v1233_v39 = vunpack.c.l.b16 %v1129_v33  ;;  %v1068_v24 = vld [vmem:[%s5375_s29 + $0x24] sm:$0xe] }
  0x6c   : > { %v1834_v44 = vrot.slane %v1832_v38, 5  ;;  %v1132_v50 = vrot.slane %v5492_v63, 5  ;;  %v1837_v53 = vshrl.u32 %v4728_v45, 16  ;;  %v1840_v55 = vshll.u32 %v4728_v45, 16  ;;  %v4733_v45 = vld [vmem:[%s5375_s29 + $0x38] sm:$0x1] }
  0x6d   : > { %4593 = vmatmul.msk.bf16.vlgmr.msrb.gmra.mxu2 %vm703_vm4, %v1262_v43  ;;  %v2206_v34 = vpack.c.b16 %v2175_v22, %v2174_v19  ;;  %v1820_v40 = vrot.slane %v1819_v35, 4  ;;  %v1830_v41 = vrot.slane %v1829_v37, 4  ;;  %v1263_v46 = vpack.c.b16 %v1233_v39, %v1232_v1 }
  0x6e   : > { %v1846_v2 = vshll.u32 %v4729_v49, 16  ;;  %v1850_v57 = vshrl.u32 %v4729_v49, 16  ;;  %v4578_v43 = vrot.slane %v1067_v52, 9  ;;  %v1134_v59 = vrot.slane %v1132_v50, 4 }
  0x6f   : > { %v1825_v51 = vsel %vm5387_vm3, %v1820_v40, %v1824_v26  ;;  %v1835_v54 = vsel %vm5387_vm3, %v1830_v41, %v1834_v44  ;;  %v1135_v63 = vrot.slane %v5495_v0, 5  ;;  %v1839_v62 = vrot.slane %v1837_v53, 4  ;;  %v5068_v0 = vld [vmem:[%s5375_s29 + $0x18] sm:$0xff]  ;;  %v5069_v53 = vld [vmem:[%s5375_s29 + $0x24] sm:$0xff] }
  0x70   : > { %v2176_v60 = vunpack.c.l.b16 %v1825_v51  ;;  %v2177_v61 = vunpack.c.l.b16 %v1835_v54  ;;  %v1842_v3 = vrot.slane %v1840_v55, 5  ;;  %v1848_v4 = vrot.slane %v1846_v2, 5 }
  0x71   : > { %v1852_v5 = vrot.slane %v1850_v57, 4  ;;  %v1133_v7 = vsel %vm5561_vm7, %v4578_v43, %v1132_v50  ;;  %v1136_v8 = vsel %vm5561_vm7, %v1134_v59, %v1135_v63  ;;  %v1856_v12 = vshll.u32 %v4730_v6, 16  ;;  %v4734_v43 = vld [vmem:[%s5375_s29 + $0x3c] sm:$0xf]  ;;  %v4735_v59 = vld [vmem:[%s5375_s29 + $0x40] sm:$0xf] }
  0x72   : > { %4706 = vmatmul.msk.bf16.vlgmr.msrb.gmra.mxu3 %vm703_vm4, %v5082_v15  ;;  %v2207_v9 = vpack.c.b16 %v2177_v61, %v2176_v60  ;;  %v1843_v10 = vor.u32 %v1842_v3, %v1839_v62  ;;  %v1234_v13 = vunpack.c.l.b16 %v1133_v7  ;;  %v1235_v14 = vunpack.c.l.b16 %v1136_v8  ;;  %v4731_v15 = vld [vmem:[%s5375_s29 + $0x30] sm:$0xf]  ;;  %v5237_v62 = vld [vmem:[%s5375_s29 + $0x34] sm:$0xf] }
  0x73   : > { %v1853_v11 = vor.u32 %v1852_v5, %v1848_v4  ;;  %v1858_v19 = vrot.slane %v1856_v12, 5  ;;  %v1139_v23 = vrot.slane %v5538_v42, 5  ;;  %v1861_v26 = vshrl.u32 %v4731_v15, 16  ;;  %v5084_v42 = vld [vmem:[%s5375_s29 + $0x24] sm:$0xff]  ;;  %v1069_v5 = vld [vmem:[%s5375_s29 + $0x30] sm:$0xe] }
  0x74   : > { %v1844_v17 = vrot.slane %v1843_v10, 4  ;;  %v1264_v22 = vpack.c.b16 %v1235_v14, %v1234_v13  ;;  %v1864_v29 = vshll.u32 %v4731_v15, 16  ;;  %v1870_v30 = vshll.u32 %v4732_v16, 16  ;;  %v5085_v10 = vld [vmem:[%s5375_s29 + $0x30] sm:$0xff]  ;;  %v5238_v14 = vld [vmem:[%s5375_s29 + $0x38] sm:$0x1] }
  0x75   : > { %v1854_v28 = vrot.slane %v1853_v11, 4  ;;  %v1874_v31 = vshrl.u32 %v4732_v16, 16  ;;  %v4579_v35 = vrot.slane %v1068_v24, 9  ;;  %v1142_v37 = vrot.slane %v5542_v48, 5 }
  0x76   : > { %v1849_v33 = vsel %vm5387_vm3, %v1844_v17, %v1848_v4  ;;  %v1863_v38 = vrot.slane %v1861_v26, 4  ;;  %v1866_v1 = vrot.slane %v1864_v29, 5  ;;  %v1872_v39 = vrot.slane %v1870_v30, 5 }
  0x77   : > { %4771 = vmatmul.msk.bf16.vlgmr.msrb.gmra.mxu0 %vm703_vm4, %v2206_v34  ;;  %v1859_v34 = vsel %vm5387_vm3, %v1854_v28, %v1858_v19  ;;  %v1876_v40 = vrot.slane %v1874_v31, 4  ;;  %v2178_v41 = vunpack.c.l.b16 %v1849_v33  ;;  %v1880_v51 = vshll.u32 %v4733_v45, 16  ;;  %v5070_v33 = vld [vmem:[%s5375_s29 + $0x30] sm:$0xff] }
  0x78   : > { %4561 = vmatmul.msk.bf16.gmra.mxu1 %vm703_vm4, %v5067_v32  ;;  %v1141_v32 = vrot.slane %v1139_v23, 4  ;;  %v2179_v44 = vunpack.c.l.b16 %v1859_v34  ;;  %v1867_v48 = vor.u32 %v1866_v1, %v1863_v38  ;;  %v1146_v3 = vrot.slane %v5237_v62, 5 }
  0x79   : > { %v1877_v50 = vor.u32 %v1876_v40, %v1872_v39  ;;  %v1885_v6 = vshrl.u32 %v4734_v43, 16  ;;  %v1888_v7 = vshll.u32 %v4734_v43, 16  ;;  %v1894_v8 = vshll.u32 %v4735_v59, 16 }
  0x7a   : > { %v1143_v49 = vsel %vm5561_vm7, %v1141_v32, %v1142_v37  ;;  %v2208_v52 = vpack.c.b16 %v2179_v44, %v2178_v41  ;;  %v1868_v2 = vrot.slane %v1867_v48, 4  ;;  %v4580_v12 = vrot.slane %v1069_v5, 9  ;;  %v4737_v41 = vld [vmem:[%s5375_s29 + $0x48] sm:$0xf]  ;;  %v4738_v44 = vld [vmem:[%s5375_s29 + $0x4c] sm:$0xf] }
  0x7b   : > { %v1237_v55 = vunpack.c.l.b16 %v1143_v49  ;;  %v1878_v57 = vrot.slane %v1877_v50, 4  ;;  %v1148_v13 = vrot.slane %v1146_v3, 4  ;;  %v1149_v15 = vrot.slane %v5238_v14, 5  ;;  %v1070_v50 = vld [vmem:[%s5375_s29 + $0x3c] sm:$0xe] }
  0x7c   : > { %v1873_v60 = vsel %vm5387_vm3, %v1868_v2, %v1872_v39  ;;  %v1887_v16 = vrot.slane %v1885_v6, 4  ;;  %v1890_v17 = vrot.slane %v1888_v7, 5  ;;  %v1896_v28 = vrot.slane %v1894_v8, 5  ;;  %v4739_v5 = vld [vmem:[%s5375_s29 + $0x50] sm:$0x1] }
  0x7d   : > { %4594 = vmatmul.msk.bf16.gmra.mxu2 %vm703_vm4, %v1263_v46  ;;  %v1140_v46 = vsel %vm5561_vm7, %v4579_v35, %v1139_v23  ;;  %v1147_v23 = vsel %vm5561_vm7, %v4580_v12, %v1146_v3  ;;  %v1150_v24 = vsel %vm5561_vm7, %v1148_v13, %v1149_v15  ;;  %v1928_v12 = vshll.u32 %v4739_v5, 16  ;;  %v4740_v15 = vld [vmem:[%s5375_s29 + $0x54] sm:$0xf] }
  0x7e   : > { %v1236_v54 = vunpack.c.l.b16 %v1140_v46  ;;  %v1891_v29 = vor.u32 %v1890_v17, %v1887_v16  ;;  %v1238_v35 = vunpack.c.l.b16 %v1147_v23  ;;  %v1239_v32 = vunpack.c.l.b16 %v1150_v24  ;;  %v4741_v16 = vld [vmem:[%s5375_s29 + $0x58] sm:$0xf] }
  0x7f   : > { %v1153_v46 = vrot.slane %v5415_v20, 5  ;;  %v1156_v20 = vrot.slane %v5420_v25, 5 }
  0x80   : > { %v1265_v63 = vpack.c.b16 %v1237_v55, %v1236_v54  ;;  %v1266_v40 = vpack.c.b16 %v1239_v32, %v1238_v35  ;;  %v1922_v54 = vshrl.u32 %v4738_v44, 16  ;;  %v5086_v55 = vld [vmem:[%s5375_s29 + $0x3c] sm:$0xff]  ;;  %v1071_v35 = vld [vmem:[%s5375_s29 + $0x48] sm:$0xe] }
  0x82   : > { %4707 = vmatmul.msk.bf16.gmra.mxu3 %vm703_vm4, %v5083_v58  ;;  %v1882_v58 = vrot.slane %v1880_v51, 5  ;;  %v1909_v51 = vshrl.u32 %v4737_v41, 16  ;;  %v1924_v3 = vrot.slane %v1922_v54, 4 }
  0x84   : > { %v1883_v61 = vsel %vm5387_vm3, %v1878_v57, %v1882_v58  ;;  %v4581_v57 = vrot.slane %v1070_v50, 9  ;;  %v1155_v58 = vrot.slane %v1153_v46, 4 }
  0x85   : > { %v2181_v11 = vunpack.c.l.b16 %v1883_v61 }
  0x86   : > { %v1154_v6 = vsel %vm5561_vm7, %v4581_v57, %v1153_v46  ;;  %v1157_v7 = vsel %vm5561_vm7, %v1155_v58, %v1156_v20 }
  0x87   : > { %4772 = vmatmul.msk.bf16.gmra.mxu0 %vm703_vm4, %v2207_v9  ;;  %v1898_v9 = vshrl.u32 %v4735_v59, 16  ;;  %v1240_v13 = vunpack.c.l.b16 %v1154_v6  ;;  %v1241_v14 = vunpack.c.l.b16 %v1157_v7 }
  0x88   : > { %4562 = vmatmul.msk.bf16.gmra.mxu1 %vm703_vm4, %v5068_v0  ;;  %v2180_v0 = vunpack.c.l.b16 %v1873_v60  ;;  %v1911_v60 = vrot.slane %v1909_v51, 4 }
  0x89   : > { %v1900_v19 = vrot.slane %v1898_v9, 4  ;;  %v1267_v23 = vpack.c.b16 %v1241_v14, %v1240_v13  ;;  %v1167_v14 = vrot.slane %v5505_v21, 5  ;;  %v1170_v21 = vrot.slane %v5510_v27, 5 }
  0x8a   : > { %v2209_v26 = vpack.c.b16 %v2181_v11, %v2180_v0  ;;  %v5071_v0 = vld [vmem:[%s5375_s29 + $0x3c] sm:$0xff] }
  0x8b   : > { %v1901_v30 = vor.u32 %v1900_v19, %v1896_v28 }
  0x8d   : > { %4595 = vmatmul.msk.bf16.gmra.mxu2 %vm703_vm4, %v1264_v22  ;;  %v4736_v22 = vld [vmem:[%s5375_s29 + $0x44] sm:$0x1]  ;;  %v1902_v38 = vrot.slane %v1901_v30, 4  ;;  %v1942_v30 = vshll.u32 %v4741_v16, 16 }
  0x8e   : > { %v1904_v31 = vshll.u32 %v4736_v22, 16  ;;  %v1930_v22 = vrot.slane %v1928_v12, 5 }
  0x90   : > { %v1906_v1 = vrot.slane %v1904_v31, 5  ;;  %v1160_v31 = vrot.slane %v5459_v47, 5  ;;  %v4582_v47 = vrot.slane %v1071_v35, 9  ;;  %v1169_v35 = vrot.slane %v1167_v14, 4 }
  0x92   : > { %4708 = vmatmul.msk.bf16.gmra.mxu3 %vm703_vm4, %v5084_v42  ;;  %v1892_v42 = vrot.slane %v1891_v29, 4  ;;  %v1907_v48 = vsel %vm5387_vm3, %v1902_v38, %v1906_v1  ;;  %v1936_v29 = vshll.u32 %v4740_v15, 16  ;;  %v1161_v58 = vsel %vm5561_vm7, %v4582_v47, %v1160_v31 }
  0x93   : > { %v2183_v59 = vunpack.c.l.b16 %v1907_v48  ;;  %v1163_v48 = vrot.slane %v5464_v56, 5 }
  0x94   : > { %v1897_v49 = vsel %vm5387_vm3, %v1892_v42, %v1896_v28 }
  0x95   : > { %v2182_v43 = vunpack.c.l.b16 %v1897_v49  ;;  %v1162_v49 = vrot.slane %v1160_v31, 4 }
  0x97   : > { %4773 = vmatmul.msk.bf16.gmra.mxu0 %vm703_vm4, %v2208_v52  ;;  %v1912_v52 = vshll.u32 %v4737_v41, 16  ;;  %v2210_v25 = vpack.c.b16 %v2183_v59, %v2182_v43  ;;  %v1944_v41 = vrot.slane %v1942_v30, 5  ;;  %v1164_v20 = vsel %vm5561_vm7, %v1162_v49, %v1163_v48  ;;  %v5088_v30 = vld [vmem:[%s5375_s29 + $0x54] sm:$0xff] }
  0x98   : > { %4563 = vmatmul.msk.bf16.gmra.mxu1 %vm703_vm4, %v5069_v53  ;;  %v1918_v53 = vshll.u32 %v4738_v44, 16  ;;  %v5087_v44 = vld [vmem:[%s5375_s29 + $0x48] sm:$0xff]  ;;  %v1171_v48 = vsel %vm5561_vm7, %v1169_v35, %v1170_v21 }
  0x99   : > { %v1914_v61 = vrot.slane %v1912_v52, 5 }
  0x9a   : > { %v1920_v62 = vrot.slane %v1918_v53, 5  ;;  %v4742_v53 = vld [vmem:[%s5375_s29 + $0x5c] sm:$0x1] }
  0x9b   : > { %v1952_v43 = vshll.u32 %v4742_v53, 16  ;;  %v5073_v53 = vld [vmem:[%s5375_s29 + $0x54] sm:$0xff] }
  0x9c   : > { %v1925_v11 = vor.u32 %v1924_v3, %v1920_v62 }
  0x9d   : > { %v5659_v4 = vpop.f32.mrf.mxu1  ;;  %4596 = vmatmul.msk.bf16.gmra.mxu2 %vm703_vm4, %v1265_v63  ;;  %v1954_v7 = vrot.slane %v1952_v43, 5 }
  0x9e   : > { %v1926_v19 = vrot.slane %v1925_v11, 4 }
  0xa0   : > { %v1931_v42 = vsel %vm5387_vm3, %v1926_v19, %v1930_v22 }
  0xa1   : > { %v2185_v52 = vunpack.c.l.b16 %v1931_v42 }
  0xa2   : > { %4709 = vmatmul.msk.bf16.gmra.mxu3 %vm703_vm4, %v5085_v10  ;;  %v1915_v10 = vor.u32 %v1914_v61, %v1911_v60  ;;  %v5072_v60 = vld [vmem:[%s5375_s29 + $0x48] sm:$0xff]  ;;  %v1242_v61 = vunpack.c.l.b16 %v1161_v58 }
  0xa4   : > { %v1916_v28 = vrot.slane %v1915_v10, 4  ;;  %v4744_v10 = vld [vmem:[%s5375_s29 + $0x64] sm:$0xf] }
  0xa5   : > { %v5672_v34 = vpop.f32.mrf.mxu1  ;;  %v1966_v22 = vshll.u32 %v4744_v10, 16 }
  0xa6   : > { %v1921_v32 = vsel %vm5387_vm3, %v1916_v28, %v1920_v62  ;;  %v1243_v62 = vunpack.c.l.b16 %v1164_v20  ;;  %v1245_v20 = vunpack.c.l.b16 %v1171_v48 }
  0xa7   : > { %v5674_v37 = vpop.f32.mrf.mxu2  ;;  %4774 = vmatmul.msk.bf16.gmra.mxu0 %vm703_vm4, %v2209_v26  ;;  %v1933_v26 = vshrl.u32 %v4740_v15, 16  ;;  %v2184_v51 = vunpack.c.l.b16 %v1921_v32 }
  0xa8   : > { %4564 = vmatmul.msk.bf16.gmra.mxu1 %vm703_vm4, %v5070_v33  ;;  %v1946_v33 = vshrl.u32 %v4741_v16, 16  ;;  %v1268_v11 = vpack.c.b16 %v1243_v62, %v1242_v61  ;;  %v1072_v16 = vld [vmem:[%s5375_s29 + $0x54] sm:$0xe]  ;;  %v4746_v62 = vld [vmem:[%s5375_s29 + $0x6c] sm:$0xf] }
  0xa9   : > { %v1935_v1 = vrot.slane %v1933_v26, 4  ;;  %v2211_v59 = vpack.c.b16 %v2185_v52, %v2184_v51 }
  0xaa   : > { %v5678_v39 = vpop.f32.mrf.mxu0  ;;  %v1948_v50 = vrot.slane %v1946_v33, 4  ;;  %v4583_v33 = vrot.slane %v1072_v16, 9  ;;  %v1984_v16 = vshll.u32 %v4746_v62, 16 }
  0xab   : > { %v5682_v45 = vpop.f32.mrf.mxu3 }
  0xac   : > { %v1949_v56 = vor.u32 %v1948_v50, %v1944_v41  ;;  %v1168_v49 = vsel %vm5561_vm7, %v4583_v33, %v1167_v14  ;;  %v1981_v14 = vshrl.u32 %v4746_v62, 16 }
  0xad   : > { %4597 = vmatmul.msk.bf16.gmra.mxu2 %vm703_vm4, %v1266_v40  ;;  %v1938_v40 = vrot.slane %v1936_v29, 5  ;;  %v1244_v58 = vunpack.c.l.b16 %v1168_v49  ;;  %v4748_v49 = vld [vmem:[%s5375_s29 + $0x74] sm:$0x1] }
  0xae   : > { %v1950_v6 = vrot.slane %v1949_v56, 4 }
  0xaf   : > { %v5692_v2 = vpop.f32.mrf.mxu1  ;;  %v5695_v63 = vpop.f32.mrf.mxu2  ;;  %v1269_v61 = vpack.c.b16 %v1245_v20, %v1244_v58  ;;  %v2000_v20 = vshll.u32 %v4748_v49, 16  ;;  %v5090_v49 = vld [vmem:[%s5375_s29 + $0x6c] sm:$0xff] }
  0xb0   : > { %v1955_v13 = vsel %vm5387_vm3, %v1950_v6, %v1954_v7  ;;  %v5239_v7 = vld [vmem:[%s5375_s29 + $0x64] sm:$0xf] }
  0xb1   : > { %v2187_v31 = vunpack.c.l.b16 %v1955_v13  ;;  %v1073_v13 = vld [vmem:[%s5375_s29 + $0x60] sm:$0xe] }
  0xb2   : > { %4710 = vmatmul.msk.bf16.gmra.mxu3 %vm703_vm4, %v5086_v55  ;;  %v5703_v8 = vpop.f32.mrf.mxu0  ;;  %v1939_v55 = vor.u32 %v1938_v40, %v1935_v1  ;;  %v1968_v1 = vrot.slane %v1966_v22, 5 }
  0xb3   : > { %v5705_v9 = vpop.f32.mrf.mxu3 }
  0xb4   : > { %v1940_v5 = vrot.slane %v1939_v55, 4 }
  0xb6   : > { %v1945_v12 = vsel %vm5387_vm3, %v1940_v5, %v1944_v41  ;;  %v4747_v5 = vld [vmem:[%s5375_s29 + $0x70] sm:$0xf] }
  0xb7   : > { %4775 = vmatmul.msk.bf16.gmra.mxu0 %vm703_vm4, %v2210_v25  ;;  %v5711_v17 = vpop.f32.mrf.mxu1  ;;  %v2186_v29 = vunpack.c.l.b16 %v1945_v12 }
  0xb8   : > { %4565 = vmatmul.msk.bf16.gmra.mxu1 %vm703_vm4, %v5071_v0  ;;  %v4743_v0 = vld [vmem:[%s5375_s29 + $0x60] sm:$0xf] }
  0xb9   : > { %v1957_v28 = vshrl.u32 %v4743_v0, 16  ;;  %v1960_v19 = vshll.u32 %v4743_v0, 16  ;;  %v2212_v50 = vpack.c.b16 %v2187_v31, %v2186_v29  ;;  %v1174_v0 = vrot.slane %v5239_v7, 5 }
  0xba   : > { %v5714_v24 = vpop.f32.mrf.mxu2  ;;  %v4584_v31 = vrot.slane %v1073_v13, 9 }
  0xbb   : > { %v1959_v32 = vrot.slane %v1957_v28, 4  ;;  %v1962_v42 = vrot.slane %v1960_v19, 5  ;;  %v1990_v28 = vshll.u32 %v4747_v5, 16  ;;  %v1994_v19 = vshrl.u32 %v4747_v5, 16 }
  0xbc   : > { %v1176_v33 = vrot.slane %v1174_v0, 4  ;;  %v1175_v48 = vsel %vm5561_vm7, %v4584_v31, %v1174_v0 }
  0xbd   : > { %4598 = vmatmul.msk.bf16.gmra.mxu2 %vm703_vm4, %v1267_v23  ;;  %v1970_v23 = vshrl.u32 %v4744_v10, 16  ;;  %v1963_v27 = vor.u32 %v1962_v42, %v1959_v32  ;;  %v1983_v42 = vrot.slane %v1981_v14, 4  ;;  %v4750_v14 = vld [vmem:[%s5375_s29 + $0x7c] sm:$0xf] }
  0xbe   : > { %v5722_v38 = vpop.f32.mrf.mxu0 }
  0xbf   : > { %v5726_v46 = vpop.f32.mrf.mxu3  ;;  %v1972_v40 = vrot.slane %v1970_v23, 4  ;;  %v1964_v43 = vrot.slane %v1963_v27, 4  ;;  %v5240_v23 = vld [vmem:[%s5375_s29 + $0x68] sm:$0x1] }
  0xc0   : > { %v1177_v29 = vrot.slane %v5240_v23, 5 }
  0xc1   : > { %v5730_v54 = vpop.f32.mrf.mxu1  ;;  %v1973_v51 = vor.u32 %v1972_v40, %v1968_v1  ;;  %v1992_v40 = vrot.slane %v1990_v28, 5 }
  0xc2   : > { %4711 = vmatmul.msk.bf16.gmra.mxu3 %vm703_vm4, %v5087_v44  ;;  %v5733_v57 = vpop.f32.mrf.mxu2  ;;  %v4745_v44 = vld [vmem:[%s5375_s29 + $0x68] sm:$0x1] }
  0xc3   : > { %v1976_v52 = vshll.u32 %v4745_v44, 16  ;;  %v1996_v44 = vrot.slane %v1994_v19, 4  ;;  %v1074_v19 = vld [vmem:[%s5375_s29 + $0x6c] sm:$0xe] }
  0xc5   : > { %v1997_v58 = vor.u32 %v1996_v44, %v1992_v40 }
  0xc6   : > { %v5740_v3 = vpop.f32.mrf.mxu0 }
  0xc7   : > { %4776 = vmatmul.msk.bf16.gmra.mxu0 %vm703_vm4, %v2211_v59  ;;  %v5743_v25 = vpop.f32.mrf.mxu3  ;;  %v1974_v59 = vrot.slane %v1973_v51, 4  ;;  %v1998_v0 = vrot.slane %v1997_v58, 4 }
  0xc8   : > { %4566 = vmatmul.msk.bf16.gmra.mxu1 %vm703_vm4, %v5072_v60  ;;  %v1978_v60 = vrot.slane %v1976_v52, 5  ;;  %v5074_v52 = vld [vmem:[%s5375_s29 + $0x60] sm:$0xff] }
  0xc9   : > { %v5753_v15 = vpop.f32.mrf.mxu1 }
  0xca   : > { %v1979_v12 = vsel %vm5387_vm3, %v1974_v59, %v1978_v60  ;;  %v1246_v60 = vunpack.c.l.b16 %v1175_v48 }
  0xcb   : > { %v2189_v21 = vunpack.c.l.b16 %v1979_v12  ;;  %v4749_v12 = vld [vmem:[%s5375_s29 + $0x78] sm:$0xf] }
  0xcc   : > { %v2005_v23 = vshrl.u32 %v4749_v12, 16 }
  0xcd   : > { %v5756_v26 = vpop.f32.mrf.mxu2  ;;  %4599 = vmatmul.msk.bf16.gmra.mxu2 %vm703_vm4, %v1268_v11  ;;  %v1969_v11 = vsel %vm5387_vm3, %v1964_v43, %v1968_v1  ;;  %v1986_v1 = vrot.slane %v1984_v16, 5  ;;  %v5241_v16 = vld [vmem:[%s5375_s29 + $0x70] sm:$0xf] }
  0xce   : > { %v2188_v35 = vunpack.c.l.b16 %v1969_v11  ;;  %v2002_v11 = vrot.slane %v2000_v20, 5  ;;  %v1181_v28 = vrot.slane %v5241_v16, 5 }
  0xd0   : > { %v5761_v41 = vpop.f32.mrf.mxu0  ;;  %v2213_v27 = vpack.c.b16 %v2189_v21, %v2188_v35  ;;  %v2003_v31 = vsel %vm5387_vm3, %v1998_v0, %v2002_v11  ;;  %v2018_v35 = vshrl.u32 %v4750_v14, 16 }
  0xd1   : > { %v5764_v47 = vpop.f32.mrf.mxu3 }
  0xd2   : > { %4712 = vmatmul.msk.bf16.gmra.mxu3 %vm703_vm4, %v5088_v30  ;;  %v5089_v30 = vld [vmem:[%s5375_s29 + $0x60] sm:$0xff] }
  0xd5   : > { %v5772_v55 = vpop.f32.mrf.mxu1  ;;  %v5774_v56 = vpop.f32.mrf.mxu2 }
  0xd7   : > { %4777 = vmatmul.msk.bf16.gmra.mxu0 %vm703_vm4, %v2212_v50  ;;  %v1178_v50 = vsel %vm5561_vm7, %v1176_v33, %v1177_v29  ;;  %v2008_v29 = vshll.u32 %v4749_v12, 16  ;;  %v2014_v33 = vshll.u32 %v4750_v14, 16  ;;  %v5075_v14 = vld [vmem:[%s5375_s29 + $0x6c] sm:$0xff] }
  0xd8   : > { %4567 = vmatmul.msk.bf16.gmra.mxu1 %vm703_vm4, %v5073_v53  ;;  %v5780_v6 = vpop.f32.mrf.mxu0  ;;  %v1987_v53 = vor.u32 %v1986_v1, %v1983_v42  ;;  %v5242_v1 = vld [vmem:[%s5375_s29 + $0x74] sm:$0x1] }
  0xd9   : > { %v5783_v10 = vpop.f32.mrf.mxu3  ;;  %v1184_v44 = vrot.slane %v5242_v1, 5  ;;  %v2010_v58 = vrot.slane %v2008_v29, 5 }
  0xda   : > { %v1988_v7 = vrot.slane %v1987_v53, 4  ;;  %v2007_v53 = vrot.slane %v2005_v23, 4 }
  0xdc   : > { %v2011_v12 = vor.u32 %v2010_v58, %v2007_v53  ;;  %v1075_v58 = vld [vmem:[%s5375_s29 + $0x78] sm:$0xe] }
  0xdd   : > { %4600 = vmatmul.msk.bf16.gmra.mxu2 %vm703_vm4, %v1269_v61  ;;  %v5791_v22 = vpop.f32.mrf.mxu1  ;;  %v1247_v61 = vunpack.c.l.b16 %v1178_v50  ;;  %v4585_v50 = vrot.slane %v1074_v19, 9 }
  0xdf   : > { %v1270_v13 = vpack.c.b16 %v1247_v61, %v1246_v60  ;;  %v2020_v60 = vrot.slane %v2018_v35, 4  ;;  %v1182_v0 = vsel %vm5561_vm7, %v4585_v50, %v1181_v28 }
  0xe0   : > { %v5795_v32 = vpop.f32.mrf.mxu2 }
  0xe2   : > { %4713 = vmatmul.msk.bf16.gmra.mxu3 %vm703_vm4, %v5089_v30  ;;  %v1993_v30 = vsel %vm5387_vm3, %v1988_v7, %v1992_v40  ;;  %v4751_v7 = vld [vmem:[%s5375_s29 + $0x80] sm:$0x1] }
  0xe3   : > { %v2190_v40 = vunpack.c.l.b16 %v1993_v30  ;;  %v2024_v19 = vshll.u32 %v4751_v7, 16 }
  0xe4   : > { %v5803_v51 = vpop.f32.mrf.mxu0 }
  0xe5   : > { %v5806_v43 = vpop.f32.mrf.mxu3  ;;  %v985_v59 = vpop.f32.mrf.mxu1  ;;  %v2026_v1 = vrot.slane %v2024_v19, 5  ;;  %v4586_v19 = vrot.slane %v1075_v58, 9 }
  0xe6   : > { %v986_v62 = vadd.f32 %v985_v59, %v5678_v39  ;;  %v2016_v59 = vrot.slane %v2014_v33, 5  ;;  %v2012_v33 = vrot.slane %v2011_v12, 4 }
  0xe7   : > { %4778 = vmatmul.msk.bf16.gmra.mxu0 %vm703_vm4, %v2213_v27  ;;  %v1183_v27 = vrot.slane %v1181_v28, 4 }
  0xe8   : > { %v5810_v5 = vpop.f32.mrf.mxu2  ;;  %4568 = vmatmul.msk.bf16.gmra.mxu1 %vm703_vm4, %v5074_v52  ;;  %v2191_v52 = vunpack.c.l.b16 %v2003_v31  ;;  %v2021_v16 = vor.u32 %v2020_v60, %v2016_v59 }
  0xea   : > { %v2214_v11 = vpack.c.b16 %v2191_v52, %v2190_v40  ;;  %v4753_v40 = vld [vmem:[%s5375_s29 + $0x88] sm:$0xf]  ;;  %v5243_v52 = vld [vmem:[%s5375_s29 + $0x7c] sm:$0xf] }
  0xeb   : > { %v1188_v53 = vrot.slane %v5243_v52, 5 }
  0xec   : > { %v5817_v39 = vpop.f32.mrf.mxu0 }
  0xed   : > { %v5823_v21 = vpop.f32.mrf.mxu3  ;;  %4601 = vmatmul.msk.bf16.gmra.mxu2 %vm703_vm4, %v1270_v13  ;;  %v987_v42 = vpop.f32.mrf.mxu1 }
  0xee   : > { %v988_v48 = vadd.f32 %v987_v42, %v5703_v8  ;;  %v1185_v8 = vsel %vm5561_vm7, %v1183_v27, %v1184_v44  ;;  %v2022_v42 = vrot.slane %v2021_v16, 4  ;;  %v4752_v44 = vld [vmem:[%s5375_s29 + $0x84] sm:$0xf]  ;;  %v5091_v16 = vld [vmem:[%s5375_s29 + $0x78] sm:$0xff] }
  0xef   : > { %v1249_v30 = vunpack.c.l.b16 %v1185_v8  ;;  %v2032_v7 = vshll.u32 %v4752_v44, 16  ;;  %v2042_v8 = vshrl.u32 %v4753_v40, 16 }
  0xf0   : > { %v1338_v20 = vpop.f32.mrf.mxu2 }
  0xf1   : > { %v1418_v61 = vadd.f32 %v1338_v20, %v986_v62  ;;  %v1248_v62 = vunpack.c.l.b16 %v1182_v0  ;;  %v2029_v20 = vshrl.u32 %v4752_v44, 16  ;;  %v2038_v0 = vshll.u32 %v4753_v40, 16 }
  0xf2   : > { %4714 = vmatmul.msk.bf16.gmra.mxu3 %vm703_vm4, %v5090_v49 }
  0xf3   : > { %v1271_v27 = vpack.c.b16 %v1249_v30, %v1248_v62  ;;  %v2031_v30 = vrot.slane %v2029_v20, 4 }
  0xf4   : > { %v2282_v13 = vpop.f32.mrf.mxu0 }
  0xf5   : > { %v1628_v23 = vpop.f32.mrf.mxu3  ;;  %v990_v29 = vpop.f32.mrf.mxu1 }
  0xf6   : > { %v1708_v31 = vadd.f32 %v1628_v23, %v1418_v61  ;;  %v991_v28 = vadd.f32 %v990_v29, %v5722_v38  ;;  %v2017_v38 = vsel %vm5387_vm3, %v2012_v33, %v2016_v59  ;;  %v2027_v61 = vsel %vm5387_vm3, %v2022_v42, %v2026_v1 }
  0xf7   : > { %4779 = vmatmul.msk.bf16.gmra.mxu0 %vm703_vm4, %v2214_v11  ;;  %v5244_v11 = vld [vmem:[%s5375_s29 + $0x80] sm:$0x1]  ;;  %v1190_v23 = vrot.slane %v1188_v53, 4  ;;  %v2192_v29 = vunpack.c.l.b16 %v2017_v38  ;;  %v2193_v62 = vunpack.c.l.b16 %v2027_v61  ;;  %v2034_v33 = vrot.slane %v2032_v7, 5  ;;  %v5076_v38 = vld [vmem:[%s5375_s29 + $0x78] sm:$0xff] }
  0xf8   : > { %v1340_v35 = vpop.f32.mrf.mxu2  ;;  %4569 = vmatmul.msk.bf16.gmra.mxu1 %vm703_vm4, %v5075_v14  ;;  %v5840_v49 = vadd.f32 %v2282_v13, %v1708_v31  ;;  %v1191_v12 = vrot.slane %v5244_v11, 5  ;;  %v2044_v42 = vrot.slane %v2042_v8, 4 }
  0xf9   : > { %v1419_v50 = vadd.f32 %v1340_v35, %v988_v48  ;;  %v2040_v35 = vrot.slane %v2038_v0, 5  ;;  %v2215_v40 = vpack.c.b16 %v2193_v62, %v2192_v29  ;;  %v2035_v58 = vor.u32 %v2034_v33, %v2031_v30  ;;  %v4756_v29 = vld [vmem:[%s5375_s29 + $0x94] sm:$0xf]  ;;  %v5245_v62 = vld [vmem:[%s5375_s29 + $0x88] sm:$0xf] }
  0xfa   : > { %v1195_v30 = vrot.slane %v5245_v62, 5 }
  0xfb   : > { %v2045_v20 = vor.u32 %v2044_v42, %v2040_v35 }
  0xfc   : > { %v2284_v60 = vpop.f32.mrf.mxu0 }
  0xfd   : > { %v1630_v48 = vpop.f32.mrf.mxu3  ;;  %4602 = vmatmul.msk.bf16.gmra.mxu2 %vm703_vm4, %v1271_v27  ;;  %v992_v13 = vpop.f32.mrf.mxu1  ;;  %v4754_v27 = vld [vmem:[%s5375_s29 + $0x8c] sm:$0x1] }
  0xfe   : > { %v1709_v14 = vadd.f32 %v1630_v48, %v1419_v50  ;;  %v993_v59 = vadd.f32 %v992_v13, %v5740_v3  ;;  %v1189_v50 = vsel %vm5561_vm7, %v4586_v19, %v1188_v53  ;;  %v1192_v3 = vsel %vm5561_vm7, %v1190_v23, %v1191_v12 }
  0xff   : > { %v2048_v61 = vshll.u32 %v4754_v27, 16  ;;  %v1251_v0 = vunpack.c.l.b16 %v1192_v3  ;;  %v2036_v12 = vrot.slane %v2035_v58, 4  ;;  %v2046_v48 = vrot.slane %v2045_v20, 4  ;;  %v5092_v20 = vld [vmem:[%s5375_s29 + $0x84] sm:$0xff] }
 0x100   : > { %v1343_v31 = vpop.f32.mrf.mxu2  ;;  %v5853_v1 = vadd.f32 %v2284_v60, %v1709_v14  ;;  %v4755_v14 = vld [vmem:[%s5375_s29 + $0x90] sm:$0xf]  ;;  %v2066_v3 = vshrl.u32 %v4756_v29, 16 }
 0x101   : > { %v1420_v44 = vadd.f32 %v1343_v31, %v991_v28  ;;  %v1250_v28 = vunpack.c.l.b16 %v1189_v50  ;;  %v2050_v13 = vrot.slane %v2048_v61, 5  ;;  %v1076_v31 = vld [vmem:[%s5375_s29 + $0x84] sm:$0xe]  ;;  %v2056_v33 = vshll.u32 %v4755_v14, 16 }
 0x102   : > { %4715 = vmatmul.msk.bf16.gmra.mxu3 %vm703_vm4, %v5091_v16  ;;  %v2062_v50 = vshll.u32 %v4756_v29, 16 }
 0x103   : > { %v1272_v23 = vpack.c.b16 %v1251_v0, %v1250_v28  ;;  %v2051_v27 = vsel %vm5387_vm3, %v2046_v48, %v2050_v13  ;;  %v2068_v48 = vrot.slane %v2066_v3, 4 }
 0x104   : > { %v2287_v52 = vpop.f32.mrf.mxu0 }
 0x105   : > { %v1633_v7 = vpop.f32.mrf.mxu3  ;;  %v995_v60 = vpop.f32.mrf.mxu1 }
 0x106   : > { %v1710_v8 = vadd.f32 %v1633_v7, %v1420_v44  ;;  %v996_v53 = vadd.f32 %v995_v60, %v5761_v41  ;;  %v2053_v41 = vshrl.u32 %v4755_v14, 16  ;;  %v2041_v44 = vsel %vm5387_vm3, %v2036_v12, %v2040_v35 }
 0x107   : > { %4780 = vmatmul.msk.bf16.gmra.mxu0 %vm703_vm4, %v2215_v40  ;;  %v5246_v40 = vld [vmem:[%s5375_s29 + $0x8c] sm:$0x1]  ;;  %v4587_v7 = vrot.slane %v1076_v31, 9  ;;  %v1197_v60 = vrot.slane %v1195_v30, 4  ;;  %v2194_v28 = vunpack.c.l.b16 %v2041_v44  ;;  %v2195_v35 = vunpack.c.l.b16 %v2051_v27 }
 0x108   : > { %v1345_v11 = vpop.f32.mrf.mxu2  ;;  %4570 = vmatmul.msk.bf16.gmra.mxu1 %vm703_vm4, %v5076_v38  ;;  %v5866_v16 = vadd.f32 %v2287_v52, %v1710_v8  ;;  %v1198_v52 = vrot.slane %v5246_v40, 5  ;;  %v2055_v0 = vrot.slane %v2053_v41, 4  ;;  %v2058_v8 = vrot.slane %v2056_v33, 5  ;;  %v5077_v41 = vld [vmem:[%s5375_s29 + $0x84] sm:$0xff] }
 0x109   : > { %v1421_v19 = vadd.f32 %v1345_v11, %v993_v59  ;;  %v2064_v12 = vrot.slane %v2062_v50, 5  ;;  %v2216_v29 = vpack.c.b16 %v2195_v35, %v2194_v28  ;;  %v4759_v28 = vld [vmem:[%s5375_s29 + $0xa0] sm:$0xf]  ;;  %v5247_v35 = vld [vmem:[%s5375_s29 + $0x94] sm:$0xf] }
 0x10a   : > { %v2059_v62 = vor.u32 %v2058_v8, %v2055_v0  ;;  %v1202_v0 = vrot.slane %v5247_v35, 5  ;;  %v1077_v8 = vld [vmem:[%s5375_s29 + $0x90] sm:$0xe] }
 0x10b   : > { %v2069_v33 = vor.u32 %v2068_v48, %v2064_v12 }
 0x10c   : > { %v2289_v42 = vpop.f32.mrf.mxu0  ;;  %v2060_v40 = vrot.slane %v2059_v62, 4 }
 0x10d   : > { %v1635_v59 = vpop.f32.mrf.mxu3  ;;  %4603 = vmatmul.msk.bf16.gmra.mxu2 %vm703_vm4, %v1272_v23  ;;  %v997_v38 = vpop.f32.mrf.mxu1  ;;  %v4757_v23 = vld [vmem:[%s5375_s29 + $0x98] sm:$0x1] }
 0x10e   : > { %v1711_v58 = vadd.f32 %v1635_v59, %v1421_v19  ;;  %v998_v61 = vadd.f32 %v997_v38, %v5780_v6  ;;  %v1196_v19 = vsel %vm5561_vm7, %v4587_v7, %v1195_v30  ;;  %v1199_v6 = vsel %vm5561_vm7, %v1197_v60, %v1198_v52 }
 0x10f   : > { %v2072_v44 = vshll.u32 %v4757_v23, 16  ;;  %v1253_v50 = vunpack.c.l.b16 %v1199_v6  ;;  %v2070_v59 = vrot.slane %v2069_v33, 4  ;;  %v2090_v6 = vshrl.u32 %v4759_v28, 16  ;;  %v5093_v33 = vld [vmem:[%s5375_s29 + $0x90] sm:$0xff] }
 0x110   : > { %v1348_v11 = vpop.f32.mrf.mxu2  ;;  %v5879_v13 = vadd.f32 %v2289_v42, %v1711_v58  ;;  %v4758_v58 = vld [vmem:[%s5375_s29 + $0x9c] sm:$0xf] }
 0x111   : > { %v1422_v14 = vadd.f32 %v1348_v11, %v996_v53  ;;  %v1252_v53 = vunpack.c.l.b16 %v1196_v19  ;;  %v2074_v38 = vrot.slane %v2072_v44, 5  ;;  %v2077_v11 = vshrl.u32 %v4758_v58, 16 }
 0x112   : > { %4716 = vmatmul.msk.bf16.gmra.mxu3 %vm703_vm4, %v5092_v20  ;;  %v2080_v23 = vshll.u32 %v4758_v58, 16  ;;  %v2086_v19 = vshll.u32 %v4759_v28, 16  ;;  %v4588_v44 = vrot.slane %v1077_v8, 9 }
 0x113   : > { %v1273_v60 = vpack.c.b16 %v1253_v50, %v1252_v53  ;;  %v2079_v50 = vrot.slane %v2077_v11, 4 }
 0x114   : > { %v2292_v31 = vpop.f32.mrf.mxu0 }
 0x115   : > { %v1638_v27 = vpop.f32.mrf.mxu3  ;;  %v1000_v42 = vpop.f32.mrf.mxu1 }
 0x116   : > { %v1712_v3 = vadd.f32 %v1638_v27, %v1422_v14  ;;  %v1001_v30 = vadd.f32 %v1000_v42, %v5803_v51  ;;  %v2065_v51 = vsel %vm5387_vm3, %v2060_v40, %v2064_v12  ;;  %v2075_v14 = vsel %vm5387_vm3, %v2070_v59, %v2074_v38 }
 0x117   : > { %4781 = vmatmul.msk.bf16.gmra.mxu0 %vm703_vm4, %v2216_v29  ;;  %v5248_v29 = vld [vmem:[%s5375_s29 + $0x98] sm:$0x1]  ;;  %v1204_v27 = vrot.slane %v1202_v0, 4  ;;  %v2196_v42 = vunpack.c.l.b16 %v2065_v51  ;;  %v2197_v53 = vunpack.c.l.b16 %v2075_v14  ;;  %v2082_v40 = vrot.slane %v2080_v23, 5  ;;  %v5078_v51 = vld [vmem:[%s5375_s29 + $0x90] sm:$0xff] }
 0x118   : > { %v1350_v52 = vpop.f32.mrf.mxu2  ;;  %4571 = vmatmul.msk.bf16.gmra.mxu1 %vm703_vm4, %v5077_v41  ;;  %v5892_v20 = vadd.f32 %v2292_v31, %v1712_v3  ;;  %v1205_v62 = vrot.slane %v5248_v29, 5  ;;  %v2092_v59 = vrot.slane %v2090_v6, 4  ;;  %v4761_v29 = vld [vmem:[%s5375_s29 + $0xa8] sm:$0xf] }
 0x119   : > { %v1423_v7 = vadd.f32 %v1350_v52, %v998_v61  ;;  %v2088_v52 = vrot.slane %v2086_v19, 5  ;;  %v2217_v28 = vpack.c.b16 %v2197_v53, %v2196_v42  ;;  %v2083_v8 = vor.u32 %v2082_v40, %v2079_v50  ;;  %v5249_v53 = vld [vmem:[%s5375_s29 + $0xa0] sm:$0xf]  ;;  %v1078_v40 = vld [vmem:[%s5375_s29 + $0x9c] sm:$0xe] }
 0x11a   : > { %v2101_v42 = vshrl.u32 %v4761_v29, 16  ;;  %v1209_v50 = vrot.slane %v5249_v53, 5 }
 0x11b   : > { %v2093_v11 = vor.u32 %v2092_v59, %v2088_v52 }
 0x11c   : > { %v2294_v48 = vpop.f32.mrf.mxu0 }
 0x11d   : > { %v1640_v61 = vpop.f32.mrf.mxu3  ;;  %4604 = vmatmul.msk.bf16.gmra.mxu2 %vm703_vm4, %v1273_v60  ;;  %v1002_v31 = vpop.f32.mrf.mxu1  ;;  %v4760_v60 = vld [vmem:[%s5375_s29 + $0xa4] sm:$0x1] }
 0x11e   : > { %v1713_v41 = vadd.f32 %v1640_v61, %v1423_v7  ;;  %v1003_v12 = vadd.f32 %v1002_v31, %v5817_v39  ;;  %v1203_v39 = vsel %vm5561_vm7, %v4588_v44, %v1202_v0  ;;  %v1206_v7 = vsel %vm5561_vm7, %v1204_v27, %v1205_v62  ;;  %v4762_v27 = vld [vmem:[%s5375_s29 + $0xac] sm:$0xf] }
 0x11f   : > { %v2096_v14 = vshll.u32 %v4760_v60, 16  ;;  %v1255_v19 = vunpack.c.l.b16 %v1206_v7  ;;  %v2084_v62 = vrot.slane %v2083_v8, 4  ;;  %v2094_v61 = vrot.slane %v2093_v11, 4 }
 0x120   : > { %v1353_v3 = vpop.f32.mrf.mxu2  ;;  %v5905_v38 = vadd.f32 %v2294_v48, %v1713_v41  ;;  %v2114_v7 = vshrl.u32 %v4762_v27, 16  ;;  %v2103_v8 = vrot.slane %v2101_v42, 4 }
 0x121   : > { %v1424_v58 = vadd.f32 %v1353_v3, %v1001_v30  ;;  %v1254_v30 = vunpack.c.l.b16 %v1203_v39  ;;  %v2098_v31 = vrot.slane %v2096_v14, 5  ;;  %v2104_v3 = vshll.u32 %v4761_v29, 16  ;;  %v5094_v14 = vld [vmem:[%s5375_s29 + $0x9c] sm:$0xff] }
 0x122   : > { %4717 = vmatmul.msk.bf16.gmra.mxu3 %vm703_vm4, %v5093_v33  ;;  %v2110_v39 = vshll.u32 %v4762_v27, 16 }
 0x123   : > { %v1274_v44 = vpack.c.b16 %v1255_v19, %v1254_v30  ;;  %v2099_v60 = vsel %vm5387_vm3, %v2094_v61, %v2098_v31  ;;  %v1211_v30 = vrot.slane %v1209_v50, 4  ;;  %v2106_v19 = vrot.slane %v2104_v3, 5  ;;  %v5079_v3 = vld [vmem:[%s5375_s29 + $0x9c] sm:$0xff] }
 0x124   : > { %v2297_v35 = vpop.f32.mrf.mxu0  ;;  %v2199_v29 = vunpack.c.l.b16 %v2099_v60  ;;  %v2116_v61 = vrot.slane %v2114_v7, 4 }
 0x125   : > { %v1643_v48 = vpop.f32.mrf.mxu3  ;;  %v1005_v23 = vpop.f32.mrf.mxu1  ;;  %v2107_v53 = vor.u32 %v2106_v19, %v2103_v8 }
 0x126   : > { %v1714_v6 = vadd.f32 %v1643_v48, %v1424_v58  ;;  %v2089_v58 = vsel %vm5387_vm3, %v2084_v62, %v2088_v52  ;;  %v4589_v48 = vrot.slane %v1078_v40, 9  ;;  %v1006_v52 = vadd.f32 %v1005_v23, %v5659_v4 }
 0x127   : > { %4782 = vmatmul.msk.bf16.gmra.mxu0 %vm703_vm4, %v2217_v28  ;;  %v5250_v28 = vld [vmem:[%s5375_s29 + $0xa4] sm:$0x1]  ;;  %v2112_v62 = vrot.slane %v2110_v39, 5 }
 0x128   : > { %v1355_v0 = vpop.f32.mrf.mxu2  ;;  %4572 = vmatmul.msk.bf16.gmra.mxu1 %vm703_vm4, %v5078_v51  ;;  %v5917_v41 = vadd.f32 %v2297_v35, %v1714_v6  ;;  %v1212_v35 = vrot.slane %v5250_v28, 5  ;;  %v2198_v6 = vunpack.c.l.b16 %v2089_v58 }
 0x129   : > { %v1425_v33 = vadd.f32 %v1355_v0, %v1003_v12  ;;  %v2117_v40 = vor.u32 %v2116_v61, %v2112_v62 }
 0x12a   : > { %v1213_v42 = vsel %vm5561_vm7, %v1211_v30, %v1212_v35  ;;  %v2218_v4 = vpack.c.b16 %v2199_v29, %v2198_v6 }
 0x12b   : > { %v1257_v7 = vunpack.c.l.b16 %v1213_v42  ;;  %v2118_v8 = vrot.slane %v2117_v40, 4 }
 0x12c   : > { %v2299_v59 = vpop.f32.mrf.mxu0 }
 0x12d   : > { %v1645_v12 = vpop.f32.mrf.mxu3  ;;  %4605 = vmatmul.msk.bf16.gmra.mxu2 %vm703_vm4, %v1274_v44  ;;  %v1007_v51 = vpop.f32.mrf.mxu1  ;;  %v4763_v44 = vld [vmem:[%s5375_s29 + $0xb0] sm:$0x1] }
 0x12e   : > { %v1715_v11 = vadd.f32 %v1645_v12, %v1425_v33  ;;  %v1210_v33 = vsel %vm5561_vm7, %v4589_v48, %v1209_v50  ;;  %v2120_v58 = vshll.u32 %v4763_v44, 16  ;;  %v2108_v12 = vrot.slane %v2107_v53, 4  ;;  %v4765_v48 = vld [vmem:[%s5375_s29 + $0xb8] sm:$0xf]  ;;  %v5252_v53 = vld [vmem:[%s5375_s29 + $0xb0] sm:$0x1] }
 0x12f   : > { %v1256_v39 = vunpack.c.l.b16 %v1210_v33  ;;  %v1008_v50 = vadd.f32 %v1007_v51, %v5672_v34  ;;  %v1079_v34 = vld [vmem:[%s5375_s29 + $0xa8] sm:$0xe]  ;;  %v2134_v51 = vshll.u32 %v4765_v48, 16  ;;  %v2138_v44 = vshrl.u32 %v4765_v48, 16 }
 0x130   : > { %v1358_v0 = vpop.f32.mrf.mxu2  ;;  %v5930_v31 = vadd.f32 %v2299_v59, %v1715_v11  ;;  %v4764_v11 = vld [vmem:[%s5375_s29 + $0xb4] sm:$0xf]  ;;  %v2113_v29 = vsel %vm5387_vm3, %v2108_v12, %v2112_v62 }
 0x131   : > { %v1426_v27 = vadd.f32 %v1358_v0, %v1006_v52  ;;  %v1275_v52 = vpack.c.b16 %v1257_v7, %v1256_v39  ;;  %v2125_v6 = vshrl.u32 %v4764_v11, 16  ;;  %v5251_v0 = vld [vmem:[%s5375_s29 + $0xac] sm:$0xf]  ;;  %v4590_v39 = vrot.slane %v1079_v34, 9 }
 0x132   : > { %4718 = vmatmul.msk.bf16.gmra.mxu3 %vm703_vm4, %v5094_v14  ;;  %v2122_v14 = vrot.slane %v2120_v58, 5  ;;  %v1216_v61 = vrot.slane %v5251_v0, 5  ;;  %v5080_v34 = vld [vmem:[%s5375_s29 + $0xa8] sm:$0xff] }
 0x133   : > { %v2127_v62 = vrot.slane %v2125_v6, 4 }
 0x134   : > { %v2302_v23 = vpop.f32.mrf.mxu0  ;;  %v2123_v42 = vsel %vm5387_vm3, %v2118_v8, %v2122_v14  ;;  %v1218_v7 = vrot.slane %v1216_v61, 4  ;;  %v4766_v14 = vld [vmem:[%s5375_s29 + $0xbc] sm:$0x1] }
 0x135   : > { %v1648_v59 = vpop.f32.mrf.mxu3  ;;  %v1010_v60 = vpop.f32.mrf.mxu1 }
 0x136   : > { %v1716_v28 = vadd.f32 %v1648_v59, %v1426_v27  ;;  %v2128_v27 = vshll.u32 %v4764_v11, 16  ;;  %v5095_v59 = vld [vmem:[%s5375_s29 + $0xa8] sm:$0xff]  ;;  %v1011_v12 = vadd.f32 %v1010_v60, %v5692_v2  ;;  %v2201_v11 = vunpack.c.l.b16 %v2123_v42 }
 0x137   : > { %4783 = vmatmul.msk.bf16.gmra.mxu0 %vm703_vm4, %v2218_v4  ;;  %v1219_v4 = vrot.slane %v5252_v53, 5 }
 0x138   : > { %v1360_v35 = vpop.f32.mrf.mxu2  ;;  %4573 = vmatmul.msk.bf16.gmra.mxu1 %vm703_vm4, %v5079_v3  ;;  %v5944_v30 = vadd.f32 %v2302_v23, %v1716_v28  ;;  %v2200_v3 = vunpack.c.l.b16 %v2113_v29  ;;  %v2130_v28 = vrot.slane %v2128_v27, 5  ;;  %v2144_v29 = vshll.u32 %v4766_v14, 16 }
 0x139   : > { %v1427_v19 = vadd.f32 %v1360_v35, %v1008_v50  ;;  %v2136_v50 = vrot.slane %v2134_v51, 5  ;;  %v2140_v35 = vrot.slane %v2138_v44, 4 }
 0x13a   : > { %v2131_v6 = vor.u32 %v2130_v28, %v2127_v62  ;;  %v2219_v2 = vpack.c.b16 %v2201_v11, %v2200_v3  ;;  %v2146_v3 = vrot.slane %v2144_v29, 5  ;;  %v5253_v62 = vld [vmem:[%s5375_s29 + $0x10] sm:$0xf]  ;;  %v1080_v11 = vld [vmem:[%s5375_s29 + $0xb4] sm:$0xe] }
 0x13b   : > { %v2141_v60 = vor.u32 %v2140_v35, %v2136_v50  ;;  %v5254_v35 = vld [vmem:[%s5375_s29 + $0xb8] sm:$0xf] }
 0x13c   : > { %v2304_v33 = vpop.f32.mrf.mxu0 }
 0x13d   : > { %v1650_v23 = vpop.f32.mrf.mxu3  ;;  %4606 = vmatmul.msk.bf16.gmra.mxu2 %vm703_vm4, %v1275_v52  ;;  %v1012_v40 = vpop.f32.mrf.mxu1  ;;  %v1220_v52 = vsel %vm5561_vm7, %v1218_v7, %v1219_v4  ;;  %v4768_v7 = vld [vmem:[%s5375_s29 + $0xc4] sm:$0xf] }
 0x13e   : > { %v1717_v58 = vadd.f32 %v1650_v23, %v1427_v19  ;;  %v1217_v19 = vsel %vm5561_vm7, %v4590_v39, %v1216_v61  ;;  %v1259_v42 = vunpack.c.l.b16 %v1220_v52  ;;  %v2132_v61 = vrot.slane %v2131_v6, 4  ;;  %v4767_v39 = vld [vmem:[%s5375_s29 + $0xc0] sm:$0xf] }
 0x13f   : > { %v1013_v4 = vadd.f32 %v1012_v40, %v5711_v17  ;;  %v2142_v23 = vrot.slane %v2141_v60, 4  ;;  %v2158_v52 = vshll.u32 %v4768_v7, 16 }
 0x140   : > { %v1363_v8 = vpop.f32.mrf.mxu2  ;;  %v5957_v48 = vadd.f32 %v2304_v33, %v1717_v58  ;;  %v1258_v33 = vunpack.c.l.b16 %v1217_v19  ;;  %v2460_v58 = vrot.slane %v5253_v62, 5  ;;  %v2137_v17 = vsel %vm5387_vm3, %v2132_v61, %v2136_v50  ;;  %v4787_v61 = vld [vmem:[%s5375_s29 + $0xc] sm:$0xe] }
 0x141   : > { %v1428_v0 = vadd.f32 %v1363_v8, %v1011_v12  ;;  %v1223_v8 = vrot.slane %v5254_v35, 5  ;;  %v2147_v40 = vsel %vm5387_vm3, %v2142_v23, %v2146_v3  ;;  %v2152_v19 = vshll.u32 %v4767_v39, 16  ;;  %v5096_v23 = vld [vmem:[%s5375_s29 + $0xb4] sm:$0xff] }
 0x142   : > { %4719 = vmatmul.msk.bf16.gmra.mxu3 %vm703_vm4, %v5095_v59  ;;  %v1276_v12 = vpack.c.b16 %v1259_v42, %v1258_v33  ;;  %v2462_v6 = vrot.slane %v2460_v58, 4  ;;  %v5256_v33 = vld [vmem:[%s5375_s29 + $0xbc] sm:$0x1]  ;;  %v2202_v3 = vunpack.c.l.b16 %v2137_v17  ;;  %v2203_v62 = vunpack.c.l.b16 %v2147_v40 }
 0x144   : > { %v2307_v27 = vpop.f32.mrf.mxu0 }
 0x145   : > { %v1653_v51 = vpop.f32.mrf.mxu3  ;;  %v1015_v44 = vpop.f32.mrf.mxu1 }
 0x146   : > { %v1718_v53 = vadd.f32 %v1653_v51, %v1428_v0  ;;  %v2149_v0 = vshrl.u32 %v4767_v39, 16  ;;  %v2162_v51 = vshrl.u32 %v4768_v7, 16  ;;  %v1016_v39 = vadd.f32 %v1015_v44, %v5730_v54  ;;  %v4769_v54 = vld [vmem:[%s5375_s29 + $0xc8] sm:$0x1] }
 0x147   : > { %4784 = vmatmul.msk.bf16.gmra.mxu0 %vm703_vm4, %v2219_v2  ;;  %v5255_v2 = vld [vmem:[%s5375_s29 + $0x14] sm:$0x1]  ;;  %v2160_v7 = vrot.slane %v2158_v52, 5 }
 0x148   : > { %v1365_v59 = vpop.f32.mrf.mxu2  ;;  %4574 = vmatmul.msk.bf16.gmra.mxu1 %vm703_vm4, %v5080_v34  ;;  %v5973_v14 = vadd.f32 %v2307_v27, %v1718_v53  ;;  %v2463_v60 = vrot.slane %v5255_v2, 5  ;;  %v4591_v34 = vrot.slane %v1080_v11, 9  ;;  %v1226_v27 = vrot.slane %v5256_v33, 5 }
 0x149   : > { %v1429_v28 = vadd.f32 %v1365_v59, %v1013_v4  ;;  %v1225_v53 = vrot.slane %v1223_v8, 4  ;;  %v4803_v59 = vrot.slane %v4787_v61, 9  ;;  %v2151_v35 = vrot.slane %v2149_v0, 4  ;;  %v5081_v61 = vld [vmem:[%s5375_s29 + $0xb4] sm:$0xff] }
 0x14a   : > { %v2154_v11 = vrot.slane %v2152_v19, 5  ;;  %v1224_v33 = vsel %vm5561_vm7, %v4591_v34, %v1223_v8  ;;  %v2464_v17 = vsel %vm5561_vm7, %v2462_v6, %v2463_v60  ;;  %v4949_v19 = vld [vmem:[%s5375_s29 + $0x18] sm:$0xf]  ;;  %v2220_v8 = vpack.c.b16 %v2203_v62, %v2202_v3 }
 0x14b   : > { %v2573_v0 = vunpack.c.l.b16 %v2464_v17  ;;  %v1260_v6 = vunpack.c.l.b16 %v1224_v33  ;;  %v3134_v17 = vshll.u32 %v4949_v19, 16 }
 0x14c   : > { %v2309_v29 = vpop.f32.mrf.mxu0  ;;  %v2155_v52 = vor.u32 %v2154_v11, %v2151_v35 }
 0x14d   : > { %v1655_v42 = vpop.f32.mrf.mxu3  ;;  %4607 = vmatmul.msk.bf16.gmra.mxu2 %vm703_vm4, %v1276_v12  ;;  %v1017_v50 = vpop.f32.mrf.mxu1  ;;  %v2164_v12 = vrot.slane %v2162_v51, 4 }
 0x14e   : > { %v1719_v4 = vadd.f32 %v1655_v42, %v1429_v28  ;;  %v2461_v28 = vsel %vm5561_vm7, %v4803_v59, %v2460_v58  ;;  %v1227_v42 = vsel %vm5561_vm7, %v1225_v53, %v1226_v27  ;;  %v6002_v27 = vld [vmem:[%s5375_s29 + $0x1c] sm:$0xf]  ;;  %v1018_v3 = vadd.f32 %v1017_v50, %v5753_v15 }
 0x14f   : > { %v2572_v44 = vunpack.c.l.b16 %v2461_v28  ;;  %v1261_v60 = vunpack.c.l.b16 %v1227_v42  ;;  %v2165_v59 = vor.u32 %v2164_v12, %v2160_v7  ;;  %v3131_v28 = vshrl.u32 %v4949_v19, 16 }
 0x150   : > { %v1368_v2 = vpop.f32.mrf.mxu2  ;;  %v5998_v51 = vadd.f32 %v2309_v29, %v1719_v4  ;;  %v2156_v62 = vrot.slane %v2155_v52, 4  ;;  %v3140_v29 = vshll.u32 %v6002_v27, 16  ;;  %v3144_v4 = vshrl.u32 %v6002_v27, 16  ;;  %v4951_v52 = vld [vmem:[%s5375_s29 + $0x20] sm:$0x1] }
 0x151   : > { %v1430_v40 = vadd.f32 %v1368_v2, %v1016_v39  ;;  %v5996_v34 = vpack.c.b16 %v2573_v0, %v2572_v44  ;;  %v2168_v39 = vshll.u32 %v4769_v54, 16  ;;  %v1277_v11 = vpack.c.b16 %v1261_v60, %v1260_v6 }
 0x152   : > { %4720 = vmatmul.msk.bf16.gmra.mxu3 %vm703_vm4, %v5096_v23  ;;  %v2166_v33 = vrot.slane %v2165_v59, 4  ;;  %v3133_v54 = vrot.slane %v3131_v28, 4  ;;  %v2161_v15 = vsel %vm5387_vm3, %v2156_v62, %v2160_v7  ;;  %v3142_v50 = vrot.slane %v3140_v29, 5 }
 0x153   : > { %v2170_v12 = vrot.slane %v2168_v39, 5  ;;  %v3146_v0 = vrot.slane %v3144_v4, 4  ;;  %v2204_v39 = vunpack.c.l.b16 %v2161_v15 }
 0x154   : > { %v2312_v58 = vpop.f32.mrf.mxu0 }
 0x155   : > { %v1658_v53 = vpop.f32.mrf.mxu3  ;;  %v1020_v2 = vpop.f32.mrf.mxu1  ;;  %v3147_v28 = vor.u32 %v3146_v0, %v3142_v50  ;;  %v5257_v0 = vld [vmem:[%s5375_s29 + $0x1c] sm:$0xf] }
 0x156   : > { %v1720_v23 = vadd.f32 %v1658_v53, %v1430_v40  ;;  %v3136_v40 = vrot.slane %v3134_v17, 5  ;;  %v1021_v53 = vadd.f32 %v1020_v2, %v5772_v55  ;;  %v3150_v17 = vshll.u32 %v4951_v52, 16  ;;  %v6026_v2 = vld [vmem:[%s5375_s29 + $0x28] sm:$0xf] }
 0x157   : > { %4785 = vmatmul.msk.bf16.gmra.mxu0 %vm703_vm4, %v2220_v8  ;;  %v2171_v8 = vsel %vm5387_vm3, %v2166_v33, %v2170_v12  ;;  %v3148_v4 = vrot.slane %v3147_v28, 4  ;;  %v4952_v33 = vld [vmem:[%s5375_s29 + $0x24] sm:$0xf]  ;;  %v3802_v55 = vrot.slane %v6002_v27, 5 }
 0x158   : > { %v1370_v35 = vpop.f32.mrf.mxu2  ;;  %4575 = vmatmul.msk.bf16.gmra.mxu1 %vm703_vm4, %v5081_v61  ;;  %v6009_v44 = vadd.f32 %v2312_v58, %v1720_v23  ;;  %v3137_v60 = vor.u32 %v3136_v40, %v3133_v54  ;;  %v5097_v58 = vld [vmem:[%s5375_s29 + $0xc0] sm:$0xff]  ;;  %v2205_v7 = vunpack.c.l.b16 %v2171_v8  ;;  %v2467_v8 = vrot.slane %v5257_v0, 5 }
 0x159   : > { %v1431_v42 = vadd.f32 %v1370_v35, %v1018_v3  ;;  %v3152_v35 = vrot.slane %v3150_v17, 5 }
 0x15a   : > { %6678 = vst [vmem:[#allocation2_spill] sm:$0xff] %v6009_v44  ;;  %v3138_v62 = vrot.slane %v3137_v60, 4  ;;  %v2221_v29 = vpack.c.b16 %v2205_v7, %v2204_v39  ;;  %v3155_v39 = vshrl.u32 %v4952_v33, 16  ;;  %v3168_v7 = vshrl.u32 %v6026_v2, 16 }
 0x15c   : > { %v2314_v19 = vpop.f32.mrf.mxu0  ;;  %v3143_v15 = vsel %vm5387_vm3, %v3138_v62, %v3142_v50  ;;  %v5258_v50 = vld [vmem:[%s5375_s29 + $0x20] sm:$0x1] }
 0x15d   : > { %v1660_v61 = vpop.f32.mrf.mxu3  ;;  %4608 = vmatmul.msk.bf16.gmra.mxu2 %vm703_vm4, %v1277_v11  ;;  %v1022_v6 = vpop.f32.mrf.mxu1  ;;  %v5014_v11 = vld [vmem:[%s5375_s29 + $0x18] sm:$0xe]  ;;  %v2470_v28 = vrot.slane %v5258_v50, 5 }
 0x15e   : > { %v1721_v59 = vadd.f32 %v1660_v61, %v1431_v42  ;;  %v5030_v60 = vrot.slane %v5014_v11, 9  ;;  %v1023_v27 = vadd.f32 %v1022_v6, %v5791_v22  ;;  %v2469_v22 = vrot.slane %v2467_v8, 4 }
 0x160   : > { %v1373_v23 = vpop.f32.mrf.mxu2  ;;  %v6022_v12 = vadd.f32 %v2314_v19, %v1721_v59  ;;  %v3158_v19 = vshll.u32 %v4952_v33, 16  ;;  %v3153_v59 = vsel %vm5387_vm3, %v3148_v4, %v3152_v35  ;;  %v3516_v4 = vunpack.c.l.b16 %v3143_v15 }
 0x161   : > { %v1432_v3 = vadd.f32 %v1373_v23, %v1021_v53  ;;  %v3164_v53 = vshll.u32 %v6026_v2, 16  ;;  %v3804_v23 = vrot.slane %v3802_v55, 4  ;;  %v3517_v35 = vunpack.c.l.b16 %v3153_v59 }
 0x162   : > { %4721 = vmatmul.msk.bf16.gmra.mxu3 %vm703_vm4, %v5097_v58  ;;  %6679 = vst [vmem:[#allocation3_spill] sm:$0xff] %v6022_v12  ;;  %v4788_v58 = vld [vmem:[%s5375_s29 + $0x18] sm:$0xe]  ;;  %v3157_v33 = vrot.slane %v3155_v39, 4  ;;  %v3803_v0 = vsel %vm5561_vm7, %v5030_v60, %v3802_v55  ;;  %v3170_v12 = vrot.slane %v3168_v7, 4 }
 0x163   : > { %v4804_v11 = vrot.slane %v4788_v58, 9  ;;  %v3166_v50 = vrot.slane %v3164_v53, 5  ;;  %v3548_v60 = vpack.c.b16 %v3517_v35, %v3516_v4  ;;  %v3914_v58 = vunpack.c.l.b16 %v3803_v0  ;;  %v4955_v4 = vld [vmem:[%s5375_s29 + $0x30] sm:$0xf] }
 0x164   : > { %v2317_v42 = vpop.f32.mrf.mxu0  ;;  %v3809_v35 = vrot.slane %v6026_v2, 5 }
 0x165   : > { %v1663_v54 = vpop.f32.mrf.mxu3  ;;  %v1025_v40 = vpop.f32.mrf.mxu1  ;;  %v2468_v15 = vsel %vm5561_vm7, %v4804_v11, %v2467_v8  ;;  %v3171_v53 = vor.u32 %v3170_v12, %v3166_v50 }
 0x166   : > { %v1722_v61 = vadd.f32 %v1663_v54, %v1432_v3  ;;  %v3805_v3 = vrot.slane %v4951_v52, 5  ;;  %v3160_v54 = vrot.slane %v3158_v19, 5  ;;  %v6049_v52 = vld [vmem:[%s5375_s29 + $0x2c] sm:$0x1]  ;;  %v1026_v19 = vadd.f32 %v1025_v40, %v5674_v37 }
 0x167   : > { %4786 = vmatmul.msk.bf16.gmra.mxu0 %vm703_vm4, %v2221_v29  ;;  %v5098_v29 = vld [vmem:[%s5375_s29 + $0x18] sm:$0xff]  ;;  %v3174_v7 = vshll.u32 %v6049_v52, 16  ;;  %v3172_v11 = vrot.slane %v3171_v53, 4  ;;  %v5260_v53 = vld [vmem:[%s5375_s29 + $0x2c] sm:$0x1] }
 0x168   : > { %v1375_v17 = vpop.f32.mrf.mxu2  ;;  %4820 = vmatmul.msk.bf16.vlgmr.msra.gmra.mxu1 %vm703_vm4, %v5996_v34  ;;  %v6042_v6 = vadd.f32 %v2317_v42, %v1722_v61  ;;  %v3806_v34 = vsel %vm5561_vm7, %v3804_v23, %v3805_v3  ;;  %v2471_v61 = vsel %vm5561_vm7, %v2469_v22, %v2470_v28  ;;  %v3161_v39 = vor.u32 %v3160_v54, %v3157_v33  ;;  %v6065_v33 = vld [vmem:[%s5375_s29 + $0x34] sm:$0xf] }
 0x169   : > { %v1433_v62 = vadd.f32 %v1375_v17, %v1023_v27  ;;  %v3915_v59 = vunpack.c.l.b16 %v3806_v34  ;;  %v2574_v23 = vunpack.c.l.b16 %v2468_v15  ;;  %v2575_v3 = vunpack.c.l.b16 %v2471_v61 }
 0x16a   : > { %v3162_v28 = vrot.slane %v3161_v39, 4  ;;  %v3176_v22 = vrot.slane %v3174_v7, 5  ;;  %v2477_v7 = vrot.slane %v5260_v53, 5 }
 0x16b   : > { %v2605_v40 = vpack.c.b16 %v2575_v3, %v2574_v23  ;;  %v3812_v23 = vrot.slane %v6049_v52, 5  ;;  %v6088_v52 = vld [vmem:[%s5375_s29 + $0x38] sm:$0x1] }
 0x16c   : > { %v2319_v44 = vpop.f32.mrf.mxu0  ;;  %v3177_v39 = vsel %vm5387_vm3, %v3172_v11, %v3176_v22 }
 0x16d   : > { %v1665_v27 = vpop.f32.mrf.mxu3  ;;  %4933 = vmatmul.msk.bf16.vlgmr.msra.gmra.mxu2 %vm703_vm4, %v5098_v29  ;;  %v1027_v42 = vpop.f32.mrf.mxu1  ;;  %v3946_v29 = vpack.c.b16 %v3915_v59, %v3914_v58  ;;  %v4789_v58 = vld [vmem:[%s5375_s29 + $0x24] sm:$0xe]  ;;  %v3192_v59 = vshrl.u32 %v6065_v33, 16 }
 0x16e   : > { %v1723_v55 = vadd.f32 %v1665_v27, %v1433_v62  ;;  %v5015_v62 = vld [vmem:[%s5375_s29 + $0x24] sm:$0xe]  ;;  %v5259_v27 = vld [vmem:[%s5375_s29 + $0x28] sm:$0xf]  ;;  %v1028_v2 = vadd.f32 %v1027_v42, %v5695_v63 }
 0x16f   : > { %v5031_v34 = vrot.slane %v5015_v62, 9  ;;  %v2474_v15 = vrot.slane %v5259_v27, 5  ;;  %v3194_v27 = vrot.slane %v3192_v59, 4  ;;  %v3198_v59 = vshll.u32 %v6088_v52, 16 }
 0x170   : > { %v1378_v17 = vpop.f32.mrf.mxu2  ;;  %v6061_v37 = vadd.f32 %v2319_v44, %v1723_v55  ;;  %v3179_v44 = vshrl.u32 %v4955_v4, 16  ;;  %v3182_v55 = vshll.u32 %v4955_v4, 16 }
 0x171   : > { %v1434_v8 = vadd.f32 %v1378_v17, %v1026_v19  ;;  %v3188_v19 = vshll.u32 %v6065_v33, 16  ;;  %v2476_v63 = vrot.slane %v2474_v15, 4  ;;  %v3810_v4 = vsel %vm5561_vm7, %v5031_v34, %v3809_v35 }
 0x172   : > { %4998 = vmatmul.msk.bf16.vlgmr.msra.gmra.mxu3 %vm703_vm4, %v3548_v60  ;;  %v3167_v60 = vsel %vm5387_vm3, %v3162_v28, %v3166_v50  ;;  %v3811_v50 = vrot.slane %v3809_v35, 4  ;;  %v4805_v28 = vrot.slane %v4789_v58, 9  ;;  %v3181_v11 = vrot.slane %v3179_v44, 4 }
 0x173   : > { %v3518_v62 = vunpack.c.l.b16 %v3167_v60  ;;  %v3184_v22 = vrot.slane %v3182_v55, 5  ;;  %v2478_v60 = vsel %vm5561_vm7, %v2476_v63, %v2477_v7  ;;  %v3916_v58 = vunpack.c.l.b16 %v3810_v4 }
 0x174   : > { %v2322_v12 = vpop.f32.mrf.mxu0  ;;  %v3813_v53 = vsel %vm5561_vm7, %v3811_v50, %v3812_v23  ;;  %v2577_v23 = vunpack.c.l.b16 %v2478_v60  ;;  %v3200_v63 = vrot.slane %v3198_v59, 5 }
 0x175   : > { %v1668_v54 = vpop.f32.mrf.mxu3  ;;  %v1030_v0 = vpop.f32.mrf.mxu1  ;;  %v3185_v44 = vor.u32 %v3184_v22, %v3181_v11  ;;  %v3816_v11 = vrot.slane %v6065_v33, 5  ;;  %v6104_v22 = vld [vmem:[%s5375_s29 + $0x40] sm:$0xf] }
 0x176   : > { %v1724_v61 = vadd.f32 %v1668_v54, %v1434_v8  ;;  %v5099_v8 = vld [vmem:[%s5375_s29 + $0x24] sm:$0xff]  ;;  %v3190_v54 = vrot.slane %v3188_v19, 5  ;;  %v1031_v55 = vadd.f32 %v1030_v0, %v5714_v24 }
 0x177   : > { %5047 = vmatmul.msk.bf16.vlgmr.msra.gmra.mxu0 %vm703_vm4, %v3946_v29  ;;  %v3519_v29 = vunpack.c.l.b16 %v3177_v39  ;;  %v3917_v39 = vunpack.c.l.b16 %v3813_v53  ;;  %v3186_v7 = vrot.slane %v3185_v44, 4 }
 0x178   : > { %v1380_v17 = vpop.f32.mrf.mxu2  ;;  %4821 = vmatmul.msk.bf16.gmra.mxu1 %vm703_vm4, %v2605_v40  ;;  %v6081_v42 = vadd.f32 %v2322_v12, %v1724_v61  ;;  %v2475_v61 = vsel %vm5561_vm7, %v4805_v28, %v2474_v15  ;;  %v3195_v19 = vor.u32 %v3194_v27, %v3190_v54 }
 0x179   : > { %v1435_v3 = vadd.f32 %v1380_v17, %v1028_v2  ;;  %v3549_v34 = vpack.c.b16 %v3519_v29, %v3518_v62  ;;  %v2576_v50 = vunpack.c.l.b16 %v2475_v61  ;;  %v4958_v62 = vld [vmem:[%s5375_s29 + $0x3c] sm:$0xf] }
 0x17a   : > { %v3196_v28 = vrot.slane %v3195_v19, 4  ;;  %v5262_v19 = vld [vmem:[%s5375_s29 + $0x38] sm:$0x1] }
 0x17b   : > { %v2606_v29 = vpack.c.b16 %v2577_v23, %v2576_v50  ;;  %v2484_v59 = vrot.slane %v5262_v19, 5  ;;  %v3819_v50 = vrot.slane %v6088_v52, 5  ;;  %v6127_v52 = vld [vmem:[%s5375_s29 + $0x44] sm:$0x1] }
 0x17c   : > { %v2324_v40 = vpop.f32.mrf.mxu0  ;;  %v3201_v44 = vsel %vm5387_vm3, %v3196_v28, %v3200_v63 }
 0x17d   : > { %v1670_v2 = vpop.f32.mrf.mxu3  ;;  %4934 = vmatmul.msk.bf16.gmra.mxu2 %vm703_vm4, %v5099_v8  ;;  %v1032_v12 = vpop.f32.mrf.mxu1  ;;  %v3947_v8 = vpack.c.b16 %v3917_v39, %v3916_v58  ;;  %v4790_v58 = vld [vmem:[%s5375_s29 + $0x30] sm:$0xe]  ;;  %v3216_v39 = vshrl.u32 %v6104_v22, 16 }
 0x17e   : > { %v1725_v35 = vadd.f32 %v1670_v2, %v1435_v3  ;;  %v5016_v3 = vld [vmem:[%s5375_s29 + $0x30] sm:$0xe]  ;;  %v5261_v2 = vld [vmem:[%s5375_s29 + $0x34] sm:$0xf]  ;;  %v1033_v33 = vadd.f32 %v1032_v12, %v5733_v57 }
 0x17f   : > { %v5032_v53 = vrot.slane %v5016_v3, 9  ;;  %v2481_v61 = vrot.slane %v5261_v2, 5  ;;  %v3218_v2 = vrot.slane %v3216_v39, 4  ;;  %v3222_v39 = vshll.u32 %v6127_v52, 16 }
 0x180   : > { %v1383_v17 = vpop.f32.mrf.mxu2  ;;  %v6100_v24 = vadd.f32 %v2324_v40, %v1725_v35  ;;  %v3203_v40 = vshrl.u32 %v4958_v62, 16  ;;  %v3206_v35 = vshll.u32 %v4958_v62, 16 }
 0x181   : > { %v1436_v15 = vadd.f32 %v1383_v17, %v1031_v55  ;;  %v3212_v55 = vshll.u32 %v6104_v22, 16  ;;  %v2483_v57 = vrot.slane %v2481_v61, 4  ;;  %v3817_v62 = vsel %vm5561_vm7, %v5032_v53, %v3816_v11 }
 0x182   : > { %4999 = vmatmul.msk.bf16.gmra.mxu3 %vm703_vm4, %v3549_v34  ;;  %v3191_v34 = vsel %vm5387_vm3, %v3186_v7, %v3190_v54  ;;  %v3818_v54 = vrot.slane %v3816_v11, 4  ;;  %v4806_v7 = vrot.slane %v4790_v58, 9  ;;  %v3205_v28 = vrot.slane %v3203_v40, 4 }
 0x183   : > { %v3520_v3 = vunpack.c.l.b16 %v3191_v34  ;;  %v3208_v63 = vrot.slane %v3206_v35, 5  ;;  %v2485_v34 = vsel %vm5561_vm7, %v2483_v57, %v2484_v59  ;;  %v3918_v58 = vunpack.c.l.b16 %v3817_v62 }
 0x184   : > { %v2327_v0 = vpop.f32.mrf.mxu0  ;;  %v3820_v19 = vsel %vm5561_vm7, %v3818_v54, %v3819_v50  ;;  %v2579_v50 = vunpack.c.l.b16 %v2485_v34  ;;  %v3224_v57 = vrot.slane %v3222_v39, 5 }
 0x185   : > { %v1673_v4 = vpop.f32.mrf.mxu3  ;;  %v1035_v27 = vpop.f32.mrf.mxu1  ;;  %v3209_v40 = vor.u32 %v3208_v63, %v3205_v28  ;;  %v3823_v28 = vrot.slane %v6104_v22, 5  ;;  %v6143_v63 = vld [vmem:[%s5375_s29 + $0x4c] sm:$0xf] }
 0x186   : > { %v1726_v60 = vadd.f32 %v1673_v4, %v1436_v15  ;;  %v5100_v15 = vld [vmem:[%s5375_s29 + $0x30] sm:$0xff]  ;;  %v3214_v4 = vrot.slane %v3212_v55, 5  ;;  %v1036_v35 = vadd.f32 %v1035_v27, %v5756_v26 }
 0x187   : > { %5048 = vmatmul.msk.bf16.gmra.mxu0 %vm703_vm4, %v3947_v8  ;;  %v3521_v8 = vunpack.c.l.b16 %v3201_v44  ;;  %v3919_v44 = vunpack.c.l.b16 %v3820_v19  ;;  %v3210_v59 = vrot.slane %v3209_v40, 4 }
 0x188   : > { %v1385_v17 = vpop.f32.mrf.mxu2  ;;  %4822 = vmatmul.msk.bf16.gmra.mxu1 %vm703_vm4, %v2606_v29  ;;  %v6120_v12 = vadd.f32 %v2327_v0, %v1726_v60  ;;  %v2482_v60 = vsel %vm5561_vm7, %v4806_v7, %v2481_v61  ;;  %v3219_v55 = vor.u32 %v3218_v2, %v3214_v4 }
 0x189   : > { %v1437_v23 = vadd.f32 %v1385_v17, %v1033_v33  ;;  %v3550_v53 = vpack.c.b16 %v3521_v8, %v3520_v3  ;;  %v2578_v54 = vunpack.c.l.b16 %v2482_v60  ;;  %v4961_v3 = vld [vmem:[%s5375_s29 + $0x48] sm:$0xf] }
 0x18a   : > { %v3220_v7 = vrot.slane %v3219_v55, 4  ;;  %v5264_v55 = vld [vmem:[%s5375_s29 + $0x44] sm:$0x1] }
 0x18b   : > { %v2607_v8 = vpack.c.b16 %v2579_v50, %v2578_v54  ;;  %v2491_v39 = vrot.slane %v5264_v55, 5  ;;  %v3826_v54 = vrot.slane %v6127_v52, 5  ;;  %v6166_v52 = vld [vmem:[%s5375_s29 + $0x50] sm:$0x1] }
 0x18c   : > { %v2329_v29 = vpop.f32.mrf.mxu0  ;;  %v3225_v40 = vsel %vm5387_vm3, %v3220_v7, %v3224_v57 }
 0x18d   : > { %v1675_v33 = vpop.f32.mrf.mxu3  ;;  %4935 = vmatmul.msk.bf16.gmra.mxu2 %vm703_vm4, %v5100_v15  ;;  %v1037_v0 = vpop.f32.mrf.mxu1  ;;  %v3948_v15 = vpack.c.b16 %v3919_v44, %v3918_v58  ;;  %v4791_v58 = vld [vmem:[%s5375_s29 + $0x3c] sm:$0xe]  ;;  %v3240_v44 = vshrl.u32 %v6143_v63, 16 }
 0x18e   : > { %v1727_v11 = vadd.f32 %v1675_v33, %v1437_v23  ;;  %v5017_v23 = vld [vmem:[%s5375_s29 + $0x3c] sm:$0xe]  ;;  %v5263_v33 = vld [vmem:[%s5375_s29 + $0x40] sm:$0xf]  ;;  %v1038_v22 = vadd.f32 %v1037_v0, %v5774_v56 }
 0x18f   : > { %v5033_v19 = vrot.slane %v5017_v23, 9  ;;  %v2488_v60 = vrot.slane %v5263_v33, 5  ;;  %v3242_v33 = vrot.slane %v3240_v44, 4  ;;  %v3246_v44 = vshll.u32 %v6166_v52, 16 }
 0x190   : > { %v1388_v17 = vpop.f32.mrf.mxu2  ;;  %v6139_v26 = vadd.f32 %v2329_v29, %v1727_v11  ;;  %v3227_v29 = vshrl.u32 %v4961_v3, 16  ;;  %v3230_v11 = vshll.u32 %v4961_v3, 16 }
 0x191   : > { %v1438_v61 = vadd.f32 %v1388_v17, %v1036_v35  ;;  %v3236_v35 = vshll.u32 %v6143_v63, 16  ;;  %v2490_v56 = vrot.slane %v2488_v60, 4  ;;  %v3824_v3 = vsel %vm5561_vm7, %v5033_v19, %v3823_v28 }
 0x192   : > { %5000 = vmatmul.msk.bf16.gmra.mxu3 %vm703_vm4, %v3550_v53  ;;  %v3215_v53 = vsel %vm5387_vm3, %v3210_v59, %v3214_v4  ;;  %v3825_v4 = vrot.slane %v3823_v28, 4  ;;  %v4807_v59 = vrot.slane %v4791_v58, 9  ;;  %v3229_v7 = vrot.slane %v3227_v29, 4 }
 0x193   : > { %v3522_v23 = vunpack.c.l.b16 %v3215_v53  ;;  %v3232_v57 = vrot.slane %v3230_v11, 5  ;;  %v2492_v53 = vsel %vm5561_vm7, %v2490_v56, %v2491_v39  ;;  %v3920_v58 = vunpack.c.l.b16 %v3824_v3 }
 0x194   : > { %v2332_v27 = vpop.f32.mrf.mxu0  ;;  %v3827_v55 = vsel %vm5561_vm7, %v3825_v4, %v3826_v54  ;;  %v2581_v54 = vunpack.c.l.b16 %v2492_v53  ;;  %v3248_v56 = vrot.slane %v3246_v44, 5 }
 0x195   : > { %v1678_v62 = vpop.f32.mrf.mxu3  ;;  %v1040_v2 = vpop.f32.mrf.mxu1  ;;  %v3233_v29 = vor.u32 %v3232_v57, %v3229_v7  ;;  %v3830_v7 = vrot.slane %v6143_v63, 5  ;;  %v6182_v57 = vld [vmem:[%s5375_s29 + $0x58] sm:$0xf] }
 0x196   : > { %v1728_v34 = vadd.f32 %v1678_v62, %v1438_v61  ;;  %v5101_v61 = vld [vmem:[%s5375_s29 + $0x3c] sm:$0xff]  ;;  %v3238_v62 = vrot.slane %v3236_v35, 5  ;;  %v1041_v11 = vadd.f32 %v1040_v2, %v5795_v32 }
 0x197   : > { %5049 = vmatmul.msk.bf16.gmra.mxu0 %vm703_vm4, %v3948_v15  ;;  %v3523_v15 = vunpack.c.l.b16 %v3225_v40  ;;  %v3921_v40 = vunpack.c.l.b16 %v3827_v55  ;;  %v3234_v39 = vrot.slane %v3233_v29, 4 }
 0x198   : > { %v1390_v17 = vpop.f32.mrf.mxu2  ;;  %4823 = vmatmul.msk.bf16.gmra.mxu1 %vm703_vm4, %v2607_v8  ;;  %v6159_v0 = vadd.f32 %v2332_v27, %v1728_v34  ;;  %v2489_v34 = vsel %vm5561_vm7, %v4807_v59, %v2488_v60  ;;  %v3243_v35 = vor.u32 %v3242_v33, %v3238_v62 }
 0x199   : > { %v1439_v50 = vadd.f32 %v1390_v17, %v1038_v22  ;;  %v3551_v19 = vpack.c.b16 %v3523_v15, %v3522_v23  ;;  %v2580_v4 = vunpack.c.l.b16 %v2489_v34  ;;  %v4964_v23 = vld [vmem:[%s5375_s29 + $0x54] sm:$0xf] }
 0x19a   : > { %v3244_v59 = vrot.slane %v3243_v35, 4  ;;  %v5266_v35 = vld [vmem:[%s5375_s29 + $0x50] sm:$0x1] }
 0x19b   : > { %v2608_v15 = vpack.c.b16 %v2581_v54, %v2580_v4  ;;  %v2498_v44 = vrot.slane %v5266_v35, 5  ;;  %v3833_v4 = vrot.slane %v6166_v52, 5  ;;  %v6205_v52 = vld [vmem:[%s5375_s29 + $0x5c] sm:$0x1] }
 0x19c   : > { %v2334_v8 = vpop.f32.mrf.mxu0  ;;  %v3249_v29 = vsel %vm5387_vm3, %v3244_v59, %v3248_v56 }
 0x19d   : > { %v1680_v22 = vpop.f32.mrf.mxu3  ;;  %4936 = vmatmul.msk.bf16.gmra.mxu2 %vm703_vm4, %v5101_v61  ;;  %v1042_v27 = vpop.f32.mrf.mxu1  ;;  %v3949_v61 = vpack.c.b16 %v3921_v40, %v3920_v58  ;;  %v4792_v58 = vld [vmem:[%s5375_s29 + $0x48] sm:$0xe]  ;;  %v3264_v40 = vshrl.u32 %v6182_v57, 16 }
 0x19e   : > { %v1729_v28 = vadd.f32 %v1680_v22, %v1439_v50  ;;  %v5018_v50 = vld [vmem:[%s5375_s29 + $0x48] sm:$0xe]  ;;  %v5265_v22 = vld [vmem:[%s5375_s29 + $0x4c] sm:$0xf]  ;;  %v1043_v63 = vadd.f32 %v1042_v27, %v5810_v5 }
 0x19f   : > { %v5034_v55 = vrot.slane %v5018_v50, 9  ;;  %v2495_v34 = vrot.slane %v5265_v22, 5  ;;  %v3266_v22 = vrot.slane %v3264_v40, 4  ;;  %v3270_v40 = vshll.u32 %v6205_v52, 16 }
 0x1a0   : > { %v1393_v17 = vpop.f32.mrf.mxu2  ;;  %v6178_v32 = vadd.f32 %v2334_v8, %v1729_v28  ;;  %v3251_v8 = vshrl.u32 %v4964_v23, 16  ;;  %v3254_v28 = vshll.u32 %v4964_v23, 16 }
 0x1a1   : > { %v1440_v60 = vadd.f32 %v1393_v17, %v1041_v11  ;;  %v3260_v11 = vshll.u32 %v6182_v57, 16  ;;  %v2497_v5 = vrot.slane %v2495_v34, 4  ;;  %v3831_v23 = vsel %vm5561_vm7, %v5034_v55, %v3830_v7 }
 0x1a2   : > { %5001 = vmatmul.msk.bf16.gmra.mxu3 %vm703_vm4, %v3551_v19  ;;  %v3239_v19 = vsel %vm5387_vm3, %v3234_v39, %v3238_v62  ;;  %v3832_v62 = vrot.slane %v3830_v7, 4  ;;  %v4808_v39 = vrot.slane %v4792_v58, 9  ;;  %v3253_v59 = vrot.slane %v3251_v8, 4 }
 0x1a3   : > { %v3524_v50 = vunpack.c.l.b16 %v3239_v19  ;;  %v3256_v56 = vrot.slane %v3254_v28, 5  ;;  %v2499_v19 = vsel %vm5561_vm7, %v2497_v5, %v2498_v44  ;;  %v3922_v58 = vunpack.c.l.b16 %v3831_v23 }
 0x1a4   : > { %v2337_v2 = vpop.f32.mrf.mxu0  ;;  %v3834_v35 = vsel %vm5561_vm7, %v3832_v62, %v3833_v4  ;;  %v2583_v4 = vunpack.c.l.b16 %v2499_v19  ;;  %v3272_v5 = vrot.slane %v3270_v40, 5 }
 0x1a5   : > { %v1683_v3 = vpop.f32.mrf.mxu3  ;;  %v1045_v33 = vpop.f32.mrf.mxu1  ;;  %v3257_v8 = vor.u32 %v3256_v56, %v3253_v59  ;;  %v3837_v59 = vrot.slane %v6182_v57, 5  ;;  %v6221_v56 = vld [vmem:[%s5375_s29 + $0x64] sm:$0xf] }
 0x1a6   : > { %v1730_v53 = vadd.f32 %v1683_v3, %v1440_v60  ;;  %v5102_v60 = vld [vmem:[%s5375_s29 + $0x48] sm:$0xff]  ;;  %v3262_v3 = vrot.slane %v3260_v11, 5  ;;  %v1046_v28 = vadd.f32 %v1045_v33, %v5682_v45 }
 0x1a7   : > { %5050 = vmatmul.msk.bf16.gmra.mxu0 %vm703_vm4, %v3949_v61  ;;  %v3525_v61 = vunpack.c.l.b16 %v3249_v29  ;;  %v3923_v29 = vunpack.c.l.b16 %v3834_v35  ;;  %v3258_v44 = vrot.slane %v3257_v8, 4 }
 0x1a8   : > { %v1395_v17 = vpop.f32.mrf.mxu2  ;;  %4824 = vmatmul.msk.bf16.gmra.mxu1 %vm703_vm4, %v2608_v15  ;;  %v6198_v27 = vadd.f32 %v2337_v2, %v1730_v53  ;;  %v2496_v53 = vsel %vm5561_vm7, %v4808_v39, %v2495_v34  ;;  %v3267_v11 = vor.u32 %v3266_v22, %v3262_v3 }
 0x1a9   : > { %v1441_v54 = vadd.f32 %v1395_v17, %v1043_v63  ;;  %v3552_v55 = vpack.c.b16 %v3525_v61, %v3524_v50  ;;  %v2582_v62 = vunpack.c.l.b16 %v2496_v53  ;;  %v4967_v50 = vld [vmem:[%s5375_s29 + $0x60] sm:$0xf] }
 0x1aa   : > { %v3268_v39 = vrot.slane %v3267_v11, 4  ;;  %v5268_v11 = vld [vmem:[%s5375_s29 + $0x5c] sm:$0x1] }
 0x1ab   : > { %v2609_v61 = vpack.c.b16 %v2583_v4, %v2582_v62  ;;  %v2505_v40 = vrot.slane %v5268_v11, 5  ;;  %v3840_v62 = vrot.slane %v6205_v52, 5  ;;  %v6244_v52 = vld [vmem:[%s5375_s29 + $0x68] sm:$0x1] }
 0x1ac   : > { %v2339_v15 = vpop.f32.mrf.mxu0  ;;  %v3273_v8 = vsel %vm5387_vm3, %v3268_v39, %v3272_v5 }
 0x1ad   : > { %v1685_v63 = vpop.f32.mrf.mxu3  ;;  %4937 = vmatmul.msk.bf16.gmra.mxu2 %vm703_vm4, %v5102_v60  ;;  %v1047_v2 = vpop.f32.mrf.mxu1  ;;  %v3950_v60 = vpack.c.b16 %v3923_v29, %v3922_v58  ;;  %v4793_v58 = vld [vmem:[%s5375_s29 + $0x54] sm:$0xe]  ;;  %v3288_v29 = vshrl.u32 %v6221_v56, 16 }
 0x1ae   : > { %v1731_v7 = vadd.f32 %v1685_v63, %v1441_v54  ;;  %v5019_v54 = vld [vmem:[%s5375_s29 + $0x54] sm:$0xe]  ;;  %v5267_v63 = vld [vmem:[%s5375_s29 + $0x58] sm:$0xf]  ;;  %v1048_v57 = vadd.f32 %v1047_v2, %v5705_v9 }
 0x1af   : > { %v5035_v35 = vrot.slane %v5019_v54, 9  ;;  %v2502_v53 = vrot.slane %v5267_v63, 5  ;;  %v3290_v63 = vrot.slane %v3288_v29, 4  ;;  %v3294_v29 = vshll.u32 %v6244_v52, 16 }
 0x1b0   : > { %v1398_v17 = vpop.f32.mrf.mxu2  ;;  %v6217_v45 = vadd.f32 %v2339_v15, %v1731_v7  ;;  %v3275_v15 = vshrl.u32 %v4967_v50, 16  ;;  %v3278_v7 = vshll.u32 %v4967_v50, 16 }
 0x1b1   : > { %v1442_v34 = vadd.f32 %v1398_v17, %v1046_v28  ;;  %v3284_v28 = vshll.u32 %v6221_v56, 16  ;;  %v2504_v9 = vrot.slane %v2502_v53, 4  ;;  %v3838_v50 = vsel %vm5561_vm7, %v5035_v35, %v3837_v59 }
 0x1b2   : > { %5002 = vmatmul.msk.bf16.gmra.mxu3 %vm703_vm4, %v3552_v55  ;;  %v3263_v55 = vsel %vm5387_vm3, %v3258_v44, %v3262_v3  ;;  %v3839_v3 = vrot.slane %v3837_v59, 4  ;;  %v4809_v44 = vrot.slane %v4793_v58, 9  ;;  %v3277_v39 = vrot.slane %v3275_v15, 4 }
 0x1b3   : > { %v3526_v54 = vunpack.c.l.b16 %v3263_v55  ;;  %v3280_v5 = vrot.slane %v3278_v7, 5  ;;  %v2506_v55 = vsel %vm5561_vm7, %v2504_v9, %v2505_v40  ;;  %v3924_v58 = vunpack.c.l.b16 %v3838_v50 }
 0x1b4   : > { %v2342_v33 = vpop.f32.mrf.mxu0  ;;  %v3841_v11 = vsel %vm5561_vm7, %v3839_v3, %v3840_v62  ;;  %v2585_v62 = vunpack.c.l.b16 %v2506_v55  ;;  %v3296_v9 = vrot.slane %v3294_v29, 5 }
 0x1b5   : > { %v1688_v23 = vpop.f32.mrf.mxu3  ;;  %v1050_v22 = vpop.f32.mrf.mxu1  ;;  %v3281_v15 = vor.u32 %v3280_v5, %v3277_v39  ;;  %v3844_v39 = vrot.slane %v6221_v56, 5  ;;  %v6260_v5 = vld [vmem:[%s5375_s29 + $0x70] sm:$0xf] }
 0x1b6   : > { %v1732_v19 = vadd.f32 %v1688_v23, %v1442_v34  ;;  %v5103_v34 = vld [vmem:[%s5375_s29 + $0x54] sm:$0xff]  ;;  %v3286_v23 = vrot.slane %v3284_v28, 5  ;;  %v1051_v7 = vadd.f32 %v1050_v22, %v5726_v46 }
 0x1b7   : > { %5051 = vmatmul.msk.bf16.gmra.mxu0 %vm703_vm4, %v3950_v60  ;;  %v3527_v60 = vunpack.c.l.b16 %v3273_v8  ;;  %v3925_v8 = vunpack.c.l.b16 %v3841_v11  ;;  %v3282_v40 = vrot.slane %v3281_v15, 4 }
 0x1b8   : > { %v1400_v17 = vpop.f32.mrf.mxu2  ;;  %4825 = vmatmul.msk.bf16.gmra.mxu1 %vm703_vm4, %v2609_v61  ;;  %v6237_v2 = vadd.f32 %v2342_v33, %v1732_v19  ;;  %v2503_v19 = vsel %vm5561_vm7, %v4809_v44, %v2502_v53  ;;  %v3291_v28 = vor.u32 %v3290_v63, %v3286_v23 }
 0x1b9   : > { %v1443_v4 = vadd.f32 %v1400_v17, %v1048_v57  ;;  %v3553_v35 = vpack.c.b16 %v3527_v60, %v3526_v54  ;;  %v2584_v3 = vunpack.c.l.b16 %v2503_v19  ;;  %v4970_v54 = vld [vmem:[%s5375_s29 + $0x6c] sm:$0xf] }
 0x1ba   : > { %v3292_v44 = vrot.slane %v3291_v28, 4  ;;  %v5270_v28 = vld [vmem:[%s5375_s29 + $0x68] sm:$0x1] }
 0x1bb   : > { %v2610_v60 = vpack.c.b16 %v2585_v62, %v2584_v3  ;;  %v2512_v29 = vrot.slane %v5270_v28, 5  ;;  %v3847_v3 = vrot.slane %v6244_v52, 5  ;;  %v6283_v52 = vld [vmem:[%s5375_s29 + $0x74] sm:$0x1] }
 0x1bc   : > { %v2344_v61 = vpop.f32.mrf.mxu0  ;;  %v3297_v15 = vsel %vm5387_vm3, %v3292_v44, %v3296_v9 }
 0x1bd   : > { %v1690_v57 = vpop.f32.mrf.mxu3  ;;  %4938 = vmatmul.msk.bf16.gmra.mxu2 %vm703_vm4, %v5103_v34  ;;  %v1052_v33 = vpop.f32.mrf.mxu1  ;;  %v3951_v34 = vpack.c.b16 %v3925_v8, %v3924_v58  ;;  %v4794_v58 = vld [vmem:[%s5375_s29 + $0x60] sm:$0xe]  ;;  %v3312_v8 = vshrl.u32 %v6260_v5, 16 }
 0x1be   : > { %v1733_v59 = vadd.f32 %v1690_v57, %v1443_v4  ;;  %v5020_v4 = vld [vmem:[%s5375_s29 + $0x60] sm:$0xe]  ;;  %v5269_v57 = vld [vmem:[%s5375_s29 + $0x64] sm:$0xf]  ;;  %v1053_v56 = vadd.f32 %v1052_v33, %v5743_v25 }
 0x1bf   : > { %v5036_v11 = vrot.slane %v5020_v4, 9  ;;  %v2509_v19 = vrot.slane %v5269_v57, 5  ;;  %v3314_v57 = vrot.slane %v3312_v8, 4  ;;  %v3318_v8 = vshll.u32 %v6283_v52, 16 }
 0x1c0   : > { %v1403_v17 = vpop.f32.mrf.mxu2  ;;  %v6256_v46 = vadd.f32 %v2344_v61, %v1733_v59  ;;  %v3299_v61 = vshrl.u32 %v4970_v54, 16  ;;  %v3302_v59 = vshll.u32 %v4970_v54, 16 }
 0x1c1   : > { %v1444_v53 = vadd.f32 %v1403_v17, %v1051_v7  ;;  %v3308_v7 = vshll.u32 %v6260_v5, 16  ;;  %v2511_v25 = vrot.slane %v2509_v19, 4  ;;  %v3845_v54 = vsel %vm5561_vm7, %v5036_v11, %v3844_v39 }
 0x1c2   : > { %5003 = vmatmul.msk.bf16.gmra.mxu3 %vm703_vm4, %v3553_v35  ;;  %v3287_v35 = vsel %vm5387_vm3, %v3282_v40, %v3286_v23  ;;  %v3846_v23 = vrot.slane %v3844_v39, 4  ;;  %v4810_v40 = vrot.slane %v4794_v58, 9  ;;  %v3301_v44 = vrot.slane %v3299_v61, 4 }
 0x1c3   : > { %v3528_v4 = vunpack.c.l.b16 %v3287_v35  ;;  %v3304_v9 = vrot.slane %v3302_v59, 5  ;;  %v2513_v35 = vsel %vm5561_vm7, %v2511_v25, %v2512_v29  ;;  %v3926_v58 = vunpack.c.l.b16 %v3845_v54 }
 0x1c4   : > { %v2347_v22 = vpop.f32.mrf.mxu0  ;;  %v3848_v28 = vsel %vm5561_vm7, %v3846_v23, %v3847_v3  ;;  %v2587_v3 = vunpack.c.l.b16 %v2513_v35  ;;  %v3320_v25 = vrot.slane %v3318_v8, 5  ;;  %v5271_v35 = vld [vmem:[%s5375_s29 + $0x70] sm:$0xf] }
 0x1c5   : > { %v1693_v50 = vpop.f32.mrf.mxu3  ;;  %v1055_v63 = vpop.f32.mrf.mxu1  ;;  %v3305_v61 = vor.u32 %v3304_v9, %v3301_v44  ;;  %v3851_v9 = vrot.slane %v6260_v5, 5 }
 0x1c6   : > { %v1734_v55 = vadd.f32 %v1693_v50, %v1444_v53  ;;  %v5104_v53 = vld [vmem:[%s5375_s29 + $0x60] sm:$0xff]  ;;  %v3310_v50 = vrot.slane %v3308_v7, 5  ;;  %v1056_v59 = vadd.f32 %v1055_v63, %v5764_v47 }
 0x1c7   : > { %5052 = vmatmul.msk.bf16.gmra.mxu0 %vm703_vm4, %v3951_v34  ;;  %v3529_v34 = vunpack.c.l.b16 %v3297_v15  ;;  %v3927_v15 = vunpack.c.l.b16 %v3848_v28  ;;  %v3306_v29 = vrot.slane %v3305_v61, 4 }
 0x1c8   : > { %v1405_v17 = vpop.f32.mrf.mxu2  ;;  %4826 = vmatmul.msk.bf16.gmra.mxu1 %vm703_vm4, %v2610_v60  ;;  %v6276_v33 = vadd.f32 %v2347_v22, %v1734_v55  ;;  %v2510_v55 = vsel %vm5561_vm7, %v4810_v40, %v2509_v19  ;;  %v3315_v7 = vor.u32 %v3314_v57, %v3310_v50  ;;  %v4973_v19 = vld [vmem:[%s5375_s29 + $0x78] sm:$0xf] }
 0x1c9   : > { %v1445_v62 = vadd.f32 %v1405_v17, %v1053_v56  ;;  %v3554_v11 = vpack.c.b16 %v3529_v34, %v3528_v4  ;;  %v2586_v23 = vunpack.c.l.b16 %v2510_v55  ;;  %v5021_v4 = vld [vmem:[%s5375_s29 + $0x6c] sm:$0xe]  ;;  %v6296_v34 = vld [vmem:[%s5375_s29 + $0x7c] sm:$0xf]  ;;  %v3323_v54 = vshrl.u32 %v4973_v19, 16 }
 0x1ca   : > { %v3316_v40 = vrot.slane %v3315_v7, 4  ;;  %v3326_v57 = vshll.u32 %v4973_v19, 16  ;;  %v4795_v55 = vld [vmem:[%s5375_s29 + $0x6c] sm:$0xe]  ;;  %v3311_v5 = vsel %vm5387_vm3, %v3306_v29, %v3310_v50  ;;  %v3854_v7 = vrot.slane %v6283_v52, 5 }
 0x1cb   : > { %v2611_v44 = vpack.c.b16 %v2587_v3, %v2586_v23  ;;  %v4811_v23 = vrot.slane %v4795_v55, 9  ;;  %v3325_v3 = vrot.slane %v3323_v54, 4  ;;  %v3530_v50 = vunpack.c.l.b16 %v3311_v5  ;;  %v6322_v54 = vld [vmem:[%s5375_s29 + $0x80] sm:$0x1] }
 0x1cc   : > { %v2349_v60 = vpop.f32.mrf.mxu0 }
 0x1cd   : > { %v1695_v56 = vpop.f32.mrf.mxu3  ;;  %4939 = vmatmul.msk.bf16.gmra.mxu2 %vm703_vm4, %v5104_v53  ;;  %v1057_v22 = vpop.f32.mrf.mxu1 }
 0x1ce   : > { %v1735_v39 = vadd.f32 %v1695_v56, %v1445_v62  ;;  %v3952_v62 = vpack.c.b16 %v3927_v15, %v3926_v58  ;;  %v5037_v58 = vrot.slane %v5021_v4, 9  ;;  %v3321_v15 = vsel %vm5387_vm3, %v3316_v40, %v3320_v25 }
 0x1cf   : > { %v3531_v29 = vunpack.c.l.b16 %v3321_v15 }
 0x1d0   : > { %v1408_v17 = vpop.f32.mrf.mxu2  ;;  %v6298_v47 = vadd.f32 %v2349_v60, %v1735_v39  ;;  %v3336_v60 = vshrl.u32 %v6296_v34, 16  ;;  %v1058_v39 = vadd.f32 %v1057_v22, %v5783_v10  ;;  %v5272_v10 = vld [vmem:[%s5375_s29 + $0x74] sm:$0x1] }
 0x1d1   : > { %v1446_v53 = vadd.f32 %v1408_v17, %v1056_v59  ;;  %v3332_v59 = vshll.u32 %v6296_v34, 16  ;;  %v3853_v17 = vrot.slane %v3851_v9, 4  ;;  %v2519_v22 = vrot.slane %v5272_v10, 5 }
 0x1d2   : > { %5004 = vmatmul.msk.bf16.gmra.mxu3 %vm703_vm4, %v3554_v11  ;;  %v2516_v11 = vrot.slane %v5271_v35, 5  ;;  %v3338_v25 = vrot.slane %v3336_v60, 4 }
 0x1d3   : > { %v3334_v40 = vrot.slane %v3332_v59, 5  ;;  %v3855_v55 = vsel %vm5561_vm7, %v3853_v17, %v3854_v7  ;;  %v3342_v7 = vshll.u32 %v6322_v54, 16 }
 0x1d4   : > { %v2352_v63 = vpop.f32.mrf.mxu0  ;;  %v2518_v4 = vrot.slane %v2516_v11, 4  ;;  %v3929_v15 = vunpack.c.l.b16 %v3855_v55 }
 0x1d5   : > { %v1698_v28 = vpop.f32.mrf.mxu3  ;;  %v1060_v56 = vpop.f32.mrf.mxu1 }
 0x1d6   : > { %v1736_v61 = vadd.f32 %v1698_v28, %v1446_v53  ;;  %v3328_v53 = vrot.slane %v3326_v57, 5 }
 0x1d7   : > { %5053 = vmatmul.msk.bf16.gmra.mxu0 %vm703_vm4, %v3952_v62  ;;  %v5105_v62 = vld [vmem:[%s5375_s29 + $0x6c] sm:$0xff] }
 0x1d8   : > { %v1410_v8 = vpop.f32.mrf.mxu2  ;;  %4827 = vmatmul.msk.bf16.gmra.mxu1 %vm703_vm4, %v2611_v44  ;;  %v6315_v28 = vadd.f32 %v2352_v63, %v1736_v61  ;;  %v3852_v44 = vsel %vm5561_vm7, %v5037_v58, %v3851_v9  ;;  %v2517_v63 = vsel %vm5561_vm7, %v4811_v23, %v2516_v11  ;;  %v2520_v61 = vsel %vm5561_vm7, %v2518_v4, %v2519_v22  ;;  %v4976_v23 = vld [vmem:[%s5375_s29 + $0x84] sm:$0xf]  ;;  %v5022_v4 = vld [vmem:[%s5375_s29 + $0x78] sm:$0xe] }
 0x1d9   : > { %v1447_v19 = vadd.f32 %v1410_v8, %v1058_v39  ;;  %v3329_v59 = vor.u32 %v3328_v53, %v3325_v3  ;;  %v3555_v39 = vpack.c.b16 %v3531_v29, %v3530_v50  ;;  %v3339_v9 = vor.u32 %v3338_v25, %v3334_v40 }
 0x1da   : > { %v1061_v58 = vadd.f32 %v1060_v56, %v5806_v43  ;;  %v3928_v5 = vunpack.c.l.b16 %v3852_v44  ;;  %v2588_v17 = vunpack.c.l.b16 %v2517_v63  ;;  %v3858_v43 = vrot.slane %v6296_v34, 5  ;;  %v6336_v56 = vld [vmem:[%s5375_s29 + $0x88] sm:$0xf] }
 0x1db   : > { %v3330_v11 = vrot.slane %v3329_v59, 4  ;;  %v3340_v3 = vrot.slane %v3339_v9, 4  ;;  %v3347_v25 = vshrl.u32 %v4976_v23, 16  ;;  %v3350_v44 = vshll.u32 %v4976_v23, 16  ;;  %v5273_v59 = vld [vmem:[%s5375_s29 + $0x7c] sm:$0xf] }
 0x1dc   : > { %v2354_v52 = vpop.f32.mrf.mxu0  ;;  %v3953_v53 = vpack.c.b16 %v3929_v15, %v3928_v5  ;;  %v3356_v34 = vshll.u32 %v6336_v56, 16  ;;  %v3860_v15 = vrot.slane %v3858_v43, 4  ;;  %v5106_v23 = vld [vmem:[%s5375_s29 + $0x78] sm:$0xff] }
 0x1dd   : > { %v1700_v57 = vpop.f32.mrf.mxu3  ;;  %4940 = vmatmul.msk.bf16.gmra.mxu2 %vm703_vm4, %v5105_v62  ;;  %v1062_v35 = vpop.f32.mrf.mxu1  ;;  %v2589_v62 = vunpack.c.l.b16 %v2520_v61  ;;  %v3335_v63 = vsel %vm5387_vm3, %v3330_v11, %v3334_v40  ;;  %v4796_v61 = vld [vmem:[%s5375_s29 + $0x78] sm:$0xe]  ;;  %v3861_v40 = vrot.slane %v6322_v54, 5 }
 0x1de   : > { %v1737_v60 = vadd.f32 %v1700_v57, %v1447_v19  ;;  %v3344_v19 = vrot.slane %v3342_v7, 5  ;;  %v3358_v54 = vrot.slane %v3356_v34, 5 }
 0x1df   : > { %v2612_v29 = vpack.c.b16 %v2589_v62, %v2588_v17  ;;  %v4812_v17 = vrot.slane %v4796_v61, 9  ;;  %v3349_v62 = vrot.slane %v3347_v25, 4  ;;  %v6361_v25 = vld [vmem:[%s5375_s29 + $0x8c] sm:$0x1] }
 0x1e0   : > { %v1413_v8 = vpop.f32.mrf.mxu2  ;;  %v6338_v22 = vadd.f32 %v2354_v52, %v1737_v60  ;;  %v3360_v52 = vshrl.u32 %v6336_v56, 16  ;;  %v1063_v60 = vadd.f32 %v1062_v35, %v5823_v21  ;;  %v3345_v5 = vsel %vm5387_vm3, %v3340_v3, %v3344_v19 }
 0x1e1   : > { %v1448_v10 = vadd.f32 %v1413_v8, %v1061_v58  ;;  %v5038_v58 = vrot.slane %v5022_v4, 9  ;;  %v3532_v8 = vunpack.c.l.b16 %v3335_v63  ;;  %v3533_v35 = vunpack.c.l.b16 %v3345_v5  ;;  %v4979_v5 = vld [vmem:[%s5375_s29 + $0x90] sm:$0xf] }
 0x1e2   : > { %5005 = vmatmul.msk.bf16.gmra.mxu3 %vm703_vm4, %v3555_v39  ;;  %6680 = vst [vmem:[#allocation4_spill] sm:$0xff] %v6338_v22  ;;  %v2523_v39 = vrot.slane %v5273_v59, 5  ;;  %v3362_v19 = vrot.slane %v3360_v52, 4  ;;  %v3374_v22 = vshll.u32 %v4979_v5, 16 }
 0x1e3   : > { %v3859_v3 = vsel %vm5561_vm7, %v5038_v58, %v3858_v43  ;;  %v3556_v34 = vpack.c.b16 %v3533_v35, %v3532_v8 }
 0x1e4   : > { %v2357_v50 = vpop.f32.mrf.mxu0  ;;  %v2525_v4 = vrot.slane %v2523_v39, 4  ;;  %v3930_v61 = vunpack.c.l.b16 %v3859_v3  ;;  %v2524_v59 = vsel %vm5561_vm7, %v4812_v17, %v2523_v39  ;;  %v6372_v3 = vld [vmem:[%s5375_s29 + $0x94] sm:$0xf]  ;;  %v5023_v39 = vld [vmem:[%s5375_s29 + $0x84] sm:$0xe]  ;;  %v3371_v17 = vshrl.u32 %v4979_v5, 16 }
 0x1e5   : > { %v1703_v55 = vpop.f32.mrf.mxu3  ;;  %v2680_v57 = vpop.f32.mrf.mxu1 }
 0x1e6   : > { %v1738_v9 = vadd.f32 %v1703_v55, %v1448_v10  ;;  %v3352_v10 = vrot.slane %v3350_v44, 5 }
 0x1e7   : > { %5054 = vmatmul.msk.bf16.gmra.mxu0 %vm703_vm4, %v3953_v53  ;;  %v5274_v53 = vld [vmem:[%s5375_s29 + $0x80] sm:$0x1] }
 0x1e8   : > { %v1415_v7 = vpop.f32.mrf.mxu2  ;;  %4828 = vmatmul.msk.bf16.gmra.mxu1 %vm703_vm4, %v2612_v29  ;;  %v2526_v55 = vrot.slane %v5274_v53, 5  ;;  %v6354_v21 = vadd.f32 %v2357_v50, %v1738_v9  ;;  %v3862_v29 = vsel %vm5561_vm7, %v3860_v15, %v3861_v40  ;;  %v3353_v9 = vor.u32 %v3352_v10, %v3349_v62 }
 0x1e9   : > { %v1449_v11 = vadd.f32 %v1415_v7, %v1063_v60  ;;  %v3931_v52 = vunpack.c.l.b16 %v3862_v29  ;;  %v3363_v60 = vor.u32 %v3362_v19, %v3358_v54  ;;  %v3366_v15 = vshll.u32 %v6361_v25, 16 }
 0x1ea   : > { %6681 = vst [vmem:[#allocation5_spill] sm:$0xff] %v6354_v21  ;;  %v2527_v43 = vsel %vm5561_vm7, %v2525_v4, %v2526_v55  ;;  %v2760_v40 = vadd.f32 %v2680_v57, %v5840_v49  ;;  %v3354_v21 = vrot.slane %v3353_v9, 4  ;;  %v3380_v49 = vshll.u32 %v6372_v3, 16 }
 0x1eb   : > { %v2591_v53 = vunpack.c.l.b16 %v2527_v43  ;;  %v3954_v8 = vpack.c.b16 %v3931_v52, %v3930_v61  ;;  %v3364_v10 = vrot.slane %v3363_v60, 4  ;;  %v3368_v4 = vrot.slane %v3366_v15, 5  ;;  %v5275_v43 = vld [vmem:[%s5375_s29 + $0x88] sm:$0xf] }
 0x1ec   : > { %v2359_v63 = vpop.f32.mrf.mxu0  ;;  %v3384_v57 = vshrl.u32 %v6372_v3, 16  ;;  %v5039_v29 = vrot.slane %v5023_v39, 9  ;;  %v3359_v61 = vsel %vm5387_vm3, %v3354_v21, %v3358_v54  ;;  %v2530_v9 = vrot.slane %v5275_v43, 5 }
 0x1ed   : > { %v1705_v44 = vpop.f32.mrf.mxu3  ;;  %4941 = vmatmul.msk.bf16.gmra.mxu2 %vm703_vm4, %v5106_v23  ;;  %v2682_v50 = vpop.f32.mrf.mxu1  ;;  %v2590_v23 = vunpack.c.l.b16 %v2524_v59  ;;  %v3369_v5 = vsel %vm5387_vm3, %v3364_v10, %v3368_v4  ;;  %v6389_v15 = vrot.slane %v3380_v49, 5 }
 0x1ee   : > { %v1739_v58 = vadd.f32 %v1705_v44, %v1449_v11  ;;  %v3865_v11 = vrot.slane %v6336_v56, 5  ;;  %v3373_v56 = vrot.slane %v3371_v17, 4  ;;  %v3386_v21 = vrot.slane %v3384_v57, 4  ;;  %v5276_v17 = vld [vmem:[%s5375_s29 + $0x8c] sm:$0x1] }
 0x1ef   : > { %v2613_v19 = vpack.c.b16 %v2591_v53, %v2590_v23  ;;  %v2761_v54 = vadd.f32 %v2682_v50, %v5853_v1  ;;  %v6396_v23 = vld [vmem:[%s5375_s29 + $0x98] sm:$0x1]  ;;  %v2532_v39 = vrot.slane %v2530_v9, 4  ;;  %v3535_v49 = vunpack.c.l.b16 %v3369_v5 }
 0x1f0   : > { %v2970_v7 = vpop.f32.mrf.mxu2  ;;  %v6379_v55 = vadd.f32 %v2359_v63, %v1739_v58  ;;  %v3867_v60 = vrot.slane %v3865_v11, 4  ;;  %v3868_v63 = vrot.slane %v6361_v25, 5  ;;  %v4797_v58 = vld [vmem:[%s5375_s29 + $0x84] sm:$0xe]  ;;  %v3387_v50 = vor.u32 %v3386_v21, %v6389_v15 }
 0x1f1   : > { %v3050_v62 = vadd.f32 %v2970_v7, %v2760_v40  ;;  %v3866_v7 = vsel %vm5561_vm7, %v5039_v29, %v3865_v11  ;;  %v5107_v25 = vld [vmem:[%s5375_s29 + $0x84] sm:$0xff]  ;;  %v4813_v53 = vrot.slane %v4797_v58, 9  ;;  %v3390_v57 = vshll.u32 %v6396_v23, 16 }
 0x1f2   : > { %5006 = vmatmul.msk.bf16.gmra.mxu3 %vm703_vm4, %v3556_v34  ;;  %v3376_v34 = vrot.slane %v3374_v22, 5  ;;  %v3534_v22 = vunpack.c.l.b16 %v3359_v61  ;;  %v3869_v1 = vsel %vm5561_vm7, %v3867_v60, %v3868_v63  ;;  %v3388_v63 = vrot.slane %v3387_v50, 4 }
 0x1f3   : > { %v3392_v58 = vrot.slane %v3390_v57, 5 }
 0x1f4   : > { %v4022_v35 = vpop.f32.mrf.mxu0  ;;  %v3557_v60 = vpack.c.b16 %v3535_v49, %v3534_v22 }
 0x1f5   : > { %v3624_v44 = vpop.f32.mrf.mxu3  ;;  %v2685_v59 = vpop.f32.mrf.mxu1 }
 0x1f6   : > { %v3704_v52 = vadd.f32 %v3624_v44, %v3050_v62  ;;  %v3377_v62 = vor.u32 %v3376_v34, %v3373_v56  ;;  %v3933_v44 = vunpack.c.l.b16 %v3869_v1  ;;  %v2762_v21 = vadd.f32 %v2685_v59, %v5866_v16  ;;  %v6423_v59 = vld [vmem:[%s5375_s29 + $0xa0] sm:$0xf] }
 0x1f7   : > { %5055 = vmatmul.msk.bf16.gmra.mxu0 %vm703_vm4, %v3954_v8  ;;  %v2533_v8 = vrot.slane %v5276_v17, 5  ;;  %v4982_v17 = vld [vmem:[%s5375_s29 + $0x9c] sm:$0xf] }
 0x1f8   : > { %v2972_v40 = vpop.f32.mrf.mxu2  ;;  %4829 = vmatmul.msk.bf16.gmra.mxu1 %vm703_vm4, %v2613_v19  ;;  %v4102_v10 = vadd.f32 %v4022_v35, %v3704_v52  ;;  %v3932_v19 = vunpack.c.l.b16 %v3866_v7  ;;  %v2531_v35 = vsel %vm5561_vm7, %v4813_v53, %v2530_v9  ;;  %v3378_v56 = vrot.slane %v3377_v62, 4 }
 0x1f9   : > { %v3051_v4 = vadd.f32 %v2972_v40, %v2761_v54  ;;  %v2534_v43 = vsel %vm5561_vm7, %v2532_v39, %v2533_v8  ;;  %v2592_v40 = vunpack.c.l.b16 %v2531_v35  ;;  %v3395_v49 = vshrl.u32 %v4982_v17, 16  ;;  %v4798_v35 = vld [vmem:[%s5375_s29 + $0x90] sm:$0xe] }
 0x1fa   : > { %v4134_v34 = vpack.c.bf16 %v4102_v10, %v4102_v10  ;;  %v2593_v7 = vunpack.c.l.b16 %v2534_v43  ;;  %v3955_v9 = vpack.c.b16 %v3933_v44, %v3932_v19  ;;  %v3383_v22 = vsel %vm5387_vm3, %v3378_v56, %v6389_v15  ;;  %v5277_v43 = vld [vmem:[%s5375_s29 + $0x94] sm:$0xf] }
 0x1fb   : > { %v3398_v1 = vshll.u32 %v4982_v17, 16  ;;  %v3393_v15 = vsel %vm5387_vm3, %v3388_v63, %v3392_v58  ;;  %v3536_v44 = vunpack.c.l.b16 %v3383_v22  ;;  %v2537_v56 = vrot.slane %v5277_v43, 5 }
 0x1fc   : > { %v4024_v11 = vpop.f32.mrf.mxu0  ;;  %v4198_v53 = vunpack.c.l.bf16 %v4134_v34  ;;  %v3404_v34 = vshll.u32 %v6423_v59, 16  ;;  %v3537_v63 = vunpack.c.l.b16 %v3393_v15  ;;  %v3397_v58 = vrot.slane %v3395_v49, 4  ;;  %v6442_v49 = vld [vmem:[%s5375_s29 + $0xa4] sm:$0x1] }
 0x1fd   : > { %v3626_v29 = vpop.f32.mrf.mxu3  ;;  %4942 = vmatmul.msk.bf16.gmra.mxu2 %vm703_vm4, %v5107_v25  ;;  %v2687_v61 = vpop.f32.mrf.mxu1  ;;  %v5024_v25 = vld [vmem:[%s5375_s29 + $0x90] sm:$0xe]  ;;  %v4814_v22 = vrot.slane %v4798_v35, 9 }
 0x1fe   : > { %v3705_v52 = vadd.f32 %v3626_v29, %v3051_v4  ;;  %v5040_v62 = vrot.slane %v5024_v25, 9  ;;  %v3872_v4 = vrot.slane %v6372_v3, 5  ;;  %v3408_v3 = vshrl.u32 %v6423_v59, 16 }
 0x1ff   : > { %v2763_v25 = vadd.f32 %v2687_v61, %v5879_v13  ;;  %v3558_v35 = vpack.c.b16 %v3537_v63, %v3536_v44 }
 0x200   : > { %v4103_v5 = vadd.f32 %v4024_v11, %v3705_v52  ;;  %v2975_v54 = vpop.f32.mrf.mxu2  ;;  %v2614_v11 = vpack.c.b16 %v2593_v7, %v2592_v40  ;;  %v4267_v52 = vmul.f32 %v4198_v53, %v4198_v53  ;;  %v3873_v13 = vsel %vm5561_vm7, %v5040_v62, %v3872_v4 }
 0x201   : > { %v3052_v16 = vadd.f32 %v2975_v54, %v2762_v21  ;;  %v3400_v54 = vrot.slane %v3398_v1, 5 }
 0x202   : > { %v4135_v39 = vpack.c.bf16 %v4103_v5, %v4103_v5  ;;  %v5117_v8 = vpack.c.bf16 %v4103_v5, %v4102_v10  ;;  %5007 = vmatmul.msk.bf16.gmra.mxu3 %vm703_vm4, %v3557_v60  ;;  %v3875_v10 = vrot.slane %v6396_v23, 5  ;;  %v3874_v23 = vrot.slane %v3872_v4, 4 }
 0x204   : > { %5118 = vst [vmem:[%s6416_s18] sm:$0xff] %v5117_v8   ;;  %v4199_v50 = vunpack.c.l.bf16 %v4135_v39  ;;  %v4027_v57 = vpop.f32.mrf.mxu0  ;;  %v5108_v39 = vld [vmem:[%s5375_s29 + $0x90] sm:$0xff]  ;;  %v5278_v8 = vld [vmem:[%s5375_s29 + $0x98] sm:$0x1]  ;;  %v3876_v61 = vsel %vm5561_vm7, %v3874_v23, %v3875_v10  ;;  %v3414_v10 = vshll.u32 %v6442_v49, 16  ;;  %v3934_v23 = vunpack.c.l.b16 %v3873_v13 }
 0x205   : > { %v3629_v19 = vpop.f32.mrf.mxu3  ;;  %v2690_v29 = vpop.f32.mrf.mxu1 }
 0x206   : > { %v4230_v60 = vadd.f32 %v4199_v50, %v4198_v53  ;;  %v4268_v5 = vmul.f32 %v4199_v50, %v4199_v50  ;;  %v3706_v21 = vadd.f32 %v3629_v19, %v3052_v16  ;;  %v2539_v53 = vrot.slane %v2537_v56, 4 }
 0x207   : > { %5056 = vmatmul.msk.bf16.gmra.mxu0 %vm703_vm4, %v3955_v9  ;;  %v2540_v50 = vrot.slane %v5278_v8, 5  ;;  %v6439_v16 = vrot.slane %v3404_v34, 5  ;;  %v3410_v9 = vrot.slane %v3408_v3, 4  ;;  %v2764_v63 = vadd.f32 %v2690_v29, %v5892_v20  ;;  %v5025_v8 = vld [vmem:[%s5375_s29 + $0x9c] sm:$0xe] }
 0x208   : > { %v4299_v40 = vadd.f32 %v4268_v5, %v4267_v52  ;;  %v4104_v7 = vadd.f32 %v4027_v57, %v3706_v21  ;;  %v2977_v17 = vpop.f32.mrf.mxu2  ;;  %4830 = vmatmul.msk.bf16.gmra.mxu1 %vm703_vm4, %v2614_v11  ;;  %v2538_v57 = vsel %vm5561_vm7, %v4814_v22, %v2537_v56  ;;  %v3401_v52 = vor.u32 %v3400_v54, %v3397_v58  ;;  %v4985_v58 = vld [vmem:[%s5375_s29 + $0xa8] sm:$0xf] }
 0x209   : > { %v3053_v19 = vadd.f32 %v2977_v17, %v2763_v25  ;;  %v2541_v3 = vsel %vm5561_vm7, %v2539_v53, %v2540_v50  ;;  %v3411_v5 = vor.u32 %v3410_v9, %v6439_v16  ;;  %v3935_v56 = vunpack.c.l.b16 %v3876_v61 }
 0x20a   : > { %v4136_v15 = vpack.c.bf16 %v4104_v7, %v4104_v7  ;;  %v2594_v25 = vunpack.c.l.b16 %v2538_v57  ;;  %v3402_v54 = vrot.slane %v3401_v52, 4  ;;  %v3879_v20 = vrot.slane %v6423_v59, 5  ;;  %v5279_v52 = vld [vmem:[%s5375_s29 + $0xa0] sm:$0xf] }
 0x20b   : > { %v3412_v53 = vrot.slane %v3411_v5, 4  ;;  %v3419_v29 = vshrl.u32 %v4985_v58, 16  ;;  %v5041_v57 = vrot.slane %v5025_v8, 9  ;;  %v2544_v5 = vrot.slane %v5279_v52, 5  ;;  %v5109_v8 = vld [vmem:[%s5375_s29 + $0x9c] sm:$0xff] }
 0x20c   : > { %v4200_v1 = vunpack.c.l.bf16 %v4136_v15  ;;  %v4029_v43 = vpop.f32.mrf.mxu0  ;;  %v3416_v15 = vrot.slane %v3414_v10, 5 }
 0x20d   : > { %v3631_v11 = vpop.f32.mrf.mxu3  ;;  %4943 = vmatmul.msk.bf16.gmra.mxu2 %vm703_vm4, %v5108_v39  ;;  %v2692_v34 = vpop.f32.mrf.mxu1  ;;  %v2595_v39 = vunpack.c.l.b16 %v2541_v3  ;;  %v4799_v3 = vld [vmem:[%s5375_s29 + $0x9c] sm:$0xe] }
 0x20e   : > { %v4231_v62 = vadd.f32 %v4230_v60, %v4200_v1  ;;  %v4269_v4 = vmul.f32 %v4200_v1, %v4200_v1  ;;  %v3707_v21 = vadd.f32 %v3631_v11, %v3053_v19  ;;  %v6460_v19 = vld [vmem:[%s5375_s29 + $0xac] sm:$0xf]  ;;  %v3422_v1 = vshll.u32 %v4985_v58, 16 }
 0x20f   : > { %v2615_v61 = vpack.c.b16 %v2595_v39, %v2594_v25  ;;  %v3432_v59 = vshrl.u32 %v6460_v19, 16  ;;  %v3881_v25 = vrot.slane %v3879_v20, 4  ;;  %v2765_v58 = vadd.f32 %v2692_v34, %v5905_v38 }
 0x210   : > { %v4300_v17 = vadd.f32 %v4299_v40, %v4269_v4  ;;  %v4105_v44 = vadd.f32 %v4029_v43, %v3707_v21  ;;  %v2980_v22 = vpop.f32.mrf.mxu2  ;;  %v3956_v40 = vpack.c.b16 %v3935_v56, %v3934_v23  ;;  %v3428_v4 = vshll.u32 %v6460_v19, 16 }
 0x211   : > { %v3054_v9 = vadd.f32 %v2980_v22, %v2764_v63  ;;  %v3417_v56 = vsel %vm5387_vm3, %v3412_v53, %v3416_v15  ;;  %v3424_v63 = vrot.slane %v3422_v1, 5  ;;  %v3434_v15 = vrot.slane %v3432_v59, 4 }
 0x212   : > { %v4137_v60 = vpack.c.bf16 %v4105_v44, %v4105_v44  ;;  %v5122_v50 = vpack.c.bf16 %v4105_v44, %v4104_v7  ;;  %5008 = vmatmul.msk.bf16.gmra.mxu3 %vm703_vm4, %v3558_v35  ;;  %v3407_v35 = vsel %vm5387_vm3, %v3402_v54, %v6439_v16  ;;  %v3882_v16 = vrot.slane %v6442_v49, 5 }
 0x213   : > { %v3421_v44 = vrot.slane %v3419_v29, 4  ;;  %v3538_v29 = vunpack.c.l.b16 %v3407_v35  ;;  %v3539_v1 = vunpack.c.l.b16 %v3417_v56  ;;  %v3880_v34 = vsel %vm5561_vm7, %v5041_v57, %v3879_v20 }
 0x214   : > { %5194 = vst [vmem:[%s6416_s18 + $0x8] sm:$0xff] %v5122_v50   ;;  %v4201_v43 = vunpack.c.l.bf16 %v4137_v60  ;;  %v4032_v13 = vpop.f32.mrf.mxu0  ;;  %v2546_v60 = vrot.slane %v2544_v5, 4  ;;  %v5280_v50 = vld [vmem:[%s5375_s29 + $0xa4] sm:$0x1]  ;;  %v3936_v56 = vunpack.c.l.b16 %v3880_v34 }
 0x215   : > { %v3634_v11 = vpop.f32.mrf.mxu3  ;;  %v2695_v7 = vpop.f32.mrf.mxu1  ;;  %v2547_v53 = vrot.slane %v5280_v50, 5 }
 0x216   : > { %v4232_v21 = vadd.f32 %v4231_v62, %v4201_v43  ;;  %v4270_v10 = vmul.f32 %v4201_v43, %v4201_v43  ;;  %v3708_v23 = vadd.f32 %v3634_v11, %v3054_v9  ;;  %v4815_v62 = vrot.slane %v4799_v3, 9 }
 0x217   : > { %5057 = vmatmul.msk.bf16.gmra.mxu0 %vm703_vm4, %v3956_v40  ;;  %v6479_v9 = vrot.slane %v3428_v4, 5  ;;  %v3425_v43 = vor.u32 %v3424_v63, %v3421_v44  ;;  %v2548_v35 = vsel %vm5561_vm7, %v2546_v60, %v2547_v53 }
 0x218   : > { %v4301_v22 = vadd.f32 %v4300_v17, %v4270_v10  ;;  %v4106_v39 = vadd.f32 %v4032_v13, %v3708_v23  ;;  %v2982_v54 = vpop.f32.mrf.mxu2  ;;  %4831 = vmatmul.msk.bf16.gmra.mxu1 %vm703_vm4, %v2615_v61  ;;  %v6482_v17 = vld [vmem:[%s5375_s29 + $0xb0] sm:$0x1]  ;;  %v3883_v61 = vsel %vm5561_vm7, %v3881_v25, %v3882_v16  ;;  %v2545_v11 = vsel %vm5561_vm7, %v4815_v62, %v2544_v5 }
 0x219   : > { %v3055_v49 = vadd.f32 %v2982_v54, %v2765_v58  ;;  %v3435_v4 = vor.u32 %v3434_v15, %v6479_v9  ;;  %v3438_v59 = vshll.u32 %v6482_v17, 16  ;;  %v3559_v23 = vpack.c.b16 %v3539_v1, %v3538_v29 }
 0x21a   : > { %v4138_v40 = vpack.c.bf16 %v4106_v39, %v4106_v39  ;;  %v3937_v25 = vunpack.c.l.b16 %v3883_v61  ;;  %v2596_v5 = vunpack.c.l.b16 %v2545_v11  ;;  %v3426_v16 = vrot.slane %v3425_v43, 4  ;;  %v4800_v11 = vld [vmem:[%s5375_s29 + $0xa8] sm:$0xe] }
 0x21b   : > { %v2766_v58 = vadd.f32 %v2695_v7, %v5917_v41  ;;  %v2597_v62 = vunpack.c.l.b16 %v2548_v35  ;;  %v3436_v60 = vrot.slane %v3435_v4, 4  ;;  %v3440_v50 = vrot.slane %v3438_v59, 5 }
 0x21c   : > { %v4202_v13 = vunpack.c.l.bf16 %v4138_v40  ;;  %v4034_v38 = vpop.f32.mrf.mxu0  ;;  %v6499_v40 = vld [vmem:[%s5375_s29 + $0xb8] sm:$0xf]  ;;  %v3886_v29 = vrot.slane %v6460_v19, 5 }
 0x21d   : > { %v3636_v3 = vpop.f32.mrf.mxu3  ;;  %4944 = vmatmul.msk.bf16.gmra.mxu2 %vm703_vm4, %v5109_v8  ;;  %v2697_v52 = vpop.f32.mrf.mxu1  ;;  %v4988_v8 = vld [vmem:[%s5375_s29 + $0xb4] sm:$0xf]  ;;  %v3441_v61 = vsel %vm5387_vm3, %v3436_v60, %v3440_v50  ;;  %v3452_v19 = vshll.u32 %v6499_v40, 16  ;;  %v3456_v4 = vshrl.u32 %v6499_v40, 16  ;;  %v5282_v60 = vld [vmem:[%s5375_s29 + $0xb0] sm:$0x1] }
 0x21e   : > { %v4233_v10 = vadd.f32 %v4232_v21, %v4202_v13  ;;  %v4271_v20 = vmul.f32 %v4202_v13, %v4202_v13  ;;  %v3709_v57 = vadd.f32 %v3636_v3, %v3055_v49  ;;  %v3957_v49 = vpack.c.b16 %v3937_v25, %v3936_v56  ;;  %v5281_v3 = vld [vmem:[%s5375_s29 + $0xac] sm:$0xf] }
 0x21f   : > { %v3443_v41 = vshrl.u32 %v4988_v8, 16  ;;  %v3446_v7 = vshll.u32 %v4988_v8, 16  ;;  %v2616_v13 = vpack.c.b16 %v2597_v62, %v2596_v5  ;;  %v2551_v35 = vrot.slane %v5281_v3, 5  ;;  %v5110_v62 = vld [vmem:[%s5375_s29 + $0xa8] sm:$0xff] }
 0x220   : > { %v4302_v44 = vadd.f32 %v4301_v22, %v4271_v20  ;;  %v4107_v63 = vadd.f32 %v4034_v38, %v3709_v57  ;;  %v2985_v54 = vpop.f32.mrf.mxu2  ;;  %v5026_v22 = vld [vmem:[%s5375_s29 + $0xa8] sm:$0xe]  ;;  %v3889_v56 = vrot.slane %v6482_v17, 5  ;;  %v2554_v50 = vrot.slane %v5282_v60, 5 }
 0x221   : > { %v3056_v15 = vadd.f32 %v2985_v54, %v2766_v58  ;;  %v3445_v25 = vrot.slane %v3443_v41, 4  ;;  %v3448_v5 = vrot.slane %v3446_v7, 5  ;;  %v2767_v58 = vadd.f32 %v2697_v52, %v5930_v31 }
 0x222   : > { %v4139_v21 = vpack.c.bf16 %v4107_v63, %v4107_v63  ;;  %v5127_v53 = vpack.c.bf16 %v4107_v63, %v4106_v39  ;;  %5009 = vmatmul.msk.bf16.gmra.mxu3 %vm703_vm4, %v3559_v23  ;;  %v3431_v39 = vsel %vm5387_vm3, %v3426_v16, %v6479_v9  ;;  %v5042_v23 = vrot.slane %v5026_v22, 9 }
 0x223   : > { %v3888_v9 = vrot.slane %v3886_v29, 4  ;;  %v2553_v8 = vrot.slane %v2551_v35, 4  ;;  %v3541_v22 = vunpack.c.l.b16 %v3441_v61  ;;  %v3449_v41 = vor.u32 %v3448_v5, %v3445_v25 }
 0x224   : > { %5195 = vst [vmem:[%s6416_s18 + $0x10] sm:$0xff] %v5127_v53   ;;  %v4203_v1 = vunpack.c.l.bf16 %v4139_v21  ;;  %v4037_v43 = vpop.f32.mrf.mxu0  ;;  %v6519_v21 = vrot.slane %v3452_v19, 5  ;;  %v3458_v53 = vrot.slane %v3456_v4, 4  ;;  %v3887_v52 = vsel %vm5561_vm7, %v5042_v23, %v3886_v29 }
 0x225   : > { %v3639_v38 = vpop.f32.mrf.mxu3  ;;  %v2700_v34 = vpop.f32.mrf.mxu1  ;;  %v3450_v23 = vrot.slane %v3449_v41, 4 }
 0x226   : > { %v4234_v59 = vadd.f32 %v4233_v10, %v4203_v1  ;;  %v4272_v20 = vmul.f32 %v4203_v1, %v4203_v1  ;;  %v3710_v57 = vadd.f32 %v3639_v38, %v3056_v15  ;;  %v4816_v10 = vrot.slane %v4800_v11, 9 }
 0x227   : > { %5058 = vmatmul.msk.bf16.gmra.mxu0 %vm703_vm4, %v3957_v49  ;;  %v3540_v49 = vunpack.c.l.b16 %v3431_v39  ;;  %v3890_v1 = vsel %vm5561_vm7, %v3888_v9, %v3889_v56  ;;  %v2555_v39 = vsel %vm5561_vm7, %v2553_v8, %v2554_v50  ;;  %v3459_v61 = vor.u32 %v3458_v53, %v6519_v21  ;;  %v6539_v50 = vld [vmem:[%s5375_s29 + $0xc4] sm:$0xf] }
 0x228   : > { %v4303_v16 = vadd.f32 %v4302_v44, %v4272_v20  ;;  %v4108_v63 = vadd.f32 %v4037_v43, %v3710_v57  ;;  %v2987_v54 = vpop.f32.mrf.mxu2  ;;  %4832 = vmatmul.msk.bf16.gmra.mxu1 %vm703_vm4, %v2616_v13  ;;  %v6522_v44 = vld [vmem:[%s5375_s29 + $0xbc] sm:$0x1]  ;;  %v2552_v43 = vsel %vm5561_vm7, %v4816_v10, %v2551_v35  ;;  %v3938_v20 = vunpack.c.l.b16 %v3887_v52  ;;  %v4801_v52 = vld [vmem:[%s5375_s29 + $0xb4] sm:$0xe] }
 0x229   : > { %v3057_v17 = vadd.f32 %v2987_v54, %v2767_v58  ;;  %v3462_v11 = vshll.u32 %v6522_v44, 16  ;;  %v3560_v4 = vpack.c.b16 %v3541_v22, %v3540_v49  ;;  %v3939_v57 = vunpack.c.l.b16 %v3890_v1  ;;  %v4991_v54 = vld [vmem:[%s5375_s29 + $0xc0] sm:$0xf]  ;;  %v5283_v1 = vld [vmem:[%s5375_s29 + $0xb8] sm:$0xf] }
 0x22a   : > { %v4140_v15 = vpack.c.bf16 %v4108_v63, %v4108_v63  ;;  %v2598_v35 = vunpack.c.l.b16 %v2552_v43  ;;  %v2768_v25 = vadd.f32 %v2700_v34, %v5944_v30  ;;  %v2599_v58 = vunpack.c.l.b16 %v2555_v39 }
 0x22b   : > { %v3460_v10 = vrot.slane %v3459_v61, 4  ;;  %v3958_v53 = vpack.c.b16 %v3939_v57, %v3938_v20  ;;  %v3467_v30 = vshrl.u32 %v4991_v54, 16  ;;  %v3470_v34 = vshll.u32 %v4991_v54, 16 }
 0x22c   : > { %v4204_v7 = vunpack.c.l.bf16 %v4140_v15  ;;  %v4039_v31 = vpop.f32.mrf.mxu0  ;;  %v3893_v15 = vrot.slane %v6499_v40, 5  ;;  %v2617_v22 = vpack.c.b16 %v2599_v58, %v2598_v35  ;;  %v2558_v43 = vrot.slane %v5283_v1, 5  ;;  %v5284_v58 = vld [vmem:[%s5375_s29 + $0xbc] sm:$0x1] }
 0x22d   : > { %v3641_v13 = vpop.f32.mrf.mxu3  ;;  %4945 = vmatmul.msk.bf16.gmra.mxu2 %vm703_vm4, %v5110_v62  ;;  %v2702_v38 = vpop.f32.mrf.mxu1  ;;  %v3464_v62 = vrot.slane %v3462_v11, 5  ;;  %v3476_v40 = vshll.u32 %v6539_v50, 16  ;;  %v3472_v20 = vrot.slane %v3470_v34, 5  ;;  %v2561_v54 = vrot.slane %v5284_v58, 5 }
 0x22e   : > { %v4235_v3 = vadd.f32 %v4234_v59, %v4204_v7  ;;  %v4273_v29 = vmul.f32 %v4204_v7, %v4204_v7  ;;  %v3711_v19 = vadd.f32 %v3641_v13, %v3057_v17  ;;  %v3480_v13 = vshrl.u32 %v6539_v50, 16 }
 0x230   : > { %v4304_v9 = vadd.f32 %v4303_v16, %v4273_v29  ;;  %v4109_v56 = vadd.f32 %v4039_v31, %v3711_v19  ;;  %v2990_v5 = vpop.f32.mrf.mxu2  ;;  %v5027_v16 = vld [vmem:[%s5375_s29 + $0xb4] sm:$0xe]  ;;  %v3465_v31 = vsel %vm5387_vm3, %v3460_v10, %v3464_v62  ;;  %v3896_v19 = vrot.slane %v6522_v44, 5 }
 0x231   : > { %v3058_v60 = vadd.f32 %v2990_v5, %v2768_v25  ;;  %v5043_v29 = vrot.slane %v5027_v16, 9  ;;  %v5111_v25 = vld [vmem:[%s5375_s29 + $0xb4] sm:$0xff]  ;;  %v2560_v5 = vrot.slane %v2558_v43, 4  ;;  %v6559_v10 = vrot.slane %v3476_v40, 5 }
 0x232   : > { %v4141_v59 = vpack.c.bf16 %v4109_v56, %v4109_v56  ;;  %v5132_v8 = vpack.c.bf16 %v4109_v56, %v4108_v63  ;;  %5010 = vmatmul.msk.bf16.gmra.mxu3 %vm703_vm4, %v3560_v4  ;;  %v3455_v63 = vsel %vm5387_vm3, %v3450_v23, %v6519_v21  ;;  %v3895_v21 = vrot.slane %v3893_v15, 4 }
 0x233   : > { %v3469_v4 = vrot.slane %v3467_v30, 4  ;;  %v2769_v23 = vadd.f32 %v2702_v38, %v5957_v48  ;;  %v3482_v62 = vrot.slane %v3480_v13, 4  ;;  %v3894_v38 = vsel %vm5561_vm7, %v5043_v29, %v3893_v15 }
 0x234   : > { %5196 = vst [vmem:[%s6416_s18 + $0x18] sm:$0xff] %v5132_v8   ;;  %v4205_v17 = vunpack.c.l.bf16 %v4141_v59  ;;  %v4042_v49 = vpop.f32.mrf.mxu0  ;;  %v3542_v8 = vunpack.c.l.b16 %v3455_v63  ;;  %v3897_v30 = vsel %vm5561_vm7, %v3895_v21, %v3896_v19  ;;  %v3940_v40 = vunpack.c.l.b16 %v3894_v38 }
 0x235   : > { %v3644_v41 = vpop.f32.mrf.mxu3  ;;  %v2705_v7 = vpop.f32.mrf.mxu1  ;;  %v3483_v63 = vor.u32 %v3482_v62, %v6559_v10  ;;  %v3941_v13 = vunpack.c.l.b16 %v3897_v30  ;;  %v4994_v62 = vld [vmem:[%s5375_s29 + $0xcc] sm:$0xf] }
 0x236   : > { %v4236_v39 = vadd.f32 %v4235_v3, %v4205_v17  ;;  %v4274_v61 = vmul.f32 %v4205_v17, %v4205_v17  ;;  %v3712_v11 = vadd.f32 %v3644_v41, %v3058_v60  ;;  %v4817_v3 = vrot.slane %v4801_v52, 9 }
 0x237   : > { %5059 = vmatmul.msk.bf16.gmra.mxu0 %vm703_vm4, %v3958_v53  ;;  %v3543_v60 = vunpack.c.l.b16 %v3465_v31  ;;  %v3473_v53 = vor.u32 %v3472_v20, %v3469_v4  ;;  %v2770_v21 = vadd.f32 %v2705_v7, %v5973_v14  ;;  %v3484_v20 = vrot.slane %v3483_v63, 4 }
 0x238   : > { %v4305_v57 = vadd.f32 %v4304_v9, %v4274_v61  ;;  %v4110_v35 = vadd.f32 %v4042_v49, %v3712_v11  ;;  %v2992_v56 = vpop.f32.mrf.mxu2  ;;  %4833 = vmatmul.msk.bf16.gmra.mxu1 %vm703_vm4, %v2617_v22  ;;  %v6562_v9 = vld [vmem:[%s5375_s29 + $0xc8] sm:$0x1]  ;;  %v2559_v34 = vsel %vm5561_vm7, %v4817_v3, %v2558_v43  ;;  %v2562_v22 = vsel %vm5561_vm7, %v2560_v5, %v2561_v54 }
 0x239   : > { %v3059_v44 = vadd.f32 %v2992_v56, %v2769_v23  ;;  %v3486_v41 = vshll.u32 %v6562_v9, 16  ;;  %v3561_v1 = vpack.c.b16 %v3543_v60, %v3542_v8  ;;  %v2600_v61 = vunpack.c.l.b16 %v2559_v34 }
 0x23a   : > { %v4142_v59 = vpack.c.bf16 %v4110_v35, %v4110_v35  ;;  %v3474_v43 = vrot.slane %v3473_v53, 4  ;;  %v2601_v4 = vunpack.c.l.b16 %v2562_v22  ;;  %v3900_v5 = vrot.slane %v6539_v50, 5  ;;  %v4802_v53 = vld [vmem:[%s5375_s29 + $0xc0] sm:$0xe] }
 0x23b   : > { %v3488_v23 = vrot.slane %v3486_v41, 5  ;;  %v3903_v50 = vrot.slane %v6562_v9, 5  ;;  %v3494_v22 = vshll.u32 %v4994_v62, 16 }
 0x23c   : > { %v4206_v16 = vunpack.c.l.bf16 %v4142_v59  ;;  %v4044_v48 = vpop.f32.mrf.mxu0  ;;  %v2618_v7 = vpack.c.b16 %v2601_v4, %v2600_v61  ;;  %v3479_v54 = vsel %vm5387_vm3, %v3474_v43, %v6559_v10  ;;  %v6585_v59 = vld [vmem:[%s5375_s29 + $0xd0] sm:$0xf]  ;;  %v3491_v10 = vshrl.u32 %v4994_v62, 16 }
 0x23d   : > { %v3646_v17 = vpop.f32.mrf.mxu3  ;;  %4946 = vmatmul.msk.bf16.gmra.mxu2 %vm703_vm4, %v5111_v25  ;;  %v2707_v49 = vpop.f32.mrf.mxu1  ;;  %v5028_v25 = vld [vmem:[%s5375_s29 + $0xc0] sm:$0xe]  ;;  %v3489_v8 = vsel %vm5387_vm3, %v3484_v20, %v3488_v23  ;;  %v3500_v63 = vshll.u32 %v6585_v59, 16  ;;  %v3504_v41 = vshrl.u32 %v6585_v59, 16 }
 0x23e   : > { %v4237_v31 = vadd.f32 %v4236_v39, %v4206_v16  ;;  %v4275_v52 = vmul.f32 %v4206_v16, %v4206_v16  ;;  %v3713_v15 = vadd.f32 %v3646_v17, %v3059_v44  ;;  %v5044_v60 = vrot.slane %v5028_v25, 9  ;;  %v5285_v16 = vld [vmem:[%s5375_s29 + $0xc4] sm:$0xf] }
 0x23f   : > { %v3902_v17 = vrot.slane %v3900_v5, 4  ;;  %v2771_v9 = vadd.f32 %v2707_v49, %v5998_v51  ;;  %v3545_v61 = vunpack.c.l.b16 %v3489_v8  ;;  %v3493_v51 = vrot.slane %v3491_v10, 4 }
 0x240   : > { %v4306_v11 = vadd.f32 %v4305_v57, %v4275_v52  ;;  %v4111_v29 = vadd.f32 %v4044_v48, %v3713_v15  ;;  %v2995_v19 = vpop.f32.mrf.mxu2  ;;  %v3959_v57 = vpack.c.b16 %v3941_v13, %v3940_v40  ;;  %v2565_v48 = vrot.slane %v5285_v16, 5  ;;  %v5112_v40 = vld [vmem:[%s5375_s29 + $0xc0] sm:$0xff] }
 0x241   : > { %v3060_v3 = vadd.f32 %v2995_v19, %v2770_v21  ;;  %v3544_v13 = vunpack.c.l.b16 %v3479_v54  ;;  %v3901_v20 = vsel %vm5561_vm7, %v5044_v60, %v3900_v5  ;;  %v3496_v49 = vrot.slane %v3494_v22, 5 }
 0x242   : > { %v4143_v39 = vpack.c.bf16 %v4111_v29, %v4111_v29  ;;  %v5137_v56 = vpack.c.bf16 %v4111_v29, %v4110_v35  ;;  %5011 = vmatmul.msk.bf16.gmra.mxu3 %vm703_vm4, %v3561_v1  ;;  %v2567_v43 = vrot.slane %v2565_v48, 4  ;;  %v5286_v29 = vld [vmem:[%s5375_s29 + $0xc8] sm:$0x1]  ;;  %v3502_v23 = vrot.slane %v3500_v63, 5 }
 0x243   : > { %v2568_v21 = vrot.slane %v5286_v29, 5 }
 0x244   : > { %5197 = vst [vmem:[%s6416_s18 + $0x20] sm:$0xff] %v5137_v56   ;;  %v4207_v58 = vunpack.c.l.bf16 %v4143_v39  ;;  %v4047_v14 = vpop.f32.mrf.mxu0  ;;  %v3506_v39 = vrot.slane %v3504_v41, 4 }
 0x245   : > { %v3649_v35 = vpop.f32.mrf.mxu3  ;;  %v2710_v44 = vpop.f32.mrf.mxu1  ;;  %v2569_v5 = vsel %vm5561_vm7, %v2567_v43, %v2568_v21  ;;  %v3907_v21 = vrot.slane %v6585_v59, 5 }
 0x246   : > { %v4238_v38 = vadd.f32 %v4237_v31, %v4207_v58  ;;  %v4276_v30 = vmul.f32 %v4207_v58, %v4207_v58  ;;  %v3714_v34 = vadd.f32 %v3649_v35, %v3060_v3  ;;  %v4818_v31 = vrot.slane %v4802_v53, 9 }
 0x247   : > { %5060 = vmatmul.msk.bf16.gmra.mxu0 %vm703_vm4, %v3959_v57  ;;  %v4996_v57 = vld [vmem:[%s5375_s29 + $0xd4] sm:$0x1]  ;;  %v3497_v53 = vor.u32 %v3496_v49, %v3493_v51  ;;  %v3507_v16 = vor.u32 %v3506_v39, %v3502_v23  ;;  %v2603_v63 = vunpack.c.l.b16 %v2569_v5 }
 0x248   : > { %v4307_v52 = vadd.f32 %v4306_v11, %v4276_v30  ;;  %v4112_v15 = vadd.f32 %v4047_v14, %v3714_v34  ;;  %v2997_v1 = vpop.f32.mrf.mxu2  ;;  %4834 = vmatmul.msk.bf16.gmra.mxu1 %vm703_vm4, %v2618_v7  ;;  %v3904_v11 = vsel %vm5561_vm7, %v3902_v17, %v3903_v50  ;;  %v2566_v25 = vsel %vm5561_vm7, %v4818_v31, %v2565_v48  ;;  %v6682_v17 = vld [vmem:[#allocation2_spill] sm:$0xff] }
 0x249   : > { %v3061_v4 = vadd.f32 %v2997_v1, %v2771_v9  ;;  %v3562_v14 = vpack.c.b16 %v3545_v61, %v3544_v13  ;;  %v3942_v7 = vunpack.c.l.b16 %v3901_v20  ;;  %v3943_v60 = vunpack.c.l.b16 %v3904_v11 }
 0x24a   : > { %v4144_v19 = vpack.c.bf16 %v4112_v15, %v4112_v15  ;;  %v2602_v50 = vunpack.c.l.b16 %v2566_v25  ;;  %v3510_v30 = vshll.u32 %v4996_v57, 16  ;;  %v2772_v10 = vadd.f32 %v2710_v44, %v6682_v17  ;;  %v6683_v25 = vld [vmem:[#allocation3_spill] sm:$0xff] }
 0x24b   : > { %v3960_v1 = vpack.c.b16 %v3943_v60, %v3942_v7  ;;  %v3498_v31 = vrot.slane %v3497_v53, 4  ;;  %v3910_v39 = vrot.slane %v4996_v57, 5  ;;  %v5113_v7 = vld [vmem:[%s5375_s29 + $0xcc] sm:$0xff] }
 0x24c   : > { %v4208_v56 = vunpack.c.l.bf16 %v4144_v19  ;;  %v4049_v3 = vpop.f32.mrf.mxu0  ;;  %v3512_v13 = vrot.slane %v3510_v30, 5  ;;  %v2619_v29 = vpack.c.b16 %v2603_v63, %v2602_v50 }
 0x24d   : > { %v3651_v58 = vpop.f32.mrf.mxu3  ;;  %4947 = vmatmul.msk.bf16.gmra.mxu2 %vm703_vm4, %v5112_v40  ;;  %v2712_v54 = vpop.f32.mrf.mxu1  ;;  %v3508_v40 = vrot.slane %v3507_v16, 4  ;;  %v3503_v11 = vsel %vm5387_vm3, %v3498_v31, %v3502_v23 }
 0x24e   : > { %v4239_v62 = vadd.f32 %v4238_v38, %v4208_v56  ;;  %v4277_v35 = vmul.f32 %v4208_v56, %v4208_v56  ;;  %v3715_v8 = vadd.f32 %v3651_v58, %v3061_v4  ;;  %v2773_v59 = vadd.f32 %v2712_v54, %v6683_v25 }
 0x24f   : > { %v3513_v51 = vsel %vm5387_vm3, %v3508_v40, %v3512_v13 }
 0x250   : > { %v4308_v48 = vadd.f32 %v4307_v52, %v4277_v35  ;;  %v4113_v34 = vadd.f32 %v4049_v3, %v3715_v8  ;;  %v3000_v22 = vpop.f32.mrf.mxu2  ;;  %v5029_v52 = vld [vmem:[%s5375_s29 + $0xcc] sm:$0xe]  ;;  %v3546_v35 = vunpack.c.l.b16 %v3503_v11  ;;  %v3547_v8 = vunpack.c.l.b16 %v3513_v51 }
 0x251   : > { %v3062_v38 = vadd.f32 %v3000_v22, %v2772_v10  ;;  %v5045_v49 = vrot.slane %v5029_v52, 9 }
 0x252   : > { %v4145_v41 = vpack.c.bf16 %v4113_v34, %v4113_v34  ;;  %v5142_v9 = vpack.c.bf16 %v4113_v34, %v4112_v15  ;;  %5012 = vmatmul.msk.bf16.gmra.mxu3 %vm703_vm4, %v3562_v14  ;;  %v3909_v14 = vrot.slane %v3907_v21, 4 }
 0x253   : > { %v3908_v36 = vsel %vm5561_vm7, %v5045_v49, %v3907_v21 }
 0x254   : > { %5198 = vst [vmem:[%s6416_s18 + $0x28] sm:$0xff] %v5142_v9   ;;  %v4209_v61 = vunpack.c.l.bf16 %v4145_v41  ;;  %v4052_v43 = vpop.f32.mrf.mxu0  ;;  %v3911_v57 = vsel %vm5561_vm7, %v3909_v14, %v3910_v39  ;;  %v3944_v34 = vunpack.c.l.b16 %v3908_v36 }
 0x255   : > { %v3654_v19 = vpop.f32.mrf.mxu3  ;;  %v2715_v44 = vpop.f32.mrf.mxu1  ;;  %v3945_v17 = vunpack.c.l.b16 %v3911_v57 }
 0x256   : > { %v4240_v4 = vadd.f32 %v4239_v62, %v4209_v61  ;;  %v4278_v20 = vmul.f32 %v4209_v61, %v4209_v61  ;;  %v3716_v15 = vadd.f32 %v3654_v19, %v3062_v38  ;;  %v2774_v63 = vadd.f32 %v2715_v44, %v6042_v6 }
 0x257   : > { %5061 = vmatmul.msk.bf16.gmra.mxu0 %vm703_vm4, %v3960_v1  ;;  %v3961_v1 = vpack.c.b16 %v3945_v17, %v3944_v34 }
 0x258   : > { %v4309_v56 = vadd.f32 %v4308_v48, %v4278_v20  ;;  %v4114_v3 = vadd.f32 %v4052_v43, %v3716_v15  ;;  %v3002_v58 = vpop.f32.mrf.mxu2  ;;  %4835 = vmatmul.msk.bf16.gmra.mxu1 %vm703_vm4, %v2619_v29  ;;  %v3563_v48 = vpack.c.b16 %v3547_v8, %v3546_v35 }
 0x259   : > { %v3063_v62 = vadd.f32 %v3002_v58, %v2773_v59 }
 0x25a   : > { %v4146_v5 = vpack.c.bf16 %v4114_v3, %v4114_v3 }
 0x25c   : > { %v4210_v60 = vunpack.c.l.bf16 %v4146_v5  ;;  %v4054_v23 = vpop.f32.mrf.mxu0 }
 0x25d   : > { %v3656_v50 = vpop.f32.mrf.mxu3  ;;  %4948 = vmatmul.msk.bf16.gmra.mxu2 %vm703_vm4, %v5113_v7  ;;  %v2717_v54 = vpop.f32.mrf.mxu1 }
 0x25e   : > { %v4241_v53 = vadd.f32 %v4240_v4, %v4210_v60  ;;  %v4279_v16 = vmul.f32 %v4210_v60, %v4210_v60  ;;  %v3717_v30 = vadd.f32 %v3656_v50, %v3063_v62  ;;  %v2775_v6 = vadd.f32 %v2717_v54, %v6061_v37 }
 0x260   : > { %v4310_v10 = vadd.f32 %v4309_v56, %v4279_v16  ;;  %v4115_v22 = vadd.f32 %v4054_v23, %v3717_v30  ;;  %v3005_v41 = vpop.f32.mrf.mxu2 }
 0x261   : > { %v3064_v18 = vadd.f32 %v3005_v41, %v2774_v63 }
 0x262   : > { %v4147_v9 = vpack.c.bf16 %v4115_v22, %v4115_v22  ;;  %v5147_v38 = vpack.c.bf16 %v4115_v22, %v4114_v3  ;;  %5013 = vmatmul.msk.bf16.gmra.mxu3 %vm703_vm4, %v3563_v48 }
 0x264   : > { %5199 = vst [vmem:[%s6416_s18 + $0x30] sm:$0xff] %v5147_v38   ;;  %v4211_v31 = vunpack.c.l.bf16 %v4147_v9  ;;  %v4057_v40 = vpop.f32.mrf.mxu0 }
 0x265   : > { %v3659_v13 = vpop.f32.mrf.mxu3  ;;  %v2720_v61 = vpop.f32.mrf.mxu1 }
 0x266   : > { %v4242_v43 = vadd.f32 %v4241_v53, %v4211_v31  ;;  %v4280_v29 = vmul.f32 %v4211_v31, %v4211_v31  ;;  %v3718_v52 = vadd.f32 %v3659_v13, %v3064_v18  ;;  %v2776_v58 = vadd.f32 %v2720_v61, %v6081_v42 }
 0x267   : > { %5062 = vmatmul.msk.bf16.gmra.mxu0 %vm703_vm4, %v3961_v1 }
 0x268   : > { %v4311_v21 = vadd.f32 %v4310_v10, %v4280_v29  ;;  %v4116_v19 = vadd.f32 %v4057_v40, %v3718_v52  ;;  %v3007_v44 = vpop.f32.mrf.mxu2 }
 0x269   : > { %v3065_v20 = vadd.f32 %v3007_v44, %v2775_v6 }
 0x26a   : > { %v4148_v4 = vpack.c.bf16 %v4116_v19, %v4116_v19 }
 0x26c   : > { %v4212_v15 = vunpack.c.l.bf16 %v4148_v4  ;;  %v4059_v11 = vpop.f32.mrf.mxu0 }
 0x26d   : > { %v3661_v51 = vpop.f32.mrf.mxu3  ;;  %v2722_v49 = vpop.f32.mrf.mxu1 }
 0x26e   : > { %v4243_v39 = vadd.f32 %v4242_v43, %v4212_v15  ;;  %v4281_v56 = vmul.f32 %v4212_v15, %v4212_v15  ;;  %v3719_v3 = vadd.f32 %v3661_v51, %v3065_v20  ;;  %v2777_v53 = vadd.f32 %v2722_v49, %v6100_v24 }
 0x270   : > { %v4312_v25 = vadd.f32 %v4311_v21, %v4281_v56  ;;  %v4117_v59 = vadd.f32 %v4059_v11, %v3719_v3  ;;  %v3010_v14 = vpop.f32.mrf.mxu2 }
 0x271   : > { %v3066_v62 = vadd.f32 %v3010_v14, %v2776_v58 }
 0x272   : > { %v4149_v7 = vpack.c.bf16 %v4117_v59, %v4117_v59  ;;  %v5152_v5 = vpack.c.bf16 %v4117_v59, %v4116_v19 }
 0x274   : > { %5200 = vst [vmem:[%s6416_s18 + $0x38] sm:$0xff] %v5152_v5   ;;  %v4213_v37 = vunpack.c.l.bf16 %v4149_v7  ;;  %v4062_v35 = vpop.f32.mrf.mxu0 }
 0x275   : > { %v3664_v8 = vpop.f32.mrf.mxu3  ;;  %v2725_v60 = vpop.f32.mrf.mxu1 }
 0x276   : > { %v4244_v23 = vadd.f32 %v4243_v39, %v4213_v37  ;;  %v4282_v36 = vmul.f32 %v4213_v37, %v4213_v37  ;;  %v3720_v57 = vadd.f32 %v3664_v8, %v3066_v62  ;;  %v2778_v18 = vadd.f32 %v2725_v60, %v6120_v12 }
 0x278   : > { %v4313_v50 = vadd.f32 %v4312_v25, %v4282_v36  ;;  %v4118_v54 = vadd.f32 %v4062_v35, %v3720_v57  ;;  %v3012_v16 = vpop.f32.mrf.mxu2 }
 0x279   : > { %v3067_v42 = vadd.f32 %v3012_v16, %v2777_v53 }
 0x27a   : > { %v4150_v30 = vpack.c.bf16 %v4118_v54, %v4118_v54 }
 0x27c   : > { %v4214_v48 = vunpack.c.l.bf16 %v4150_v30  ;;  %v4064_v34 = vpop.f32.mrf.mxu0 }
 0x27d   : > { %v3666_v17 = vpop.f32.mrf.mxu3  ;;  %v2727_v10 = vpop.f32.mrf.mxu1 }
 0x27e   : > { %v4245_v22 = vadd.f32 %v4244_v23, %v4214_v48  ;;  %v4283_v63 = vmul.f32 %v4214_v48, %v4214_v48  ;;  %v3721_v41 = vadd.f32 %v3666_v17, %v3067_v42  ;;  %v2779_v4 = vadd.f32 %v2727_v10, %v6139_v26 }
 0x280   : > { %v4314_v9 = vadd.f32 %v4313_v50, %v4283_v63  ;;  %v4119_v38 = vadd.f32 %v4064_v34, %v3721_v41  ;;  %v3015_v1 = vpop.f32.mrf.mxu2 }
 0x281   : > { %v3068_v13 = vadd.f32 %v3015_v1, %v2778_v18 }
 0x282   : > { %v4151_v31 = vpack.c.bf16 %v4119_v38, %v4119_v38  ;;  %v5157_v40 = vpack.c.bf16 %v4119_v38, %v4118_v54 }
 0x284   : > { %5201 = vst [vmem:[%s6416_s18 + $0x40] sm:$0xff] %v5157_v40   ;;  %v4215_v24 = vunpack.c.l.bf16 %v4151_v31  ;;  %v4067_v61 = vpop.f32.mrf.mxu0 }
 0x285   : > { %v3669_v43 = vpop.f32.mrf.mxu3  ;;  %v2730_v29 = vpop.f32.mrf.mxu1 }
 0x286   : > { %v4246_v52 = vadd.f32 %v4245_v22, %v4215_v24  ;;  %v4284_v21 = vmul.f32 %v4215_v24, %v4215_v24  ;;  %v3722_v19 = vadd.f32 %v3669_v43, %v3068_v13  ;;  %v2780_v14 = vadd.f32 %v2730_v29, %v6159_v0 }
 0x288   : > { %v4315_v6 = vadd.f32 %v4314_v9, %v4284_v21  ;;  %v4120_v44 = vadd.f32 %v4067_v61, %v3722_v19  ;;  %v3017_v20 = vpop.f32.mrf.mxu2 }
 0x289   : > { %v3069_v12 = vadd.f32 %v3017_v20, %v2779_v4 }
 0x28a   : > { %v4152_v15 = vpack.c.bf16 %v4120_v44, %v4120_v44 }
 0x28c   : > { %v4216_v11 = vunpack.c.l.bf16 %v4152_v15  ;;  %v4069_v51 = vpop.f32.mrf.mxu0 }
 0x28d   : > { %v3671_v49 = vpop.f32.mrf.mxu3  ;;  %v2732_v39 = vpop.f32.mrf.mxu1 }
 0x28e   : > { %v4247_v56 = vadd.f32 %v4246_v52, %v4216_v11  ;;  %v4285_v3 = vmul.f32 %v4216_v11, %v4216_v11  ;;  %v3723_v25 = vadd.f32 %v3671_v49, %v3069_v12  ;;  %v2781_v53 = vadd.f32 %v2732_v39, %v6178_v32 }
 0x290   : > { %v4316_v59 = vadd.f32 %v4315_v6, %v4285_v3  ;;  %v4121_v58 = vadd.f32 %v4069_v51, %v3723_v25  ;;  %v3020_v7 = vpop.f32.mrf.mxu2 }
 0x291   : > { %v3070_v37 = vadd.f32 %v3020_v7, %v2780_v14 }
 0x292   : > { %v4153_v5 = vpack.c.bf16 %v4121_v58, %v4121_v58  ;;  %v5162_v62 = vpack.c.bf16 %v4121_v58, %v4120_v44 }
 0x294   : > { %5202 = vst [vmem:[%s6416_s18 + $0x48] sm:$0xff] %v5162_v62   ;;  %v4217_v26 = vunpack.c.l.bf16 %v4153_v5  ;;  %v4072_v35 = vpop.f32.mrf.mxu0 }
 0x295   : > { %v3674_v8 = vpop.f32.mrf.mxu3  ;;  %v2735_v60 = vpop.f32.mrf.mxu1 }
 0x296   : > { %v4248_v23 = vadd.f32 %v4247_v56, %v4217_v26  ;;  %v4286_v36 = vmul.f32 %v4217_v26, %v4217_v26  ;;  %v3724_v57 = vadd.f32 %v3674_v8, %v3070_v37  ;;  %v2782_v38 = vadd.f32 %v2735_v60, %v6198_v27 }
 0x298   : > { %v4317_v50 = vadd.f32 %v4316_v59, %v4286_v36  ;;  %v4122_v54 = vadd.f32 %v4072_v35, %v3724_v57  ;;  %v3022_v16 = vpop.f32.mrf.mxu2 }
 0x299   : > { %v3071_v0 = vadd.f32 %v3022_v16, %v2781_v53 }
 0x29a   : > { %v4154_v30 = vpack.c.bf16 %v4122_v54, %v4122_v54 }
 0x29c   : > { %v4218_v42 = vunpack.c.l.bf16 %v4154_v30  ;;  %v4074_v48 = vpop.f32.mrf.mxu0 }
 0x29d   : > { %v3676_v34 = vpop.f32.mrf.mxu3  ;;  %v2737_v17 = vpop.f32.mrf.mxu1 }
 0x29e   : > { %v4249_v10 = vadd.f32 %v4248_v23, %v4218_v42  ;;  %v4287_v22 = vmul.f32 %v4218_v42, %v4218_v42  ;;  %v3725_v63 = vadd.f32 %v3676_v34, %v3071_v0  ;;  %v2783_v6 = vadd.f32 %v2737_v17, %v6217_v45 }
 0x2a0   : > { %v4318_v41 = vadd.f32 %v4317_v50, %v4287_v22  ;;  %v4123_v9 = vadd.f32 %v4074_v48, %v3725_v63  ;;  %v3025_v18 = vpop.f32.mrf.mxu2 }
 0x2a1   : > { %v3072_v40 = vadd.f32 %v3025_v18, %v2782_v38 }
 0x2a2   : > { %v4155_v1 = vpack.c.bf16 %v4123_v9, %v4123_v9  ;;  %v5167_v31 = vpack.c.bf16 %v4123_v9, %v4122_v54 }
 0x2a4   : > { %5203 = vst [vmem:[%s6416_s18 + $0x50] sm:$0xff] %v5167_v31   ;;  %v4219_v32 = vunpack.c.l.bf16 %v4155_v1  ;;  %v4077_v13 = vpop.f32.mrf.mxu0 }
 0x2a5   : > { %v3679_v24 = vpop.f32.mrf.mxu3  ;;  %v2740_v61 = vpop.f32.mrf.mxu1 }
 0x2a6   : > { %v4250_v43 = vadd.f32 %v4249_v10, %v4219_v32  ;;  %v4288_v29 = vmul.f32 %v4219_v32, %v4219_v32  ;;  %v3726_v52 = vadd.f32 %v3679_v24, %v3072_v40  ;;  %v2784_v25 = vadd.f32 %v2740_v61, %v6237_v2 }
 0x2a8   : > { %v4319_v21 = vadd.f32 %v4318_v41, %v4288_v29  ;;  %v4124_v19 = vadd.f32 %v4077_v13, %v3726_v52  ;;  %v3027_v44 = vpop.f32.mrf.mxu2 }
 0x2a9   : > { %v3073_v27 = vadd.f32 %v3027_v44, %v2783_v6 }
 0x2aa   : > { %v4156_v4 = vpack.c.bf16 %v4124_v19, %v4124_v19 }
 0x2ac   : > { %v4220_v20 = vunpack.c.l.bf16 %v4156_v4  ;;  %v4079_v15 = vpop.f32.mrf.mxu0 }
 0x2ad   : > { %v3681_v12 = vpop.f32.mrf.mxu3  ;;  %v2742_v11 = vpop.f32.mrf.mxu1 }
 0x2ae   : > { %v4251_v51 = vadd.f32 %v4250_v43, %v4220_v20  ;;  %v4289_v49 = vmul.f32 %v4220_v20, %v4220_v20  ;;  %v3727_v39 = vadd.f32 %v3681_v12, %v3073_v27  ;;  %v2785_v36 = vadd.f32 %v2742_v11, %v6256_v46 }
 0x2b0   : > { %v4320_v56 = vadd.f32 %v4319_v21, %v4289_v49  ;;  %v4125_v3 = vadd.f32 %v4079_v15, %v3727_v39  ;;  %v3030_v59 = vpop.f32.mrf.mxu2 }
 0x2b1   : > { %v3074_v7 = vadd.f32 %v3030_v59, %v2784_v25 }
 0x2b2   : > { %v4157_v58 = vpack.c.bf16 %v4125_v3, %v4125_v3  ;;  %v5172_v14 = vpack.c.bf16 %v4125_v3, %v4124_v19 }
 0x2b4   : > { %5204 = vst [vmem:[%s6416_s18 + $0x58] sm:$0xff] %v5172_v14   ;;  %v4221_v45 = vunpack.c.l.bf16 %v4157_v58  ;;  %v4082_v5 = vpop.f32.mrf.mxu0 }
 0x2b5   : > { %v3684_v62 = vpop.f32.mrf.mxu3  ;;  %v2745_v37 = vpop.f32.mrf.mxu1 }
 0x2b6   : > { %v4252_v26 = vadd.f32 %v4251_v51, %v4221_v45  ;;  %v4290_v35 = vmul.f32 %v4221_v45, %v4221_v45  ;;  %v3728_v8 = vadd.f32 %v3684_v62, %v3074_v7  ;;  %v2786_v10 = vadd.f32 %v2745_v37, %v6276_v33  ;;  %v6684_v45 = vld [vmem:[#allocation4_spill] sm:$0xff] }
 0x2b8   : > { %v4321_v60 = vadd.f32 %v4320_v56, %v4290_v35  ;;  %v4126_v23 = vadd.f32 %v4082_v5, %v3728_v8  ;;  %v3032_v57 = vpop.f32.mrf.mxu2 }
 0x2b9   : > { %v3075_v2 = vadd.f32 %v3032_v57, %v2785_v36 }
 0x2ba   : > { %v4158_v50 = vpack.c.bf16 %v4126_v23, %v4126_v23 }
 0x2bc   : > { %v4222_v54 = vunpack.c.l.bf16 %v4158_v50  ;;  %v4084_v53 = vpop.f32.mrf.mxu0 }
 0x2bd   : > { %v3686_v16 = vpop.f32.mrf.mxu3  ;;  %v2747_v30 = vpop.f32.mrf.mxu1 }
 0x2be   : > { %v4253_v0 = vadd.f32 %v4252_v26, %v4222_v54  ;;  %v4291_v42 = vmul.f32 %v4222_v54, %v4222_v54  ;;  %v3729_v48 = vadd.f32 %v3686_v16, %v3075_v2  ;;  %v2787_v61 = vadd.f32 %v2747_v30, %v6298_v47  ;;  %v6685_v54 = vld [vmem:[#allocation5_spill] sm:$0xff] }
 0x2c0   : > { %v4322_v34 = vadd.f32 %v4321_v60, %v4291_v42  ;;  %v4127_v17 = vadd.f32 %v4084_v53, %v3729_v48  ;;  %v3035_v22 = vpop.f32.mrf.mxu2 }
 0x2c1   : > { %v3076_v9 = vadd.f32 %v3035_v22, %v2786_v10 }
 0x2c2   : > { %v4159_v63 = vpack.c.bf16 %v4127_v17, %v4127_v17  ;;  %v5177_v41 = vpack.c.bf16 %v4127_v17, %v4126_v23 }
 0x2c4   : > { %5205 = vst [vmem:[%s6416_s18 + $0x60] sm:$0xff] %v5177_v41   ;;  %v4223_v46 = vunpack.c.l.bf16 %v4159_v63  ;;  %v4087_v38 = vpop.f32.mrf.mxu0 }
 0x2c5   : > { %v3689_v18 = vpop.f32.mrf.mxu3  ;;  %v2750_v32 = vpop.f32.mrf.mxu1 }
 0x2c6   : > { %v4254_v1 = vadd.f32 %v4253_v0, %v4223_v46  ;;  %v4292_v31 = vmul.f32 %v4223_v46, %v4223_v46  ;;  %v3730_v40 = vadd.f32 %v3689_v18, %v3076_v9  ;;  %v2788_v15 = vadd.f32 %v2750_v32, %v6315_v28 }
 0x2c8   : > { %v4323_v13 = vadd.f32 %v4322_v34, %v4292_v31  ;;  %v4128_v24 = vadd.f32 %v4087_v38, %v3730_v40  ;;  %v3037_v43 = vpop.f32.mrf.mxu2 }
 0x2c9   : > { %v3077_v33 = vadd.f32 %v3037_v43, %v2787_v61 }
 0x2ca   : > { %v4160_v29 = vpack.c.bf16 %v4128_v24, %v4128_v24 }
 0x2cc   : > { %v4224_v52 = vunpack.c.l.bf16 %v4160_v29  ;;  %v4089_v21 = vpop.f32.mrf.mxu0 }
 0x2cd   : > { %v3691_v19 = vpop.f32.mrf.mxu3  ;;  %v2752_v11 = vpop.f32.mrf.mxu1 }
 0x2ce   : > { %v4255_v6 = vadd.f32 %v4254_v1, %v4224_v52  ;;  %v4293_v44 = vmul.f32 %v4224_v52, %v4224_v52  ;;  %v3731_v4 = vadd.f32 %v3691_v19, %v3077_v33  ;;  %v2789_v5 = vadd.f32 %v2752_v11, %v6684_v45 }
 0x2d0   : > { %v4324_v27 = vadd.f32 %v4323_v13, %v4293_v44  ;;  %v4129_v20 = vadd.f32 %v4089_v21, %v3731_v4  ;;  %v3040_v12 = vpop.f32.mrf.mxu2 }
 0x2d1   : > { %v3078_v39 = vadd.f32 %v3040_v12, %v2788_v15 }
 0x2d2   : > { %v4161_v51 = vpack.c.bf16 %v4129_v20, %v4129_v20  ;;  %v5182_v49 = vpack.c.bf16 %v4129_v20, %v4128_v24 }
 0x2d4   : > { %5206 = vst [vmem:[%s6416_s18 + $0x68] sm:$0xff] %v5182_v49   ;;  %v4225_v47 = vunpack.c.l.bf16 %v4161_v51  ;;  %v4092_v56 = vpop.f32.mrf.mxu0 }
 0x2d5   : > { %v3694_v3 = vpop.f32.mrf.mxu3  ;;  %v2755_v26 = vpop.f32.mrf.mxu1 }
 0x2d6   : > { %v4256_v25 = vadd.f32 %v4255_v6, %v4225_v47  ;;  %v4294_v59 = vmul.f32 %v4225_v47, %v4225_v47  ;;  %v3732_v58 = vadd.f32 %v3694_v3, %v3078_v39  ;;  %v2790_v53 = vadd.f32 %v2755_v26, %v6685_v54 }
 0x2d8   : > { %v4325_v14 = vadd.f32 %v4324_v27, %v4294_v59  ;;  %v4130_v7 = vadd.f32 %v4092_v56, %v3732_v58  ;;  %v3042_v62 = vpop.f32.mrf.mxu2 }
 0x2d9   : > { %v3079_v28 = vadd.f32 %v3042_v62, %v2789_v5 }
 0x2da   : > { %v4162_v37 = vpack.c.bf16 %v4130_v7, %v4130_v7 }
 0x2dc   : > { %v4226_v35 = vunpack.c.l.bf16 %v4162_v37  ;;  %v4094_v8 = vpop.f32.mrf.mxu0 }
 0x2dd   : > { %v3696_v60 = vpop.f32.mrf.mxu3  ;;  %v2757_v34 = vpop.f32.mrf.mxu1 }
 0x2de   : > { %v4257_v23 = vadd.f32 %v4256_v25, %v4226_v35  ;;  %v4295_v36 = vmul.f32 %v4226_v35, %v4226_v35  ;;  %v3733_v57 = vadd.f32 %v3696_v60, %v3079_v28  ;;  %v2791_v38 = vadd.f32 %v2757_v34, %v6379_v55 }
 0x2e0   : > { %v4326_v50 = vadd.f32 %v4325_v14, %v4295_v36  ;;  %v4131_v2 = vadd.f32 %v4094_v8, %v3733_v57  ;;  %v3045_v16 = vpop.f32.mrf.mxu2 }
 0x2e1   : > { %v3080_v42 = vadd.f32 %v3045_v16, %v2790_v53 }
 0x2e2   : > { %v4163_v30 = vpack.c.bf16 %v4131_v2, %v4131_v2  ;;  %v5187_v0 = vpack.c.bf16 %v4131_v2, %v4130_v7 }
 0x2e4   : > { %5207 = vst [vmem:[%s6416_s18 + $0x70] sm:$0xff] %v5187_v0   ;;  %v4227_v48 = vunpack.c.l.bf16 %v4163_v30  ;;  %v4097_v17 = vpop.f32.mrf.mxu0 }
 0x2e5   : > { %v3699_v10 = vpop.f32.mrf.mxu3 }
 0x2e6   : > { %v4258_v22 = vadd.f32 %v4257_v23, %v4227_v48  ;;  %v4296_v63 = vmul.f32 %v4227_v48, %v4227_v48  ;;  %v3734_v41 = vadd.f32 %v3699_v10, %v3080_v42 }
 0x2e8   : > { %v4327_v9 = vadd.f32 %v4326_v50, %v4296_v63  ;;  %v4132_v46 = vadd.f32 %v4097_v17, %v3734_v41  ;;  %v3047_v18 = vpop.f32.mrf.mxu2 }
 0x2e9   : > { %v3081_v31 = vadd.f32 %v3047_v18, %v2791_v38 }
 0x2ea   : > { %v4164_v1 = vpack.c.bf16 %v4132_v46, %v4132_v46 }
 0x2ec   : > { %v4228_v40 = vunpack.c.l.bf16 %v4164_v1  ;;  %v4099_v43 = vpop.f32.mrf.mxu0 }
 0x2ed   : > { %v3701_v32 = vpop.f32.mrf.mxu3 }
 0x2ee   : > { %v4259_v13 = vadd.f32 %v4258_v22, %v4228_v40  ;;  %v4297_v24 = vmul.f32 %v4228_v40, %v4228_v40  ;;  %v3735_v61 = vadd.f32 %v3701_v32, %v3081_v31 }
 0x2f0   : > { %v4328_v29 = vadd.f32 %v4327_v9, %v4297_v24  ;;  %v4133_v33 = vadd.f32 %v4099_v43, %v3735_v61 }
 0x2f2   : > { %v4165_v52 = vpack.c.bf16 %v4133_v33, %v4133_v33  ;;  %v5192_v21 = vpack.c.bf16 %v4133_v33, %v4132_v46 }
 0x2f4   : > { %5208 = vst [vmem:[%s6416_s18 + $0x78] sm:$0xff] %v5192_v21   ;;  %v4229_v19 = vunpack.c.l.bf16 %v4165_v52 }
 0x2f6   : > { %v4260_v6 = vadd.f32 %v4259_v13, %v4229_v19  ;;  %v4298_v44 = vmul.f32 %v4229_v19, %v4229_v19 }
 0x2f8   : > { %v4261_v4 = vrot.slane %v4260_v6, 4  ;;  %v4329_v55 = vadd.f32 %v4328_v29, %v4298_v44 }
 0x2fa   : > { %v4262_v27 = vadd.f32 %v4261_v4, %v4260_v6  ;;  %v4330_v20 = vrot.slane %v4329_v55, 4 }
 0x2fc   : > { %v4263_v15 = vrot.slane %v4262_v27, 2  ;;  %v4331_v12 = vadd.f32 %v4330_v20, %v4329_v55 }
 0x2fe   : > { %v4264_v11 = vadd.f32 %v4263_v15, %v4262_v27  ;;  %v4332_v51 = vrot.slane %v4331_v12, 2 }
 0x300   : > { %v4265_v49 = vrot.slane %v4264_v11, 1  ;;  %v4333_v39 = vadd.f32 %v4332_v51, %v4331_v12 }
 0x302   : > { %v4334_v47 = vrot.slane %v4333_v39, 1  ;;  %v4266_v56 = vadd.f32 %v4265_v49, %v4264_v11 }
 0x304   : > { %v4335_v3 = vadd.f32 %v4334_v47, %v4333_v39 }
 0x306   : > { %v4337_v25 = vsel %vm4336_vm8, %v4266_v56, %v4335_v3 }
 0x307   : > { %4338 = vst [vmem:[%s210_s22] sm:$0x3] %v4337_v25 }
 0x308 PF: > { %s14_s14 = sadd.s32 1, %s5309_s14   ;;  %s6686_s12 = smov %s5305_s13 }
 0x309   : > { %p11_p5 = scmp.ge.s32.totalorder %s14_s14, 4   ;;  %s6687_s13 = smov %s6689_s15 }
 0x30b   :  { %13 = sbr.rel (!%p11_p5) target bundleno = 2 (0x2), region = 81 }

</bundles_post_ra>
